<compile_context>
chip_gen: v7x
topology: tpu7x:2x2x1
jax: 0.10.0
libtpu: 0.0.40
codegen_flags: <defaults>
</compile_context>

<pallas_src>
import math

import jax
import jax.numpy as jnp
from jax import lax
from jax.experimental import pallas as pl
from jax.experimental.pallas import tpu as pltpu


_LANES = 512                 # lane-dense last dim (multiple of 128)
_MAX_BLOCK_ROWS = 2048       # 2048 x 512 x 4 B = 4 MiB per f32 input block/step
_MIN_KERNEL_BYTES = 1 << 20  # below ~1 MiB fused XLA beats pallas_call overhead


def _round_up(x, m):
    return ((x + m - 1) // m) * m


def _cdiv(a, b):
    return (a + b - 1) // b


def _num_tensorcores():
    """Best-effort TensorCores-per-chip (2 on v7x megacore, else 1)."""
    names = ("num_cores", "core_count", "num_tensorcores",
             "num_tensor_cores", "tensor_cores_per_chip")
    try:
        info = pltpu.get_tpu_info()
        for name in names:
            v = getattr(info, name, None)
            if isinstance(v, int) and 1 <= v <= 8:
                return v
    except Exception:
        pass
    try:
        v = getattr(jax.devices()[0], "num_cores", None)
        if isinstance(v, int) and 1 <= v <= 8:
            return v
    except Exception:
        pass
    return 1


def _make_l1_sum_kernel(steps, block_rows, rows, need_mask):
    """Builds the kernel for one static tiling configuration."""
    groups = block_rows // 8  # block_rows is always a multiple of 8 here

    def kernel(q_ref, p_ref, o_ref, acc_ref):
        # q_ref, p_ref : (block_rows, _LANES) VMEM input tiles
        # o_ref        : (1, 1) SMEM partial sum for the current partition
        # acc_ref      : (8, _LANES) f32 VMEM accumulator (constant 16 KiB)
        pi = pl.program_id(0)   # megacore "parallel" partition
        si = pl.program_id(1)   # reduction step ("arbitrary")

        @pl.when(si == 0)
        def _():
            acc_ref[...] = jnp.zeros_like(acc_ref)

        # Upcast after load: HBM traffic stays in the input dtype (bf16 halves
        # bytes moved); compute + accumulation in f32 (needed on v5e).
        d = jnp.abs(q_ref[...].astype(jnp.float32) -
                    p_ref[...].astype(jnp.float32))

        if need_mask:
            # Zero rows past the logical end of the flattened input.  The
            # out-of-range part of the (possibly clamped) block holds undefined
            # data and must not reach the accumulator.
            start = (pi * steps + si) * block_rows
            valid = rows - start                       # <=0 (all) .. >=block_rows (none)
            row_ids = lax.broadcasted_iota(jnp.int32, (block_rows, _LANES), 0)
            d = jnp.where(row_ids < valid, d, 0.0)

        # Fold block_rows -> 8 sublanes with pure cross-vreg VALU adds:
        # no per-step XLU reduce, accumulator size independent of block size.
        acc_ref[...] += jnp.sum(d.reshape(groups, 8, _LANES), axis=0)

        # One cross-lane (XLU) reduction per partition, at its final step only.
        @pl.when(si == pl.num_programs(1) - 1)
        def _():
            o_ref[0, 0] = jnp.sum(acc_ref[...])

    return kernel


def self_perceptual_loss(query, positive_key, ids=None):
    """Pallas implementation of selfPerceptualLoss.forward.

    query, positive_key: [N, C, H, W] stacks of feature maps.  `ids` is unused,
    matching the reference.  Returns float32: sum_i mean(|query[i]-positive[i]|).
    """
    assert query.shape == positive_key.shape
    per_item = int(math.prod(query.shape[1:])) if query.ndim > 1 else 1
    total = int(math.prod(query.shape))
    itemsize = jnp.dtype(query.dtype).itemsize

    # Fallback: tiny inputs (pallas_call fixed cost dominates) or flat sizes
    # that cannot form a (rows, 512) view with rows % 8 == 0 without a pad copy.
    if total * itemsize < _MIN_KERNEL_BYTES or total % (8 * _LANES) != 0:
        d = jnp.abs(query.astype(jnp.float32) - positive_key.astype(jnp.float32))
        return (jnp.sum(d) / jnp.float32(per_item)).astype(jnp.float32)

    # ---- lane-dense 2-D view: contiguous reshape only, NO pad / slice copy ----
    rows = total // _LANES                      # multiple of 8 by the check above
    q2 = query.reshape(rows, _LANES)
    p2 = positive_key.reshape(rows, _LANES)

    # ---- static tiling math (python ints) ------------------------------------
    block_rows = min(_MAX_BLOCK_ROWS, rows)
    blocks = _cdiv(rows, block_rows)
    p_parts = 2 if (_num_tensorcores() >= 2 and blocks >= 2) else 1
    steps = _cdiv(blocks, p_parts)
    if p_parts > 1:
        # Balance the two TensorCores: shrink block_rows so both partitions get
        # (nearly) equal work and the masked overhang is a few rows, not a block.
        block_rows = min(block_rows, _round_up(_cdiv(rows, p_parts * steps), 8))
        blocks = _cdiv(rows, block_rows)
    need_mask = (p_parts * steps * block_rows != rows)
    last_block = blocks - 1

    if p_parts * steps == blocks:
        in_map = lambda pi, si: (pi * steps + si, 0)
    else:
        # Clamp fully-out-of-range steps onto the last real block (their rows
        # are masked to zero in-kernel) so every DMA stays in bounds.
        in_map = lambda pi, si: (jnp.minimum(pi * steps + si, last_block), 0)

    in_block_bytes = block_rows * _LANES * itemsize
    # Scale the scoped-VMEM limit with the block size; stay under v7x's 64 MiB.
    vmem_limit = int(min(48 * 1024 * 1024, 4 * in_block_bytes + 24 * 1024 * 1024))

    kernel = _make_l1_sum_kernel(steps, block_rows, rows, need_mask)

    partials = pl.pallas_call(
        kernel,
        out_shape=jax.ShapeDtypeStruct((p_parts, 1), jnp.float32),
        grid_spec=pltpu.PrefetchScalarGridSpec(
            num_scalar_prefetch=0,
            grid=(p_parts, steps),
            in_specs=[
                pl.BlockSpec((block_rows, _LANES), in_map),
                pl.BlockSpec((block_rows, _LANES), in_map),
            ],
            out_specs=pl.BlockSpec(
                (1, 1), lambda pi, si: (pi, 0), memory_space=pltpu.SMEM
            ),
            scratch_shapes=[pltpu.VMEM((8, _LANES), jnp.float32)],
        ),
        compiler_params=pltpu.CompilerParams(
            dimension_semantics=("parallel", "arbitrary"),
            vmem_limit_bytes=vmem_limit,
        ),
        cost_estimate=pl.CostEstimate(
            flops=3 * total,
            transcendentals=0,
            bytes_accessed=2 * total * itemsize + 4 * p_parts,
        ),
    )(q2, p2)

    # Division by C*H*W hoisted out of the kernel (valid for a uniform stack):
    # sum_i mean_i == (sum of all |diff|) / (C*H*W).
    return (jnp.sum(partials) / jnp.float32(per_item)).astype(jnp.float32)


if __name__ == "__main__":
    def ref_loss(q, p):
        axes = tuple(range(1, q.ndim))
        return jnp.sum(jnp.mean(
            jnp.abs(q.astype(jnp.float32) - p.astype(jnp.float32)), axis=axes))

    key = jax.random.PRNGKey(0)
    cases = [
        (2, 4, 16, 16),     # tiny: fused-XLA fallback path (module example size)
        (2, 64, 64, 64),    # kernel path, single block   (rows = 1024)
        (8, 64, 64, 64),    # kernel path, multiple blocks (rows = 4096)
        (1, 8, 257, 512),   # kernel path, ragged tail -> in-kernel masking (rows = 2056)
    ]
    for shape in cases:
        key, k1, k2 = jax.random.split(key, 3)
        q = jax.random.normal(k1, shape, dtype=jnp.float32)
        p = jax.random.normal(k2, shape, dtype=jnp.float32)
        loss = jax.block_until_ready(self_perceptual_loss(q, p, None))
        ref = jax.block_until_ready(ref_loss(q, p))
        assert jnp.allclose(loss, ref, rtol=2e-4, atol=1e-5), (shape, loss, ref)

    print("KERNEL_OK")
</pallas_src>

<mosaic_0001>
module attributes {stable_mosaic.version = 11 : i64} {
  func.func @kernel(%arg0: i32, %arg1: i32, %arg2: memref<1024x512xf32, #tpu.memory_space<vmem>>, %arg3: memref<1024x512xf32, #tpu.memory_space<vmem>>, %arg4: memref<1x1xf32, #tpu.memory_space<smem>>, %arg5: memref<8x512xf32, #tpu.memory_space<vmem>>) attributes {dimension_semantics = [#tpu.dimension_semantics<parallel>, #tpu.dimension_semantics<arbitrary>], iteration_bounds = array<i64: 1, 1>, scalar_prefetch = 0 : i64, scratch_operands = 1 : i64, tpu.core_type = #tpu.core_type<tc>, window_params = [{transform_indices = @transform_0, window_bounds = array<i64: 1024, 512>}, {transform_indices = @transform_1, window_bounds = array<i64: 1024, 512>}, {transform_indices = @transform_2, window_bounds = array<i64: 1, 1>}]} {
    %c0_i32 = arith.constant 0 : i32
    %0 = arith.cmpi eq, %arg1, %c0_i32 : i32
    %1 = arith.extui %0 : i1 to i32
    %c0_i32_0 = arith.constant 0 : i32
    %2 = arith.cmpi ne, %1, %c0_i32_0 : i32
    scf.if %2 {
      %cst_10 = arith.constant 0.000000e+00 : f32
      %15 = vector.broadcast %cst_10 : f32 to vector<8x512xf32>
      %c0_11 = arith.constant 0 : index
      %c0_12 = arith.constant 0 : index
      %16 = vector.load %arg5[%c0_11, %c0_12] : memref<8x512xf32, #tpu.memory_space<vmem>>, vector<8x512xf32>
      tpu.vector_store %arg5[%c0_11, %c0_12], %15 {strides = array<i32>} : memref<8x512xf32, #tpu.memory_space<vmem>>, vector<8x512xf32>,
    } else {
    }
    %c0 = arith.constant 0 : index
    %c0_1 = arith.constant 0 : index
    %3 = vector.load %arg2[%c0, %c0_1] : memref<1024x512xf32, #tpu.memory_space<vmem>>, vector<1024x512xf32>
    %c0_2 = arith.constant 0 : index
    %c0_3 = arith.constant 0 : index
    %4 = vector.load %arg3[%c0_2, %c0_3] : memref<1024x512xf32, #tpu.memory_space<vmem>>, vector<1024x512xf32>
    %5 = arith.subf %3, %4 : vector<1024x512xf32>
    %6 = math.absf %5 : vector<1024x512xf32>
    %c0_4 = arith.constant 0 : index
    %c0_5 = arith.constant 0 : index
    %7 = vector.load %arg5[%c0_4, %c0_5] : memref<8x512xf32, #tpu.memory_space<vmem>>, vector<8x512xf32>
    %8 = vector.shape_cast %6 : vector<1024x512xf32> to vector<128x8x512xf32>
    %cst = arith.constant dense<0.000000e+00> : vector<8x512xf32>
    %9 = vector.multi_reduction <add>, %8, %cst [0] : vector<128x8x512xf32> to vector<8x512xf32>
    %10 = arith.addf %7, %9 : vector<8x512xf32>
    %c0_6 = arith.constant 0 : index
    %c0_7 = arith.constant 0 : index
    %11 = vector.load %arg5[%c0_6, %c0_7] : memref<8x512xf32, #tpu.memory_space<vmem>>, vector<8x512xf32>
    tpu.vector_store %arg5[%c0_6, %c0_7], %10 {strides = array<i32>} : memref<8x512xf32, #tpu.memory_space<vmem>>, vector<8x512xf32>,
    %c0_i32_8 = arith.constant 0 : i32
    %12 = arith.cmpi eq, %arg1, %c0_i32_8 : i32
    %13 = arith.extui %12 : i1 to i32
    %c0_i32_9 = arith.constant 0 : i32
    %14 = arith.cmpi ne, %13, %c0_i32_9 : i32
    scf.if %14 {
      %c0_10 = arith.constant 0 : index
      %c0_11 = arith.constant 0 : index
      %15 = vector.load %arg5[%c0_10, %c0_11] : memref<8x512xf32, #tpu.memory_space<vmem>>, vector<8x512xf32>
      %16 = vector.shape_cast %15 : vector<8x512xf32> to vector<1x8x512xf32>
      %cst_12 = arith.constant dense<0.000000e+00> : vector<1xf32>
      %17 = vector.multi_reduction <add>, %16, %cst_12 [1, 2] : vector<1x8x512xf32> to vector<1xf32>
      %18 = vector.shape_cast %17 : vector<1xf32> to vector<1x1x1xf32>
      %19 = vector.extract %18[0, 0, 0] : f32 from vector<1x1x1xf32>
      %c0_13 = arith.constant 0 : index
      %c0_14 = arith.constant 0 : index
      %20 = memref.load %arg4[%c0_13, %c0_14] : memref<1x1xf32, #tpu.memory_space<smem>>
      memref.store %19, %arg4[%c0_13, %c0_14] : memref<1x1xf32, #tpu.memory_space<smem>>
    } else {
    }
    return
  }
  func.func @transform_0(%arg0: i32, %arg1: i32) -> (i32, i32) {
    %c1_i32 = arith.constant 1 : i32
    %0 = arith.muli %arg0, %c1_i32 : i32
    %1 = arith.addi %0, %arg1 : i32
    %c0_i32 = arith.constant 0 : i32
    %c0_i32_0 = arith.constant 0 : i32
    return %1, %c0_i32 : i32, i32
  }
  func.func @transform_1(%arg0: i32, %arg1: i32) -> (i32, i32) {
    %c1_i32 = arith.constant 1 : i32
    %0 = arith.muli %arg0, %c1_i32 : i32
    %1 = arith.addi %0, %arg1 : i32
    %c0_i32 = arith.constant 0 : i32
    %c0_i32_0 = arith.constant 0 : i32
    return %1, %c0_i32 : i32, i32
  }
  func.func @transform_2(%arg0: i32, %arg1: i32) -> (i32, i32) {
    %c0_i32 = arith.constant 0 : i32
    %c0_i32_0 = arith.constant 0 : i32
    return %arg0, %c0_i32 : i32, i32
  }
}

</mosaic_0001>

<bundles_post_ra>
// kernel: tpu_custom_call.1
= control target key start
LH: loop header
LB: loop body
LE: loop exit
PB: predicated region body
PF: predicated region fallthrough
CT: control target
= control target key end

     0   :  { %7 = vsyncpa [#allocation4], 0  ;;  %s6377_s0 = inlined_call_operand.hbm [shape: f32[1024,512], index: 0, kind: input, shape index: {}]   ;;  %s6378_s1 = inlined_call_operand.hbm [shape: f32[1024,512], index: 1, kind: input, shape index: {}]   ;;  %s6379_s2 = inlined_call_operand.hbm [shape: f32[1,1], index: 2, kind: output, shape index: {}]  }
   0x1   :  { %8 = vsyncpa [#allocation7], 0 }
   0x2   :  { %9 = vsyncpa [#allocation5], 0  ;;  %s2733_s9 = smov [#allocation3]   ;;  %s2673_s13 = scalar_lea.hbm %s6377_s0, 65536 }
   0x3   :  { %s20_s10 = sshll.u32 %s2733_s9, 4  ;;  %p2674_p0 = scmp.ne.s32.totalorder %s6377_s0, %s2673_s13  ;;  %s21_s10 = int_to_ptr.vmem [resolvable:$true] %s20_s10 }
   0x4   :  { %p2677_p1 = scmp.lt.u32.totalorder %s2673_s13, %s6377_s0 }
   0x6   :  { %p2679_p2 = pnand %p2677_p1, %p2674_p0 }
   0x8   :  { %2682 = shalt.err (!%p2679_p2)
}
   0x9   :  { %s2683_s18 = scalar_lea.vmem %s21_s10, 65536  ;;  %p2688_p4 = scmp.lt.s32.totalorder %s21_s10, %s21_s10 }
   0xa   :  { %p2684_p3 = scmp.ne.s32.totalorder %s21_s10, %s2683_s18  ;;  %p2689_p5 = scmp.lt.s32.totalorder %s2683_s18, %s2683_s18 }
   0xc   :  { %p2690_p6 = por %p2689_p5, %p2688_p4 }
   0xe   :  { %p2691_p7 = pnand %p2690_p6, %p2684_p3 }
  0x10   :  { %2694 = shalt.err (!%p2691_p7)
}
  0x11   :  { %s2734_s19 = smov 512   ;;  %s2735_s20 = smov 32  }
  0x12   :  { %26 = dma.hbm_to_vmem [thread:$0]  %s6377_s0, 65536, %s21_s10, [#allocation4], %s2734_s19, %s2734_s19, %s2735_s20  }
  0x13   :  { %s2736_s23 = smov [#allocation6]   ;;  %s2695_s27 = scalar_lea.hbm %s6378_s1, 65536 }
  0x14   :  { %s37_s24 = sshll.u32 %s2736_s23, 4  ;;  %p2696_p8 = scmp.ne.s32.totalorder %s6378_s1, %s2695_s27  ;;  %s38_s24 = int_to_ptr.vmem [resolvable:$true] %s37_s24 }
  0x15   :  { %p2699_p9 = scmp.lt.u32.totalorder %s2695_s27, %s6378_s1 }
  0x17   :  { %p2701_p10 = pnand %p2699_p9, %p2696_p8 }
  0x19   :  { %2704 = shalt.err (!%p2701_p10)
}
  0x1a   :  { %s2705_s4 = scalar_lea.vmem %s38_s24, 65536  ;;  %p2710_p12 = scmp.lt.s32.totalorder %s38_s24, %s38_s24 }
  0x1b   :  { %p2706_p11 = scmp.ne.s32.totalorder %s38_s24, %s2705_s4  ;;  %p2711_p13 = scmp.lt.s32.totalorder %s2705_s4, %s2705_s4 }
  0x1d   :  { %p2712_p0 = por %p2711_p13, %p2710_p12 }
  0x1f   :  { %p2713_p1 = pnand %p2712_p0, %p2706_p11 }
  0x21   :  { %2716 = shalt.err (!%p2713_p1)
}
  0x22   :  { %43 = dma.hbm_to_vmem [thread:$0]  %s6378_s1, 65536, %s38_s24, [#allocation7], %s2734_s19, %s2734_s19, %s2735_s20  }
  0x23   :  { %2727 = dma.done.wait [#allocation4], 65536  }
  0x24   :  { %2728 = vsyncadd [#allocation4], 4294901760 }
  0x25   :  { %2729 = dma.done.wait [#allocation7], 65536  }
  0x26   :  { %2730 = vsyncadd [#allocation7], 4294901760  ;;  %v62_v0 = vld [vmem:[#allocation3] sm:$0xff]  ;;  %v63_v1 = vld [vmem:[#allocation3 + $0x8] sm:$0xff]  ;;  %s2717_s8 = scalar_lea.hbm %s6379_s2, 16 }
  0x27   :  { %v574_v2 = vld [vmem:[#allocation6] sm:$0xff]  ;;  %v64_v3 = vld [vmem:[#allocation3 + $0x10] sm:$0xff]  ;;  %v2777_v4 = vld [vmem:[#allocation3 + $0x18] sm:$0xff]  ;;  %p2718_p2 = scmp.ne.s32.totalorder %s6379_s2, %s2717_s8  ;;  %p2721_p3 = scmp.lt.u32.totalorder %s2717_s8, %s6379_s2 }
  0x28   :  { %v575_v5 = vld [vmem:[#allocation6 + $0x8] sm:$0xff]  ;;  %v2779_v6 = vld [vmem:[#allocation3 + $0x20] sm:$0xff]  ;;  %v2783_v8 = vld [vmem:[#allocation3 + $0x30] sm:$0xff]  ;;  %v1086_v14 = vsub.f32 %v62_v0, %v574_v2 }
  0x29   :  { %v2781_v7 = vld [vmem:[#allocation3 + $0x28] sm:$0xff]  ;;  %v576_v9 = vld [vmem:[#allocation6 + $0x10] sm:$0xff]  ;;  %v2785_v10 = vld [vmem:[#allocation3 + $0x38] sm:$0xff]  ;;  %v1087_v21 = vsub.f32 %v63_v1, %v575_v5  ;;  %p2723_p4 = pnand %p2721_p3, %p2718_p2 }
  0x2a   :  { %v2787_v11 = vld [vmem:[#allocation3 + $0x40] sm:$0xff]  ;;  %v2789_v12 = vld [vmem:[#allocation3 + $0x48] sm:$0xff]  ;;  %v577_v13 = vld [vmem:[#allocation6 + $0x18] sm:$0xff]  ;;  %v1088_v28 = vsub.f32 %v64_v3, %v576_v9  ;;  %v2846_v45 = vand.u32 2147483647, %v1086_v14 }
  0x2b   :  { %v2791_v15 = vld [vmem:[#allocation3 + $0x50] sm:$0xff]  ;;  %v2793_v16 = vld [vmem:[#allocation3 + $0x58] sm:$0xff]  ;;  %v2795_v17 = vld [vmem:[#allocation3 + $0x60] sm:$0xff]  ;;  %v1089_v35 = vsub.f32 %v2777_v4, %v577_v13  ;;  %v2866_v55 = vand.u32 2147483647, %v1087_v21 }
  0x2c   :  { %v2797_v18 = vld [vmem:[#allocation6 + $0x20] sm:$0xff]  ;;  %v2799_v19 = vld [vmem:[#allocation6 + $0x28] sm:$0xff]  ;;  %v2801_v20 = vld [vmem:[#allocation6 + $0x30] sm:$0xff]  ;;  %6865 = vst [vmem:[#allocation15_spill] sm:$0xff] %v2846_v45  ;;  %v2886_v1 = vand.u32 2147483647, %v1088_v28 }
  0x2d   :  { %v2803_v22 = vld [vmem:[#allocation3 + $0x68] sm:$0xff]  ;;  %v2805_v23 = vld [vmem:[#allocation3 + $0x70] sm:$0xff]  ;;  %v2807_v24 = vld [vmem:[#allocation3 + $0x78] sm:$0xff]  ;;  %v1090_v42 = vsub.f32 %v2779_v6, %v2797_v18  ;;  %v1091_v43 = vsub.f32 %v2781_v7, %v2799_v19  ;;  %v1092_v44 = vsub.f32 %v2783_v8, %v2801_v20  ;;  %6869 = vst [vmem:[#allocation19_spill] sm:$0xff] %v2866_v55  ;;  %v2906_v14 = vand.u32 2147483647, %v1089_v35 }
  0x2e   :  { %v2809_v25 = vld [vmem:[#allocation6 + $0x38] sm:$0xff]  ;;  %v2811_v26 = vld [vmem:[#allocation6 + $0x40] sm:$0xff]  ;;  %v2813_v27 = vld [vmem:[#allocation6 + $0x48] sm:$0xff]  ;;  %6874 = vst [vmem:[#allocation24_spill] sm:$0xff] %v2886_v1 }
  0x2f   :  { %v2815_v29 = vld [vmem:[#allocation3 + $0x80] sm:$0xff]  ;;  %v2817_v30 = vld [vmem:[#allocation3 + $0x88] sm:$0xff]  ;;  %v2819_v31 = vld [vmem:[#allocation3 + $0x90] sm:$0xff]  ;;  %6879 = vst [vmem:[#allocation29_spill] sm:$0xff] %v2906_v14  ;;  %v2926_v8 = vand.u32 2147483647, %v1090_v42  ;;  %v6902_v35 = vsub.f32 %v2785_v10, %v2809_v25 }
  0x30   :  { %6862 = vst [vmem:[#allocation12_spill] sm:$0xff] %v2819_v31  ;;  %v2821_v32 = vld [vmem:[#allocation6 + $0x50] sm:$0xff]  ;;  %v2823_v33 = vld [vmem:[#allocation6 + $0x58] sm:$0xff]  ;;  %v2825_v34 = vld [vmem:[#allocation6 + $0x60] sm:$0xff]  ;;  %v2946_v9 = vand.u32 2147483647, %v1091_v43 }
  0x31   :  { %v2828_v36 = vld [vmem:[#allocation3 + $0x98] sm:$0xff]  ;;  %v2830_v37 = vld [vmem:[#allocation3 + $0xa0] sm:$0xff]  ;;  %v2832_v38 = vld [vmem:[#allocation3 + $0xa8] sm:$0xff]  ;;  %6885 = vst [vmem:[#allocation35_spill] sm:$0xff] %v2926_v8  ;;  %v2966_v13 = vand.u32 2147483647, %v1092_v44 }
  0x32   :  { %6863 = vst [vmem:[#allocation13_spill] sm:$0xff] %v2830_v37  ;;  %6864 = vst [vmem:[#allocation14_spill] sm:$0xff] %v2832_v38  ;;  %v2834_v39 = vld [vmem:[#allocation6 + $0x68] sm:$0xff]  ;;  %v2836_v40 = vld [vmem:[#allocation6 + $0x70] sm:$0xff] }
  0x33   :  { %v2838_v41 = vld [vmem:[#allocation6 + $0x78] sm:$0xff]  ;;  %v2848_v46 = vld [vmem:[#allocation3 + $0xb0] sm:$0xff]  ;;  %v2852_v48 = vld [vmem:[#allocation3 + $0xc0] sm:$0xff]  ;;  %6891 = vst [vmem:[#allocation41_spill] sm:$0xff] %v2946_v9 }
  0x34   :  { %v2850_v47 = vld [vmem:[#allocation3 + $0xb8] sm:$0xff]  ;;  %6867 = vst [vmem:[#allocation17_spill] sm:$0xff] %v2852_v48  ;;  %v2854_v49 = vld [vmem:[#allocation6 + $0x80] sm:$0xff]  ;;  %v2856_v50 = vld [vmem:[#allocation6 + $0x88] sm:$0xff] }
  0x35   :  { %6866 = vst [vmem:[#allocation16_spill] sm:$0xff] %v2850_v47  ;;  %v2858_v51 = vld [vmem:[#allocation6 + $0x90] sm:$0xff]  ;;  %v2868_v56 = vld [vmem:[#allocation3 + $0xc8] sm:$0xff]  ;;  %v2872_v58 = vld [vmem:[#allocation3 + $0xd8] sm:$0xff] }
  0x36   :  { %6868 = vst [vmem:[#allocation18_spill] sm:$0xff] %v2858_v51  ;;  %v2870_v57 = vld [vmem:[#allocation3 + $0xd0] sm:$0xff]  ;;  %6870 = vst [vmem:[#allocation20_spill] sm:$0xff] %v2872_v58  ;;  %v2874_v59 = vld [vmem:[#allocation6 + $0x98] sm:$0xff] }
  0x37   :  { %6871 = vst [vmem:[#allocation21_spill] sm:$0xff] %v2874_v59  ;;  %v2876_v60 = vld [vmem:[#allocation6 + $0xa0] sm:$0xff]  ;;  %v2878_v61 = vld [vmem:[#allocation6 + $0xa8] sm:$0xff]  ;;  %v2892_v4 = vld [vmem:[#allocation3 + $0xf0] sm:$0xff] }
  0x38   :  { %6872 = vst [vmem:[#allocation22_spill] sm:$0xff] %v2876_v60  ;;  %6873 = vst [vmem:[#allocation23_spill] sm:$0xff] %v2878_v61  ;;  %v2888_v2 = vld [vmem:[#allocation3 + $0xe0] sm:$0xff]  ;;  %v2890_v3 = vld [vmem:[#allocation3 + $0xe8] sm:$0xff] }
  0x39   :  { %6875 = vst [vmem:[#allocation25_spill] sm:$0xff] %v2890_v3  ;;  %6876 = vst [vmem:[#allocation26_spill] sm:$0xff] %v2892_v4  ;;  %v2894_v5 = vld [vmem:[#allocation6 + $0xb0] sm:$0xff]  ;;  %v2896_v6 = vld [vmem:[#allocation6 + $0xb8] sm:$0xff] }
  0x3a   :  { %6877 = vst [vmem:[#allocation27_spill] sm:$0xff] %v2896_v6  ;;  %v2898_v7 = vld [vmem:[#allocation6 + $0xc0] sm:$0xff]  ;;  %v2908_v18 = vld [vmem:[#allocation3 + $0xf8] sm:$0xff]  ;;  %v2912_v20 = vld [vmem:[#allocation3 + $0x108] sm:$0xff] }
  0x3b   :  { %6878 = vst [vmem:[#allocation28_spill] sm:$0xff] %v2898_v7  ;;  %6880 = vst [vmem:[#allocation30_spill] sm:$0xff] %v2908_v18  ;;  %v2910_v19 = vld [vmem:[#allocation3 + $0x100] sm:$0xff]  ;;  %v2914_v21 = vld [vmem:[#allocation6 + $0xc8] sm:$0xff] }
  0x3c   :  { %6881 = vst [vmem:[#allocation31_spill] sm:$0xff] %v2912_v20  ;;  %6882 = vst [vmem:[#allocation32_spill] sm:$0xff] %v2914_v21  ;;  %v2916_v28 = vld [vmem:[#allocation6 + $0xd0] sm:$0xff]  ;;  %v2918_v0 = vld [vmem:[#allocation6 + $0xd8] sm:$0xff] }
  0x3d   :  { %6883 = vst [vmem:[#allocation33_spill] sm:$0xff] %v2916_v28  ;;  %6884 = vst [vmem:[#allocation34_spill] sm:$0xff] %v2918_v0  ;;  %v2928_v63 = vld [vmem:[#allocation3 + $0x110] sm:$0xff]  ;;  %v2930_v62 = vld [vmem:[#allocation3 + $0x118] sm:$0xff] }
  0x3e   :  { %6886 = vst [vmem:[#allocation36_spill] sm:$0xff] %v2928_v63  ;;  %6887 = vst [vmem:[#allocation37_spill] sm:$0xff] %v2930_v62  ;;  %v2932_v54 = vld [vmem:[#allocation3 + $0x120] sm:$0xff]  ;;  %v2936_v52 = vld [vmem:[#allocation6 + $0xe8] sm:$0xff] }
  0x3f   :  { %v2934_v53 = vld [vmem:[#allocation6 + $0xe0] sm:$0xff]  ;;  %6889 = vst [vmem:[#allocation39_spill] sm:$0xff] %v2936_v52  ;;  %v2938_v14 = vld [vmem:[#allocation6 + $0xf0] sm:$0xff]  ;;  %v2948_v1 = vld [vmem:[#allocation3 + $0x128] sm:$0xff] }
  0x40   :  { %6888 = vst [vmem:[#allocation38_spill] sm:$0xff] %v2934_v53  ;;  %6890 = vst [vmem:[#allocation40_spill] sm:$0xff] %v2938_v14  ;;  %v2950_v55 = vld [vmem:[#allocation3 + $0x130] sm:$0xff]  ;;  %v2952_v8 = vld [vmem:[#allocation3 + $0x138] sm:$0xff] }
  0x41   :  { %6892 = vst [vmem:[#allocation42_spill] sm:$0xff] %v2950_v55  ;;  %6893 = vst [vmem:[#allocation43_spill] sm:$0xff] %v2952_v8  ;;  %v2954_v45 = vld [vmem:[#allocation6 + $0xf8] sm:$0xff]  ;;  %v2956_v51 = vld [vmem:[#allocation6 + $0x100] sm:$0xff] }
  0x42   :  { %6894 = vst [vmem:[#allocation44_spill] sm:$0xff] %v2954_v45  ;;  %6895 = vst [vmem:[#allocation45_spill] sm:$0xff] %v2956_v51  ;;  %v2958_v31 = vld [vmem:[#allocation6 + $0x108] sm:$0xff]  ;;  %v2968_v9 = vld [vmem:[#allocation3 + $0x140] sm:$0xff] }
  0x43   :  { %6896 = vst [vmem:[#allocation46_spill] sm:$0xff] %v2958_v31  ;;  %6897 = vst [vmem:[#allocation47_spill] sm:$0xff] %v2966_v13  ;;  %v2970_v61 = vld [vmem:[#allocation3 + $0x148] sm:$0xff]  ;;  %v2972_v38 = vld [vmem:[#allocation3 + $0x150] sm:$0xff]  ;;  %v2989_v13 = vand.u32 2147483647, %v6902_v35  ;;  %v6909_v35 = vsub.f32 %v2787_v11, %v2811_v26 }
  0x44   :  { %6898 = vst [vmem:[#allocation48_spill] sm:$0xff] %v2970_v61  ;;  %6899 = vst [vmem:[#allocation49_spill] sm:$0xff] %v2972_v38  ;;  %v2974_v60 = vld [vmem:[#allocation6 + $0x110] sm:$0xff]  ;;  %v2976_v37 = vld [vmem:[#allocation6 + $0x118] sm:$0xff] }
  0x45   :  { %6900 = vst [vmem:[#allocation50_spill] sm:$0xff] %v2974_v60  ;;  %6901 = vst [vmem:[#allocation51_spill] sm:$0xff] %v2976_v37  ;;  %v2978_v59 = vld [vmem:[#allocation6 + $0x120] sm:$0xff]  ;;  %v2991_v7 = vld [vmem:[#allocation3 + $0x158] sm:$0xff]  ;;  %v3012_v43 = vand.u32 2147483647, %v6909_v35  ;;  %v6914_v35 = vsub.f32 %v2789_v12, %v2813_v27 }
  0x46   :  { %6903 = vst [vmem:[#allocation52_spill] sm:$0xff] %v2989_v13  ;;  %6904 = vst [vmem:[#allocation53_spill] sm:$0xff] %v2991_v7  ;;  %v2993_v48 = vld [vmem:[#allocation3 + $0x160] sm:$0xff]  ;;  %v2995_v6 = vld [vmem:[#allocation3 + $0x168] sm:$0xff] }
  0x47   :  { %6905 = vst [vmem:[#allocation54_spill] sm:$0xff] %v2995_v6  ;;  %v2997_v47 = vld [vmem:[#allocation6 + $0x128] sm:$0xff]  ;;  %v2999_v42 = vld [vmem:[#allocation6 + $0x130] sm:$0xff]  ;;  %v3001_v21 = vld [vmem:[#allocation6 + $0x138] sm:$0xff]  ;;  %v3035_v10 = vand.u32 2147483647, %v6914_v35  ;;  %v6920_v35 = vsub.f32 %v2791_v15, %v2821_v32 }
  0x48   :  { %6906 = vst [vmem:[#allocation55_spill] sm:$0xff] %v2997_v47  ;;  %6907 = vst [vmem:[#allocation56_spill] sm:$0xff] %v2999_v42  ;;  %v3014_v13 = vld [vmem:[#allocation3 + $0x170] sm:$0xff]  ;;  %v3016_v0 = vld [vmem:[#allocation3 + $0x178] sm:$0xff] }
  0x49   :  { %6908 = vst [vmem:[#allocation57_spill] sm:$0xff] %v3001_v21  ;;  %6910 = vst [vmem:[#allocation58_spill] sm:$0xff] %v3014_v13  ;;  %v3018_v58 = vld [vmem:[#allocation3 + $0x180] sm:$0xff]  ;;  %v3022_v44 = vld [vmem:[#allocation6 + $0x148] sm:$0xff]  ;;  %v3058_v11 = vand.u32 2147483647, %v6920_v35  ;;  %v6925_v35 = vsub.f32 %v2793_v16, %v2823_v33 }
  0x4a   :  { %6911 = vst [vmem:[#allocation59_spill] sm:$0xff] %v3016_v0  ;;  %v3020_v28 = vld [vmem:[#allocation6 + $0x140] sm:$0xff]  ;;  %6912 = vst [vmem:[#allocation60_spill] sm:$0xff] %v3022_v44  ;;  %v3024_v53 = vld [vmem:[#allocation6 + $0x150] sm:$0xff] }
  0x4b   :  { %6913 = vst [vmem:[#allocation61_spill] sm:$0xff] %v3024_v53  ;;  %v3037_v14 = vld [vmem:[#allocation3 + $0x188] sm:$0xff]  ;;  %v3039_v4 = vld [vmem:[#allocation3 + $0x190] sm:$0xff]  ;;  %v3041_v52 = vld [vmem:[#allocation3 + $0x198] sm:$0xff]  ;;  %v3081_v27 = vand.u32 2147483647, %v6925_v35  ;;  %v6933_v35 = vsub.f32 %v2795_v17, %v2825_v34 }
  0x4c   :  { %6915 = vst [vmem:[#allocation62_spill] sm:$0xff] %v3039_v4  ;;  %6916 = vst [vmem:[#allocation63_spill] sm:$0xff] %v3041_v52  ;;  %v3043_v3 = vld [vmem:[#allocation6 + $0x158] sm:$0xff]  ;;  %v3045_v25 = vld [vmem:[#allocation6 + $0x160] sm:$0xff] }
  0x4d   :  { %6917 = vst [vmem:[#allocation64_spill] sm:$0xff] %v3043_v3  ;;  %6918 = vst [vmem:[#allocation65_spill] sm:$0xff] %v3045_v25  ;;  %v3047_v45 = vld [vmem:[#allocation6 + $0x168] sm:$0xff]  ;;  %v3060_v18 = vld [vmem:[#allocation3 + $0x1a0] sm:$0xff]  ;;  %v3104_v15 = vand.u32 2147483647, %v6933_v35  ;;  %v6938_v35 = vsub.f32 %v2803_v22, %v2834_v39 }
  0x4e   :  { %6919 = vst [vmem:[#allocation66_spill] sm:$0xff] %v3047_v45  ;;  %6921 = vst [vmem:[#allocation67_spill] sm:$0xff] %v3058_v11  ;;  %v3062_v31 = vld [vmem:[#allocation3 + $0x1a8] sm:$0xff]  ;;  %v3064_v20 = vld [vmem:[#allocation3 + $0x1b0] sm:$0xff] }
  0x4f   :  { %6922 = vst [vmem:[#allocation68_spill] sm:$0xff] %v3064_v20  ;;  %v3066_v51 = vld [vmem:[#allocation6 + $0x170] sm:$0xff]  ;;  %v3068_v26 = vld [vmem:[#allocation6 + $0x178] sm:$0xff]  ;;  %v3070_v60 = vld [vmem:[#allocation6 + $0x180] sm:$0xff]  ;;  %v3127_v16 = vand.u32 2147483647, %v6938_v35  ;;  %v6944_v35 = vsub.f32 %v2805_v23, %v2836_v40 }
  0x50   :  { %6923 = vst [vmem:[#allocation69_spill] sm:$0xff] %v3066_v51  ;;  %6924 = vst [vmem:[#allocation70_spill] sm:$0xff] %v3068_v26  ;;  %v3083_v11 = vld [vmem:[#allocation3 + $0x1b8] sm:$0xff]  ;;  %v3085_v37 = vld [vmem:[#allocation3 + $0x1c0] sm:$0xff] }
  0x51   :  { %6926 = vst [vmem:[#allocation71_spill] sm:$0xff] %v3081_v27  ;;  %6927 = vst [vmem:[#allocation72_spill] sm:$0xff] %v3083_v11  ;;  %v3087_v62 = vld [vmem:[#allocation3 + $0x1c8] sm:$0xff]  ;;  %v3091_v12 = vld [vmem:[#allocation6 + $0x190] sm:$0xff]  ;;  %v3150_v17 = vand.u32 2147483647, %v6944_v35  ;;  %v6951_v35 = vsub.f32 %v2807_v24, %v2838_v41 }
  0x52   :  { %6928 = vst [vmem:[#allocation73_spill] sm:$0xff] %v3085_v37  ;;  %6929 = vst [vmem:[#allocation74_spill] sm:$0xff] %v3087_v62  ;;  %v3089_v63 = vld [vmem:[#allocation6 + $0x188] sm:$0xff]  ;;  %v3093_v47 = vld [vmem:[#allocation6 + $0x198] sm:$0xff] }
  0x53   :  { %6930 = vst [vmem:[#allocation75_spill] sm:$0xff] %v3089_v63  ;;  %6931 = vst [vmem:[#allocation76_spill] sm:$0xff] %v3091_v12  ;;  %v3106_v27 = vld [vmem:[#allocation3 + $0x1d0] sm:$0xff]  ;;  %v3108_v21 = vld [vmem:[#allocation3 + $0x1d8] sm:$0xff]  ;;  %v3173_v39 = vand.u32 2147483647, %v6951_v35  ;;  %v6959_v35 = vsub.f32 %v2815_v29, %v2854_v49  ;;  %v6965_v49 = vsub.f32 %v2817_v30, %v2856_v50 }
  0x54   :  { %6932 = vst [vmem:[#allocation77_spill] sm:$0xff] %v3093_v47  ;;  %6934 = vst [vmem:[#allocation78_spill] sm:$0xff] %v3106_v27  ;;  %v3110_v8 = vld [vmem:[#allocation3 + $0x1e0] sm:$0xff]  ;;  %v3114_v32 = vld [vmem:[#allocation6 + $0x1a8] sm:$0xff] }
  0x55   :  { %6935 = vst [vmem:[#allocation79_spill] sm:$0xff] %v3108_v21  ;;  %v3112_v42 = vld [vmem:[#allocation6 + $0x1a0] sm:$0xff]  ;;  %6936 = vst [vmem:[#allocation80_spill] sm:$0xff] %v3114_v32  ;;  %v3116_v55 = vld [vmem:[#allocation6 + $0x1b0] sm:$0xff]  ;;  %v3196_v23 = vand.u32 2147483647, %v6959_v35 }
  0x56   :  { %6937 = vst [vmem:[#allocation81_spill] sm:$0xff] %v3116_v55  ;;  %v3129_v53 = vld [vmem:[#allocation3 + $0x1e8] sm:$0xff]  ;;  %v3131_v38 = vld [vmem:[#allocation3 + $0x1f0] sm:$0xff]  ;;  %v3133_v44 = vld [vmem:[#allocation3 + $0x1f8] sm:$0xff]  ;;  %v3217_v35 = vand.u32 2147483647, %v6965_v49 }
  0x57   :  { %6939 = vst [vmem:[#allocation82_spill] sm:$0xff] %v3131_v38  ;;  %6940 = vst [vmem:[#allocation83_spill] sm:$0xff] %v3133_v44  ;;  %v3135_v61 = vld [vmem:[#allocation6 + $0x1b8] sm:$0xff]  ;;  %v3137_v33 = vld [vmem:[#allocation6 + $0x1c0] sm:$0xff] }
  0x58   :  { %6941 = vst [vmem:[#allocation84_spill] sm:$0xff] %v3135_v61  ;;  %6942 = vst [vmem:[#allocation85_spill] sm:$0xff] %v3137_v33  ;;  %v3139_v3 = vld [vmem:[#allocation6 + $0x1c8] sm:$0xff]  ;;  %v3152_v7 = vld [vmem:[#allocation3 + $0x200] sm:$0xff] }
  0x59   :  { %6943 = vst [vmem:[#allocation86_spill] sm:$0xff] %v3139_v3  ;;  %6945 = vst [vmem:[#allocation87_spill] sm:$0xff] %v3150_v17  ;;  %v3154_v45 = vld [vmem:[#allocation3 + $0x208] sm:$0xff]  ;;  %v3156_v6 = vld [vmem:[#allocation3 + $0x210] sm:$0xff] }
  0x5a   :  { %6946 = vst [vmem:[#allocation88_spill] sm:$0xff] %v3152_v7  ;;  %6947 = vst [vmem:[#allocation89_spill] sm:$0xff] %v3154_v45  ;;  %v3158_v25 = vld [vmem:[#allocation6 + $0x1d0] sm:$0xff]  ;;  %v3160_v34 = vld [vmem:[#allocation6 + $0x1d8] sm:$0xff] }
  0x5b   :  { %6948 = vst [vmem:[#allocation90_spill] sm:$0xff] %v3156_v6  ;;  %6949 = vst [vmem:[#allocation91_spill] sm:$0xff] %v3158_v25  ;;  %v3162_v51 = vld [vmem:[#allocation6 + $0x1e0] sm:$0xff]  ;;  %v3175_v17 = vld [vmem:[#allocation3 + $0x218] sm:$0xff] }
  0x5c   :  { %6950 = vst [vmem:[#allocation92_spill] sm:$0xff] %v3160_v34  ;;  %6952 = vst [vmem:[#allocation93_spill] sm:$0xff] %v3173_v39  ;;  %v3177_v26 = vld [vmem:[#allocation3 + $0x220] sm:$0xff]  ;;  %v3179_v0 = vld [vmem:[#allocation3 + $0x228] sm:$0xff] }
  0x5d   :  { %6953 = vst [vmem:[#allocation94_spill] sm:$0xff] %v3175_v17  ;;  %6954 = vst [vmem:[#allocation95_spill] sm:$0xff] %v3177_v26  ;;  %v3181_v13 = vld [vmem:[#allocation6 + $0x1e8] sm:$0xff]  ;;  %v3183_v22 = vld [vmem:[#allocation6 + $0x1f0] sm:$0xff] }
  0x5e   :  { %6955 = vst [vmem:[#allocation96_spill] sm:$0xff] %v3179_v0  ;;  %6956 = vst [vmem:[#allocation97_spill] sm:$0xff] %v3181_v13  ;;  %v3185_v63 = vld [vmem:[#allocation6 + $0x1f8] sm:$0xff]  ;;  %v3198_v39 = vld [vmem:[#allocation3 + $0x230] sm:$0xff] }
  0x5f   :  { %6957 = vst [vmem:[#allocation98_spill] sm:$0xff] %v3183_v22  ;;  %6958 = vst [vmem:[#allocation99_spill] sm:$0xff] %v3185_v63  ;;  %v3200_v47 = vld [vmem:[#allocation3 + $0x238] sm:$0xff]  ;;  %v3202_v52 = vld [vmem:[#allocation6 + $0x200] sm:$0xff] }
  0x60   :  { %6960 = vst [vmem:[#allocation100_spill] sm:$0xff] %v3198_v39  ;;  %6961 = vst [vmem:[#allocation101_spill] sm:$0xff] %v3200_v47  ;;  %v3204_v12 = vld [vmem:[#allocation6 + $0x208] sm:$0xff]  ;;  %v3206_v40 = vld [vmem:[#allocation6 + $0x210] sm:$0xff] }
  0x61   :  { %6962 = vst [vmem:[#allocation102_spill] sm:$0xff] %v3202_v52  ;;  %6963 = vst [vmem:[#allocation103_spill] sm:$0xff] %v3204_v12  ;;  %v3219_v55 = vld [vmem:[#allocation3 + $0x240] sm:$0xff]  ;;  %v3221_v20 = vld [vmem:[#allocation3 + $0x248] sm:$0xff] }
  0x62   :  { %6964 = vst [vmem:[#allocation104_spill] sm:$0xff] %v3206_v40  ;;  %v3223_v4 = vld [vmem:[#allocation6 + $0x218] sm:$0xff]  ;;  %v3225_v32 = vld [vmem:[#allocation6 + $0x220] sm:$0xff]  ;;  %v3227_v24 = vld [vmem:[#allocation6 + $0x228] sm:$0xff] }
  0x63   :  { %6966 = vst [vmem:[#allocation105_spill] sm:$0xff] %v3223_v4  ;;  %6967 = vst [vmem:[#allocation106_spill] sm:$0xff] %v3225_v32  ;;  %v6969_v50 = vld [vmem:[#allocation12_spill] sm:$0xff]  ;;  %v6970_v49 = vld [vmem:[#allocation18_spill] sm:$0xff] }
  0x64   :  { %6968 = vst [vmem:[#allocation107_spill] sm:$0xff] %v3227_v24  ;;  %v6971_v61 = vsub.f32 %v6969_v50, %v6970_v49  ;;  %v3240_v3 = vld [vmem:[#allocation3 + $0x250] sm:$0xff]  ;;  %v3242_v62 = vld [vmem:[#allocation3 + $0x258] sm:$0xff]  ;;  %v3261_v34 = vld [vmem:[#allocation3 + $0x268] sm:$0xff] }
  0x65   :  { %6973 = vst [vmem:[#allocation18_spill] sm:$0xff] %v3240_v3  ;;  %6974 = vst [vmem:[#allocation108_spill] sm:$0xff] %v3242_v62  ;;  %v3244_v33 = vld [vmem:[#allocation6 + $0x230] sm:$0xff]  ;;  %v3246_v37 = vld [vmem:[#allocation6 + $0x238] sm:$0xff] }
  0x66   :  { %v3238_v11 = vand.u32 2147483647, %v6971_v61  ;;  %6975 = vst [vmem:[#allocation109_spill] sm:$0xff] %v3244_v33  ;;  %6976 = vst [vmem:[#allocation110_spill] sm:$0xff] %v3246_v37  ;;  %v6977_v61 = vld [vmem:[#allocation21_spill] sm:$0xff]  ;;  %v3263_v21 = vld [vmem:[#allocation3 + $0x270] sm:$0xff] }
  0x67   :  { %v6978_v50 = vsub.f32 %v2828_v36, %v6977_v61  ;;  %6980 = vst [vmem:[#allocation111_spill] sm:$0xff] %v3263_v21  ;;  %v3265_v25 = vld [vmem:[#allocation6 + $0x240] sm:$0xff]  ;;  %v3267_v41 = vld [vmem:[#allocation6 + $0x248] sm:$0xff]  ;;  %v3280_v44 = vld [vmem:[#allocation3 + $0x278] sm:$0xff] }
  0x68   :  { %6972 = vst [vmem:[#allocation12_spill] sm:$0xff] %v3238_v11  ;;  %v3259_v11 = vld [vmem:[#allocation3 + $0x260] sm:$0xff]  ;;  %6981 = vst [vmem:[#allocation112_spill] sm:$0xff] %v3267_v41  ;;  %v6982_v61 = vld [vmem:[#allocation13_spill] sm:$0xff] }
  0x69   :  { %v3257_v49 = vand.u32 2147483647, %v6978_v50  ;;  %v6983_v50 = vld [vmem:[#allocation22_spill] sm:$0xff]  ;;  %6985 = vst [vmem:[#allocation13_spill] sm:$0xff] %v3280_v44  ;;  %v3282_v22 = vld [vmem:[#allocation3 + $0x280] sm:$0xff]  ;;  %v3286_v27 = vld [vmem:[#allocation6 + $0x258] sm:$0xff] }
  0x6a   :  { %v3284_v38 = vld [vmem:[#allocation6 + $0x250] sm:$0xff]  ;;  %6987 = vst [vmem:[#allocation113_spill] sm:$0xff] %v3286_v27  ;;  %v3296_v40 = vld [vmem:[#allocation3 + $0x288] sm:$0xff]  ;;  %v3300_v12 = vld [vmem:[#allocation6 + $0x260] sm:$0xff] }
  0x6b   :  { %6979 = vst [vmem:[#allocation21_spill] sm:$0xff] %v3257_v49  ;;  %v6984_v49 = vsub.f32 %v6982_v61, %v6983_v50  ;;  %6986 = vst [vmem:[#allocation22_spill] sm:$0xff] %v3284_v38  ;;  %v6988_v61 = vld [vmem:[#allocation15_spill] sm:$0xff]  ;;  %v3298_v6 = vld [vmem:[#allocation3 + $0x290] sm:$0xff] }
  0x6c   :  { %6990 = vst [vmem:[#allocation15_spill] sm:$0xff] %v3298_v6  ;;  %v3302_v45 = vld [vmem:[#allocation6 + $0x268] sm:$0xff]  ;;  %v3304_v52 = vld [vmem:[#allocation6 + $0x270] sm:$0xff]  ;;  %v6993_v4 = vld [vmem:[#allocation23_spill] sm:$0xff] }
  0x6d   :  { %v3278_v63 = vand.u32 2147483647, %v6984_v49  ;;  %v6989_v49 = vld [vmem:[#allocation35_spill] sm:$0xff]  ;;  %v6992_v36 = vld [vmem:[#allocation14_spill] sm:$0xff]  ;;  %v6996_v24 = vld [vmem:[#allocation41_spill] sm:$0xff] }
  0x6e   :  { %v2114_v50 = vadd.f32 %v6989_v49, %v6988_v61  ;;  %6991 = vst [vmem:[#allocation35_spill] sm:$0xff] %v3304_v52  ;;  %v6994_v17 = vsub.f32 %v6992_v36, %v6993_v4  ;;  %v6995_v49 = vld [vmem:[#allocation19_spill] sm:$0xff]  ;;  %v3317_v26 = vld [vmem:[#allocation3 + $0x2a0] sm:$0xff]  ;;  %v7000_v4 = vsub.f32 %v2848_v46, %v2894_v5  ;;  %v3333_v36 = vld [vmem:[#allocation3 + $0x2a8] sm:$0xff] }
  0x6f   :  { %v2241_v0 = vadd.f32 %v6996_v24, %v6995_v49  ;;  %v3315_v32 = vld [vmem:[#allocation3 + $0x298] sm:$0xff]  ;;  %6998 = vst [vmem:[#allocation23_spill] sm:$0xff] %v3317_v26  ;;  %v3321_v13 = vld [vmem:[#allocation6 + $0x280] sm:$0xff]  ;;  %7002 = vst [vmem:[#allocation114_spill] sm:$0xff] %v3333_v36 }
  0x70   :  { %v1619_v61 = vand.u32 2147483647, %v6994_v17  ;;  %6997 = vst [vmem:[#allocation14_spill] sm:$0xff] %v3315_v32  ;;  %v3319_v7 = vld [vmem:[#allocation6 + $0x278] sm:$0xff]  ;;  %v3330_v17 = vand.u32 2147483647, %v7000_v4  ;;  %v2115_v24 = vadd.f32 %v2114_v50, %v3012_v43 }
  0x71   :  { %6999 = vst [vmem:[#allocation19_spill] sm:$0xff] %v3319_v7  ;;  %v3335_v49 = vld [vmem:[#allocation3 + $0x2b0] sm:$0xff]  ;;  %v3337_v37 = vld [vmem:[#allocation6 + $0x288] sm:$0xff]  ;;  %v7005_v33 = vld [vmem:[#allocation16_spill] sm:$0xff]  ;;  %v2242_v43 = vadd.f32 %v2241_v0, %v3035_v10 }
  0x72   :  { %7001 = vst [vmem:[#allocation41_spill] sm:$0xff] %v3330_v17  ;;  %7003 = vst [vmem:[#allocation115_spill] sm:$0xff] %v3335_v49  ;;  %v3339_v47 = vld [vmem:[#allocation6 + $0x290] sm:$0xff]  ;;  %v7006_v46 = vld [vmem:[#allocation27_spill] sm:$0xff] }
  0x73   :  { %7004 = vst [vmem:[#allocation116_spill] sm:$0xff] %v3339_v47  ;;  %v7007_v5 = vsub.f32 %v7005_v33, %v7006_v46  ;;  %v3351_v50 = vld [vmem:[#allocation3 + $0x2b8] sm:$0xff]  ;;  %v3355_v39 = vld [vmem:[#allocation6 + $0x2a0] sm:$0xff]  ;;  %v2116_v33 = vadd.f32 %v2115_v24, %v3104_v15  ;;  %v3366_v0 = vld [vmem:[#allocation3 + $0x2c8] sm:$0xff]  ;;  %v2243_v15 = vadd.f32 %v2242_v43, %v3127_v16 }
  0x74   :  { %7009 = vst [vmem:[#allocation27_spill] sm:$0xff] %v3351_v50  ;;  %v3353_v17 = vld [vmem:[#allocation6 + $0x298] sm:$0xff]  ;;  %7011 = vst [vmem:[#allocation118_spill] sm:$0xff] %v3355_v39  ;;  %v3364_v46 = vld [vmem:[#allocation3 + $0x2c0] sm:$0xff] }
  0x75   :  { %v3348_v4 = vand.u32 2147483647, %v7007_v5  ;;  %7010 = vst [vmem:[#allocation117_spill] sm:$0xff] %v3353_v17  ;;  %v3368_v10 = vld [vmem:[#allocation6 + $0x2a8] sm:$0xff]  ;;  %v3370_v5 = vld [vmem:[#allocation6 + $0x2b0] sm:$0xff]  ;;  %v7015_v27 = vld [vmem:[#allocation28_spill] sm:$0xff] }
  0x76   :  { %7012 = vst [vmem:[#allocation119_spill] sm:$0xff] %v3368_v10  ;;  %7013 = vst [vmem:[#allocation120_spill] sm:$0xff] %v3370_v5  ;;  %v7014_v29 = vld [vmem:[#allocation17_spill] sm:$0xff]  ;;  %v3380_v24 = vld [vmem:[#allocation3 + $0x2d0] sm:$0xff] }
  0x77   :  { %7008 = vst [vmem:[#allocation16_spill] sm:$0xff] %v3348_v4  ;;  %v7016_v62 = vsub.f32 %v7014_v29, %v7015_v27  ;;  %7017 = vst [vmem:[#allocation17_spill] sm:$0xff] %v3380_v24  ;;  %v3382_v52 = vld [vmem:[#allocation3 + $0x2d8] sm:$0xff]  ;;  %v7020_v41 = vld [vmem:[#allocation32_spill] sm:$0xff] }
  0x78   :  { %7018 = vst [vmem:[#allocation28_spill] sm:$0xff] %v3382_v52  ;;  %v3384_v21 = vld [vmem:[#allocation6 + $0x2b8] sm:$0xff]  ;;  %v7021_v7 = vsub.f32 %v2868_v56, %v7020_v41  ;;  %v3394_v27 = vld [vmem:[#allocation3 + $0x2e0] sm:$0xff]  ;;  %v3396_v16 = vld [vmem:[#allocation3 + $0x2e8] sm:$0xff] }
  0x79   :  { %v1622_v30 = vand.u32 2147483647, %v7016_v62  ;;  %7019 = vst [vmem:[#allocation121_spill] sm:$0xff] %v3384_v21  ;;  %v2117_v62 = vadd.f32 %v2116_v33, %v3196_v23  ;;  %v3398_v29 = vld [vmem:[#allocation6 + $0x2c0] sm:$0xff]  ;;  %v3400_v43 = vld [vmem:[#allocation6 + $0x2c8] sm:$0xff]  ;;  %v2244_v23 = vadd.f32 %v2243_v15, %v3217_v35  ;;  %v3412_v41 = vld [vmem:[#allocation3 + $0x2f0] sm:$0xff] }
  0x7a   :  { %v1623_v44 = vand.u32 2147483647, %v7021_v7  ;;  %7022 = vst [vmem:[#allocation32_spill] sm:$0xff] %v3400_v43  ;;  %v7023_v47 = vld [vmem:[#allocation33_spill] sm:$0xff]  ;;  %7026 = vst [vmem:[#allocation122_spill] sm:$0xff] %v3412_v41  ;;  %v3414_v33 = vld [vmem:[#allocation3 + $0x2f8] sm:$0xff] }
  0x7b   :  { %v7024_v56 = vsub.f32 %v2870_v57, %v7023_v47  ;;  %7027 = vst [vmem:[#allocation123_spill] sm:$0xff] %v3414_v33  ;;  %v3416_v6 = vld [vmem:[#allocation6 + $0x2d0] sm:$0xff]  ;;  %v3418_v3 = vld [vmem:[#allocation6 + $0x2d8] sm:$0xff]  ;;  %v2118_v35 = vadd.f32 %v2117_v62, %v3278_v63  ;;  %v3428_v15 = vld [vmem:[#allocation3 + $0x300] sm:$0xff] }
  0x7c   :  { %7028 = vst [vmem:[#allocation124_spill] sm:$0xff] %v3416_v6  ;;  %7029 = vst [vmem:[#allocation125_spill] sm:$0xff] %v3418_v3  ;;  %v7030_v47 = vld [vmem:[#allocation38_spill] sm:$0xff]  ;;  %v3432_v17 = vld [vmem:[#allocation6 + $0x2e8] sm:$0xff] }
  0x7d   :  { %v3409_v7 = vand.u32 2147483647, %v7024_v56  ;;  %v7031_v57 = vsub.f32 %v2888_v2, %v7030_v47  ;;  %7032 = vst [vmem:[#allocation38_spill] sm:$0xff] %v3428_v15  ;;  %7033 = vst [vmem:[#allocation126_spill] sm:$0xff] %v3432_v17  ;;  %v7034_v39 = vld [vmem:[#allocation20_spill] sm:$0xff]  ;;  %v7035_v38 = vld [vmem:[#allocation34_spill] sm:$0xff] }
  0x7e   :  { %v7036_v10 = vsub.f32 %v7034_v39, %v7035_v38  ;;  %v7038_v4 = vld [vmem:[#allocation25_spill] sm:$0xff]  ;;  %v7039_v5 = vld [vmem:[#allocation39_spill] sm:$0xff]  ;;  %v3446_v62 = vld [vmem:[#allocation6 + $0x2f0] sm:$0xff] }
  0x7f   :  { %7025 = vst [vmem:[#allocation33_spill] sm:$0xff] %v3409_v7  ;;  %v1626_v56 = vand.u32 2147483647, %v7031_v57  ;;  %v3430_v7 = vld [vmem:[#allocation6 + $0x2e0] sm:$0xff]  ;;  %v7040_v2 = vsub.f32 %v7038_v4, %v7039_v5  ;;  %v2245_v57 = vadd.f32 %v2244_v23, %v1619_v61  ;;  %v3444_v63 = vld [vmem:[#allocation3 + $0x308] sm:$0xff]  ;;  %7041 = vst [vmem:[#allocation34_spill] sm:$0xff] %v3446_v62 }
  0x80   :  { %v3439_v36 = vand.u32 2147483647, %v7036_v10  ;;  %v3448_v49 = vld [vmem:[#allocation6 + $0x2f8] sm:$0xff]  ;;  %v7043_v38 = vld [vmem:[#allocation45_spill] sm:$0xff]  ;;  %v3457_v4 = vld [vmem:[#allocation3 + $0x310] sm:$0xff] }
  0x81   :  { %v1627_v47 = vand.u32 2147483647, %v7040_v2  ;;  %7042 = vst [vmem:[#allocation25_spill] sm:$0xff] %v3448_v49  ;;  %v7044_v39 = vsub.f32 %v2910_v19, %v7043_v38  ;;  %7045 = vst [vmem:[#allocation39_spill] sm:$0xff] %v3457_v4  ;;  %v3459_v61 = vld [vmem:[#allocation3 + $0x318] sm:$0xff]  ;;  %v3461_v5 = vld [vmem:[#allocation6 + $0x300] sm:$0xff]  ;;  %v2246_v43 = vadd.f32 %v2245_v57, %v1623_v44  ;;  %v7053_v2 = vsub.f32 %v2932_v54, %v2978_v59 }
  0x82   :  { %7037 = vst [vmem:[#allocation20_spill] sm:$0xff] %v3439_v36  ;;  %v2119_v36 = vadd.f32 %v2118_v35, %v1622_v30  ;;  %7046 = vst [vmem:[#allocation45_spill] sm:$0xff] %v3459_v61  ;;  %v7048_v26 = vld [vmem:[#allocation31_spill] sm:$0xff]  ;;  %v7049_v21 = vld [vmem:[#allocation46_spill] sm:$0xff] }
  0x83   :  { %v1630_v10 = vand.u32 2147483647, %v7044_v39  ;;  %7047 = vst [vmem:[#allocation127_spill] sm:$0xff] %v3461_v5  ;;  %v7050_v32 = vsub.f32 %v7048_v26, %v7049_v21  ;;  %v3470_v19 = vld [vmem:[#allocation3 + $0x320] sm:$0xff]  ;;  %v3472_v30 = vld [vmem:[#allocation3 + $0x328] sm:$0xff]  ;;  %v3476_v38 = vld [vmem:[#allocation6 + $0x310] sm:$0xff]  ;;  %v2247_v24 = vadd.f32 %v2246_v43, %v1627_v47  ;;  %v7089_v5 = vsub.f32 %v3018_v58, %v3070_v60 }
  0x84   :  { %v3474_v35 = vld [vmem:[#allocation6 + $0x308] sm:$0xff]  ;;  %7052 = vst [vmem:[#allocation46_spill] sm:$0xff] %v3476_v38  ;;  %v1634_v21 = vand.u32 2147483647, %v7053_v2  ;;  %v2120_v26 = vadd.f32 %v2119_v36, %v1626_v56  ;;  %v3485_v44 = vld [vmem:[#allocation3 + $0x330] sm:$0xff]  ;;  %v3489_v57 = vld [vmem:[#allocation6 + $0x318] sm:$0xff] }
  0x85   :  { %v1631_v50 = vand.u32 2147483647, %v7050_v32  ;;  %7051 = vst [vmem:[#allocation31_spill] sm:$0xff] %v3474_v35  ;;  %7054 = vst [vmem:[#allocation128_spill] sm:$0xff] %v3485_v44  ;;  %v3487_v32 = vld [vmem:[#allocation3 + $0x338] sm:$0xff]  ;;  %v3498_v54 = vld [vmem:[#allocation3 + $0x340] sm:$0xff] }
  0x86   :  { %7055 = vst [vmem:[#allocation129_spill] sm:$0xff] %v3487_v32  ;;  %7056 = vst [vmem:[#allocation130_spill] sm:$0xff] %v3489_v57  ;;  %v7057_v52 = vld [vmem:[#allocation55_spill] sm:$0xff]  ;;  %v3500_v59 = vld [vmem:[#allocation3 + $0x348] sm:$0xff]  ;;  %v2121_v43 = vadd.f32 %v2120_v26, %v1630_v10  ;;  %v1646_v4 = vand.u32 2147483647, %v7089_v5 }
  0x87   :  { %v7058_v23 = vsub.f32 %v2948_v1, %v7057_v52  ;;  %7059 = vst [vmem:[#allocation55_spill] sm:$0xff] %v3500_v59  ;;  %v3502_v36 = vld [vmem:[#allocation6 + $0x320] sm:$0xff]  ;;  %v3504_v56 = vld [vmem:[#allocation6 + $0x328] sm:$0xff]  ;;  %v7060_v3 = vld [vmem:[#allocation26_spill] sm:$0xff]  ;;  %v7064_v52 = vsub.f32 %v2968_v9, %v3020_v28  ;;  %v2248_v28 = vadd.f32 %v2247_v24, %v1631_v50 }
  0x88   :  { %v7061_v62 = vld [vmem:[#allocation40_spill] sm:$0xff]  ;;  %v3516_v47 = vld [vmem:[#allocation3 + $0x350] sm:$0xff]  ;;  %v3522_v33 = vld [vmem:[#allocation6 + $0x338] sm:$0xff] }
  0x89   :  { %v1635_v6 = vand.u32 2147483647, %v7058_v23  ;;  %v7062_v41 = vsub.f32 %v7060_v3, %v7061_v62  ;;  %v1638_v1 = vand.u32 2147483647, %v7064_v52  ;;  %7065 = vst [vmem:[#allocation40_spill] sm:$0xff] %v3516_v47  ;;  %v3518_v23 = vld [vmem:[#allocation3 + $0x358] sm:$0xff] }
  0x8a   :  { %7066 = vst [vmem:[#allocation131_spill] sm:$0xff] %v3518_v23  ;;  %v3520_v49 = vld [vmem:[#allocation6 + $0x330] sm:$0xff]  ;;  %7068 = vst [vmem:[#allocation133_spill] sm:$0xff] %v3522_v33  ;;  %v7070_v62 = vld [vmem:[#allocation60_spill] sm:$0xff] }
  0x8b   :  { %v3511_v39 = vand.u32 2147483647, %v7062_v41  ;;  %7067 = vst [vmem:[#allocation132_spill] sm:$0xff] %v3520_v49  ;;  %v7069_v41 = vld [vmem:[#allocation48_spill] sm:$0xff]  ;;  %v3535_v52 = vld [vmem:[#allocation6 + $0x348] sm:$0xff]  ;;  %v7074_v15 = vld [vmem:[#allocation30_spill] sm:$0xff]  ;;  %v2249_v61 = vadd.f32 %v2248_v28, %v1635_v6 }
  0x8c   :  { %v3531_v10 = vld [vmem:[#allocation3 + $0x360] sm:$0xff]  ;;  %7073 = vst [vmem:[#allocation60_spill] sm:$0xff] %v3535_v52  ;;  %v7078_v3 = vld [vmem:[#allocation65_spill] sm:$0xff]  ;;  %v3549_v24 = vld [vmem:[#allocation6 + $0x350] sm:$0xff] }
  0x8d   :  { %7063 = vst [vmem:[#allocation26_spill] sm:$0xff] %v3511_v39  ;;  %v7071_v39 = vsub.f32 %v7069_v41, %v7070_v62  ;;  %7072 = vst [vmem:[#allocation48_spill] sm:$0xff] %v3531_v10  ;;  %v3533_v26 = vld [vmem:[#allocation6 + $0x340] sm:$0xff]  ;;  %v7079_v38 = vsub.f32 %v2993_v48, %v7078_v3  ;;  %v3547_v50 = vld [vmem:[#allocation3 + $0x368] sm:$0xff] }
  0x8e   :  { %v7075_v17 = vld [vmem:[#allocation44_spill] sm:$0xff]  ;;  %7081 = vst [vmem:[#allocation65_spill] sm:$0xff] %v3549_v24  ;;  %v3551_v62 = vld [vmem:[#allocation6 + $0x358] sm:$0xff]  ;;  %v3560_v48 = vld [vmem:[#allocation3 + $0x370] sm:$0xff] }
  0x8f   :  { %v1639_v9 = vand.u32 2147483647, %v7071_v39  ;;  %v7076_v2 = vsub.f32 %v7074_v15, %v7075_v17  ;;  %v1642_v41 = vand.u32 2147483647, %v7079_v38  ;;  %v2122_v39 = vadd.f32 %v2121_v43, %v1634_v21  ;;  %7080 = vst [vmem:[#allocation44_spill] sm:$0xff] %v3547_v50  ;;  %7082 = vst [vmem:[#allocation134_spill] sm:$0xff] %v3551_v62 }
  0x90   :  { %v7083_v17 = vld [vmem:[#allocation54_spill] sm:$0xff]  ;;  %v3562_v38 = vld [vmem:[#allocation3 + $0x378] sm:$0xff]  ;;  %v3564_v21 = vld [vmem:[#allocation6 + $0x360] sm:$0xff]  ;;  %v7097_v43 = vsub.f32 %v3060_v18, %v3112_v42 }
  0x91   :  { %v3542_v35 = vand.u32 2147483647, %v7076_v2  ;;  %v7084_v15 = vld [vmem:[#allocation66_spill] sm:$0xff]  ;;  %7086 = vst [vmem:[#allocation54_spill] sm:$0xff] %v3560_v48  ;;  %7088 = vst [vmem:[#allocation135_spill] sm:$0xff] %v3564_v21  ;;  %v3575_v6 = vld [vmem:[#allocation3 + $0x388] sm:$0xff]  ;;  %v2250_v60 = vadd.f32 %v2249_v61, %v1639_v9 }
  0x92   :  { %v7085_v2 = vsub.f32 %v7083_v17, %v7084_v15  ;;  %7087 = vst [vmem:[#allocation66_spill] sm:$0xff] %v3562_v38  ;;  %v3573_v17 = vld [vmem:[#allocation3 + $0x380] sm:$0xff]  ;;  %v3577_v28 = vld [vmem:[#allocation6 + $0x368] sm:$0xff]  ;;  %v3579_v15 = vld [vmem:[#allocation6 + $0x370] sm:$0xff]  ;;  %v1650_v49 = vand.u32 2147483647, %v7097_v43 }
  0x93   :  { %7077 = vst [vmem:[#allocation30_spill] sm:$0xff] %v3542_v35  ;;  %v2123_v35 = vadd.f32 %v2122_v39, %v1638_v1  ;;  %7090 = vst [vmem:[#allocation136_spill] sm:$0xff] %v3577_v28  ;;  %v7092_v3 = vld [vmem:[#allocation75_spill] sm:$0xff]  ;;  %v3588_v5 = vld [vmem:[#allocation3 + $0x390] sm:$0xff] }
  0x94   :  { %v1643_v57 = vand.u32 2147483647, %v7085_v2  ;;  %7091 = vst [vmem:[#allocation137_spill] sm:$0xff] %v3579_v15  ;;  %v7093_v33 = vsub.f32 %v3037_v14, %v7092_v3  ;;  %7094 = vst [vmem:[#allocation75_spill] sm:$0xff] %v3588_v5  ;;  %v3590_v1 = vld [vmem:[#allocation3 + $0x398] sm:$0xff]  ;;  %v3601_v14 = vld [vmem:[#allocation3 + $0x3a0] sm:$0xff] }
  0x95   :  { %7095 = vst [vmem:[#allocation138_spill] sm:$0xff] %v3590_v1  ;;  %v3592_v39 = vld [vmem:[#allocation6 + $0x378] sm:$0xff]  ;;  %v2124_v44 = vadd.f32 %v2123_v35, %v1642_v41  ;;  %7098 = vst [vmem:[#allocation140_spill] sm:$0xff] %v3601_v14  ;;  %v3605_v61 = vld [vmem:[#allocation6 + $0x380] sm:$0xff] }
  0x96   :  { %v1647_v58 = vand.u32 2147483647, %v7093_v33  ;;  %7096 = vst [vmem:[#allocation139_spill] sm:$0xff] %v3592_v39  ;;  %v3603_v33 = vld [vmem:[#allocation3 + $0x3a8] sm:$0xff]  ;;  %v7101_v32 = vld [vmem:[#allocation36_spill] sm:$0xff]  ;;  %v7102_v24 = vld [vmem:[#allocation50_spill] sm:$0xff]  ;;  %v2251_v41 = vadd.f32 %v2250_v60, %v1643_v57 }
  0x97   :  { %7099 = vst [vmem:[#allocation141_spill] sm:$0xff] %v3603_v33  ;;  %v3607_v9 = vld [vmem:[#allocation6 + $0x388] sm:$0xff]  ;;  %v7103_v47 = vsub.f32 %v7101_v32, %v7102_v24  ;;  %v7105_v18 = vld [vmem:[#allocation80_spill] sm:$0xff]  ;;  %v3619_v43 = vld [vmem:[#allocation3 + $0x3b0] sm:$0xff] }
  0x98   :  { %7100 = vst [vmem:[#allocation142_spill] sm:$0xff] %v3607_v9  ;;  %v7106_v42 = vsub.f32 %v3062_v31, %v7105_v18  ;;  %7107 = vst [vmem:[#allocation50_spill] sm:$0xff] %v3619_v43  ;;  %v3621_v62 = vld [vmem:[#allocation3 + $0x3b8] sm:$0xff]  ;;  %v3623_v23 = vld [vmem:[#allocation6 + $0x390] sm:$0xff]  ;;  %v2125_v18 = vadd.f32 %v2124_v44, %v1646_v4 }
  0x99   :  { %v3614_v2 = vand.u32 2147483647, %v7103_v47  ;;  %7108 = vst [vmem:[#allocation80_spill] sm:$0xff] %v3621_v62  ;;  %7109 = vst [vmem:[#allocation143_spill] sm:$0xff] %v3623_v23  ;;  %v3625_v52 = vld [vmem:[#allocation6 + $0x398] sm:$0xff]  ;;  %v7111_v47 = vld [vmem:[#allocation73_spill] sm:$0xff] }
  0x9a   :  { %v1651_v35 = vand.u32 2147483647, %v7106_v42  ;;  %7110 = vst [vmem:[#allocation144_spill] sm:$0xff] %v3625_v52  ;;  %v7112_v24 = vld [vmem:[#allocation85_spill] sm:$0xff]  ;;  %v3634_v57 = vld [vmem:[#allocation3 + $0x3c0] sm:$0xff]  ;;  %v7118_v59 = vld [vmem:[#allocation51_spill] sm:$0xff] }
  0x9b   :  { %7104 = vst [vmem:[#allocation36_spill] sm:$0xff] %v3614_v2  ;;  %v7113_v2 = vsub.f32 %v7111_v47, %v7112_v24  ;;  %7114 = vst [vmem:[#allocation73_spill] sm:$0xff] %v3634_v57  ;;  %v3636_v60 = vld [vmem:[#allocation6 + $0x3a0] sm:$0xff]  ;;  %v3638_v42 = vld [vmem:[#allocation6 + $0x3a8] sm:$0xff] }
  0x9c   :  { %7115 = vst [vmem:[#allocation85_spill] sm:$0xff] %v3636_v60  ;;  %7116 = vst [vmem:[#allocation145_spill] sm:$0xff] %v3638_v42  ;;  %v7117_v10 = vld [vmem:[#allocation37_spill] sm:$0xff]  ;;  %v7121_v32 = vld [vmem:[#allocation74_spill] sm:$0xff] }
  0x9d   :  { %v1654_v31 = vand.u32 2147483647, %v7113_v2  ;;  %v7119_v3 = vsub.f32 %v7117_v10, %v7118_v59  ;;  %v7122_v15 = vld [vmem:[#allocation86_spill] sm:$0xff]  ;;  %v2252_v2 = vadd.f32 %v2251_v41, %v1647_v58  ;;  %v3650_v4 = vld [vmem:[#allocation3 + $0x3c8] sm:$0xff]  ;;  %v3654_v24 = vld [vmem:[#allocation6 + $0x3b8] sm:$0xff]  ;;  %v7126_v59 = vsub.f32 %v3110_v8, %v3162_v51 }
  0x9e   :  { %v7123_v48 = vsub.f32 %v7121_v32, %v7122_v15  ;;  %v3652_v44 = vld [vmem:[#allocation6 + $0x3b0] sm:$0xff]  ;;  %7125 = vst [vmem:[#allocation74_spill] sm:$0xff] %v3654_v24  ;;  %v3667_v58 = vld [vmem:[#allocation6 + $0x3c0] sm:$0xff]  ;;  %v7130_v50 = vld [vmem:[#allocation97_spill] sm:$0xff] }
  0x9f   :  { %v3645_v28 = vand.u32 2147483647, %v7119_v3  ;;  %7124 = vst [vmem:[#allocation51_spill] sm:$0xff] %v3652_v44  ;;  %v1658_v10 = vand.u32 2147483647, %v7126_v59  ;;  %v2126_v3 = vadd.f32 %v2125_v18, %v1650_v49  ;;  %v3663_v15 = vld [vmem:[#allocation3 + $0x3d0] sm:$0xff]  ;;  %v7131_v21 = vsub.f32 %v3129_v53, %v7130_v50 }
  0xa0   :  { %v1655_v47 = vand.u32 2147483647, %v7123_v48  ;;  %7127 = vst [vmem:[#allocation86_spill] sm:$0xff] %v3663_v15  ;;  %v3665_v48 = vld [vmem:[#allocation3 + $0x3d8] sm:$0xff]  ;;  %7129 = vst [vmem:[#allocation147_spill] sm:$0xff] %v3667_v58  ;;  %v2253_v38 = vadd.f32 %v2252_v2, %v1651_v35  ;;  %v3676_v51 = vld [vmem:[#allocation3 + $0x3e0] sm:$0xff]  ;;  %v7169_v58 = vsub.f32 %v3259_v11, %v3300_v12 }
  0xa1   :  { %7120 = vst [vmem:[#allocation37_spill] sm:$0xff] %v3645_v28  ;;  %7128 = vst [vmem:[#allocation146_spill] sm:$0xff] %v3665_v48  ;;  %v1659_v39 = vand.u32 2147483647, %v7131_v21  ;;  %v3678_v8 = vld [vmem:[#allocation3 + $0x3e8] sm:$0xff]  ;;  %v3682_v18 = vld [vmem:[#allocation6 + $0x3d0] sm:$0xff]  ;;  %v2127_v50 = vadd.f32 %v2126_v3, %v1654_v31 }
  0xa2   :  { %v3680_v49 = vld [vmem:[#allocation6 + $0x3c8] sm:$0xff]  ;;  %7133 = vst [vmem:[#allocation148_spill] sm:$0xff] %v3682_v18  ;;  %v7134_v32 = vld [vmem:[#allocation88_spill] sm:$0xff]  ;;  %v7135_v52 = vld [vmem:[#allocation102_spill] sm:$0xff]  ;;  %v2254_v33 = vadd.f32 %v2253_v38, %v1655_v47  ;;  %v1674_v18 = vand.u32 2147483647, %v7169_v58 }
  0xa3   :  { %7132 = vst [vmem:[#allocation97_spill] sm:$0xff] %v3680_v49  ;;  %v7136_v1 = vsub.f32 %v7134_v32, %v7135_v52  ;;  %v3691_v21 = vld [vmem:[#allocation3 + $0x3f0] sm:$0xff]  ;;  %v3693_v35 = vld [vmem:[#allocation3 + $0x3f8] sm:$0xff]  ;;  %v7140_v5 = vld [vmem:[#allocation89_spill] sm:$0xff]  ;;  %v2128_v47 = vadd.f32 %v2127_v50, %v1658_v10 }
  0xa4   :  { %7137 = vst [vmem:[#allocation88_spill] sm:$0xff] %v3691_v21  ;;  %7138 = vst [vmem:[#allocation102_spill] sm:$0xff] %v3693_v35  ;;  %v3695_v2 = vld [vmem:[#allocation6 + $0x3d8] sm:$0xff]  ;;  %v3704_v52 = vld [vmem:[#allocation3 + $0x400] sm:$0xff] }
  0xa5   :  { %v1662_v53 = vand.u32 2147483647, %v7136_v1  ;;  %7139 = vst [vmem:[#allocation149_spill] sm:$0xff] %v3695_v2  ;;  %v7141_v28 = vld [vmem:[#allocation103_spill] sm:$0xff]  ;;  %v3706_v1 = vld [vmem:[#allocation3 + $0x408] sm:$0xff]  ;;  %v3708_v31 = vld [vmem:[#allocation6 + $0x3e0] sm:$0xff] }
  0xa6   :  { %v7142_v41 = vsub.f32 %v7140_v5, %v7141_v28  ;;  %v3710_v3 = vld [vmem:[#allocation6 + $0x3e8] sm:$0xff]  ;;  %v7143_v23 = vld [vmem:[#allocation42_spill] sm:$0xff]  ;;  %v7144_v44 = vld [vmem:[#allocation56_spill] sm:$0xff] }
  0xa7   :  { %v7145_v43 = vsub.f32 %v7143_v23, %v7144_v44  ;;  %v7147_v24 = vld [vmem:[#allocation95_spill] sm:$0xff]  ;;  %v7148_v28 = vld [vmem:[#allocation106_spill] sm:$0xff]  ;;  %v3737_v10 = vld [vmem:[#allocation3 + $0x420] sm:$0xff]  ;;  %v7161_v23 = vsub.f32 %v3219_v55, %v3265_v25 }
  0xa8   :  { %v1663_v42 = vand.u32 2147483647, %v7142_v41  ;;  %v7149_v5 = vsub.f32 %v7147_v24, %v7148_v28  ;;  %v3722_v41 = vld [vmem:[#allocation3 + $0x410] sm:$0xff]  ;;  %v3724_v62 = vld [vmem:[#allocation3 + $0x418] sm:$0xff]  ;;  %v2255_v28 = vadd.f32 %v2254_v33, %v1659_v39  ;;  %v3739_v50 = vld [vmem:[#allocation6 + $0x400] sm:$0xff] }
  0xa9   :  { %v3717_v59 = vand.u32 2147483647, %v7145_v43  ;;  %7150 = vst [vmem:[#allocation103_spill] sm:$0xff] %v3722_v41  ;;  %7151 = vst [vmem:[#allocation42_spill] sm:$0xff] %v3724_v62  ;;  %v3726_v60 = vld [vmem:[#allocation6 + $0x3f0] sm:$0xff]  ;;  %v3728_v14 = vld [vmem:[#allocation6 + $0x3f8] sm:$0xff] }
  0xaa   :  { %v1666_v38 = vand.u32 2147483647, %v7149_v5  ;;  %7152 = vst [vmem:[#allocation56_spill] sm:$0xff] %v3726_v60  ;;  %7153 = vst [vmem:[#allocation95_spill] sm:$0xff] %v3728_v14  ;;  %v7154_v43 = vld [vmem:[#allocation96_spill] sm:$0xff]  ;;  %v7155_v44 = vld [vmem:[#allocation107_spill] sm:$0xff]  ;;  %v2256_v2 = vadd.f32 %v2255_v28, %v1663_v42 }
  0xab   :  { %7146 = vst [vmem:[#allocation89_spill] sm:$0xff] %v3717_v59  ;;  %v7156_v59 = vsub.f32 %v7154_v43, %v7155_v44  ;;  %v3741_v5 = vld [vmem:[#allocation6 + $0x408] sm:$0xff]  ;;  %v7157_v57 = vld [vmem:[#allocation43_spill] sm:$0xff]  ;;  %v1670_v43 = vand.u32 2147483647, %v7161_v23  ;;  %v3755_v33 = vld [vmem:[#allocation6 + $0x410] sm:$0xff]  ;;  %v7172_v23 = vsub.f32 %v3261_v34, %v3302_v45 }
  0xac   :  { %v7158_v9 = vld [vmem:[#allocation57_spill] sm:$0xff]  ;;  %7163 = vst [vmem:[#allocation107_spill] sm:$0xff] %v3755_v33  ;;  %v3757_v44 = vld [vmem:[#allocation6 + $0x418] sm:$0xff]  ;;  %v3766_v55 = vld [vmem:[#allocation3 + $0x430] sm:$0xff] }
  0xad   :  { %v1667_v24 = vand.u32 2147483647, %v7156_v59  ;;  %v7159_v32 = vsub.f32 %v7157_v57, %v7158_v9  ;;  %v2129_v59 = vadd.f32 %v2128_v47, %v1662_v53  ;;  %v3753_v39 = vld [vmem:[#allocation3 + $0x428] sm:$0xff]  ;;  %7164 = vst [vmem:[#allocation43_spill] sm:$0xff] %v3757_v44  ;;  %v7165_v9 = vld [vmem:[#allocation112_spill] sm:$0xff]  ;;  %7167 = vst [vmem:[#allocation57_spill] sm:$0xff] %v3766_v55  ;;  %v7176_v47 = vsub.f32 %v3282_v22, %v3321_v13 }
  0xae   :  { %7162 = vst [vmem:[#allocation96_spill] sm:$0xff] %v3753_v39  ;;  %v7166_v57 = vsub.f32 %v3221_v20, %v7165_v9  ;;  %v3768_v25 = vld [vmem:[#allocation3 + $0x438] sm:$0xff]  ;;  %v3770_v53 = vld [vmem:[#allocation6 + $0x420] sm:$0xff]  ;;  %v3781_v42 = vld [vmem:[#allocation3 + $0x448] sm:$0xff]  ;;  %v1675_v11 = vand.u32 2147483647, %v7172_v23  ;;  %v7181_v13 = vsub.f32 %v3296_v40, %v3337_v37 }
  0xaf   :  { %v3748_v49 = vand.u32 2147483647, %v7159_v32  ;;  %7168 = vst [vmem:[#allocation112_spill] sm:$0xff] %v3768_v25  ;;  %v2130_v48 = vadd.f32 %v2129_v59, %v1666_v38  ;;  %v3779_v20 = vld [vmem:[#allocation3 + $0x440] sm:$0xff]  ;;  %v3783_v28 = vld [vmem:[#allocation6 + $0x428] sm:$0xff]  ;;  %v3785_v9 = vld [vmem:[#allocation6 + $0x430] sm:$0xff]  ;;  %v2257_v12 = vadd.f32 %v2256_v2, %v1667_v24 }
  0xb0   :  { %v1671_v32 = vand.u32 2147483647, %v7166_v57  ;;  %7170 = vst [vmem:[#allocation150_spill] sm:$0xff] %v3783_v28  ;;  %7171 = vst [vmem:[#allocation151_spill] sm:$0xff] %v3785_v9  ;;  %v3794_v58 = vld [vmem:[#allocation3 + $0x450] sm:$0xff]  ;;  %v3796_v38 = vld [vmem:[#allocation3 + $0x458] sm:$0xff] }
  0xb1   :  { %7160 = vst [vmem:[#allocation106_spill] sm:$0xff] %v3748_v49  ;;  %7173 = vst [vmem:[#allocation152_spill] sm:$0xff] %v3794_v58  ;;  %v3798_v59 = vld [vmem:[#allocation6 + $0x438] sm:$0xff]  ;;  %v1678_v35 = vand.u32 2147483647, %v7176_v47  ;;  %v2131_v60 = vadd.f32 %v2130_v48, %v1670_v43  ;;  %v3807_v45 = vld [vmem:[#allocation3 + $0x460] sm:$0xff] }
  0xb2   :  { %7174 = vst [vmem:[#allocation153_spill] sm:$0xff] %v3796_v38  ;;  %7175 = vst [vmem:[#allocation154_spill] sm:$0xff] %v3798_v59  ;;  %v3809_v34 = vld [vmem:[#allocation3 + $0x468] sm:$0xff]  ;;  %v3811_v2 = vld [vmem:[#allocation6 + $0x440] sm:$0xff]  ;;  %v1679_v22 = vand.u32 2147483647, %v7181_v13  ;;  %v2258_v48 = vadd.f32 %v2257_v12, %v1671_v32 }
  0xb3   :  { %v3813_v24 = vld [vmem:[#allocation6 + $0x448] sm:$0xff]  ;;  %v3825_v43 = vld [vmem:[#allocation3 + $0x470] sm:$0xff]  ;;  %v3827_v47 = vld [vmem:[#allocation3 + $0x478] sm:$0xff]  ;;  %v2132_v40 = vadd.f32 %v2131_v60, %v1674_v18 }
  0xb4   :  { %v7177_v14 = vld [vmem:[#allocation49_spill] sm:$0xff]  ;;  %7183 = vst [vmem:[#allocation155_spill] sm:$0xff] %v3827_v47  ;;  %v3829_v44 = vld [vmem:[#allocation6 + $0x450] sm:$0xff]  ;;  %v3831_v62 = vld [vmem:[#allocation6 + $0x458] sm:$0xff] }
  0xb5   :  { %v7178_v33 = vld [vmem:[#allocation61_spill] sm:$0xff]  ;;  %7184 = vst [vmem:[#allocation156_spill] sm:$0xff] %v3829_v44  ;;  %7185 = vst [vmem:[#allocation157_spill] sm:$0xff] %v3831_v62  ;;  %v3840_v32 = vld [vmem:[#allocation3 + $0x480] sm:$0xff] }
  0xb6   :  { %v7179_v41 = vsub.f32 %v7177_v14, %v7178_v33  ;;  %7182 = vst [vmem:[#allocation61_spill] sm:$0xff] %v3825_v43  ;;  %v7187_v33 = vld [vmem:[#allocation118_spill] sm:$0xff]  ;;  %v3842_v12 = vld [vmem:[#allocation6 + $0x460] sm:$0xff]  ;;  %v3844_v13 = vld [vmem:[#allocation6 + $0x468] sm:$0xff] }
  0xb7   :  { %7190 = vst [vmem:[#allocation118_spill] sm:$0xff] %v3844_v13  ;;  %v7192_v49 = vld [vmem:[#allocation64_spill] sm:$0xff]  ;;  %v7195_v14 = vld [vmem:[#allocation114_spill] sm:$0xff]  ;;  %v7196_v9 = vld [vmem:[#allocation119_spill] sm:$0xff] }
  0xb8   :  { %v3820_v57 = vand.u32 2147483647, %v7179_v41  ;;  %v7186_v41 = vld [vmem:[#allocation23_spill] sm:$0xff]  ;;  %v7197_v55 = vsub.f32 %v7195_v14, %v7196_v9  ;;  %v3856_v60 = vld [vmem:[#allocation3 + $0x488] sm:$0xff]  ;;  %v3858_v18 = vld [vmem:[#allocation6 + $0x470] sm:$0xff]  ;;  %v7208_v14 = vsub.f32 %v3394_v27, %v3430_v7 }
  0xb9   :  { %v7188_v21 = vsub.f32 %v7186_v41, %v7187_v33  ;;  %7189 = vst [vmem:[#allocation23_spill] sm:$0xff] %v3840_v32  ;;  %7198 = vst [vmem:[#allocation64_spill] sm:$0xff] %v3858_v18  ;;  %v3860_v33 = vld [vmem:[#allocation6 + $0x478] sm:$0xff]  ;;  %v3869_v9 = vld [vmem:[#allocation3 + $0x490] sm:$0xff] }
  0xba   :  { %7180 = vst [vmem:[#allocation49_spill] sm:$0xff] %v3820_v57  ;;  %v7191_v57 = vld [vmem:[#allocation53_spill] sm:$0xff]  ;;  %v1683_v41 = vand.u32 2147483647, %v7197_v55  ;;  %7199 = vst [vmem:[#allocation114_spill] sm:$0xff] %v3860_v33  ;;  %v3871_v55 = vld [vmem:[#allocation3 + $0x498] sm:$0xff] }
  0xbb   :  { %v1682_v37 = vand.u32 2147483647, %v7188_v21  ;;  %v7193_v23 = vsub.f32 %v7191_v57, %v7192_v49  ;;  %v2259_v21 = vadd.f32 %v2258_v48, %v1675_v11  ;;  %v7200_v49 = vsub.f32 %v3364_v46, %v3398_v29  ;;  %7201 = vst [vmem:[#allocation119_spill] sm:$0xff] %v3869_v9  ;;  %7202 = vst [vmem:[#allocation158_spill] sm:$0xff] %v3871_v55  ;;  %v3873_v11 = vld [vmem:[#allocation6 + $0x480] sm:$0xff]  ;;  %v3884_v29 = vld [vmem:[#allocation3 + $0x4a8] sm:$0xff] }
  0xbc   :  { %7203 = vst [vmem:[#allocation159_spill] sm:$0xff] %v3873_v11  ;;  %v7204_v39 = vld [vmem:[#allocation32_spill] sm:$0xff]  ;;  %v7212_v38 = vld [vmem:[#allocation126_spill] sm:$0xff]  ;;  %v3912_v7 = vld [vmem:[#allocation3 + $0x4c8] sm:$0xff] }
  0xbd   :  { %v3851_v28 = vand.u32 2147483647, %v7193_v23  ;;  %v1686_v57 = vand.u32 2147483647, %v7200_v49  ;;  %v2133_v23 = vadd.f32 %v2132_v40, %v1678_v35  ;;  %v7205_v15 = vsub.f32 %v3366_v0, %v7204_v39  ;;  %v3882_v46 = vld [vmem:[#allocation3 + $0x4a0] sm:$0xff]  ;;  %v3886_v35 = vld [vmem:[#allocation6 + $0x488] sm:$0xff] }
  0xbe   :  { %v2260_v25 = vadd.f32 %v2259_v21, %v1679_v22  ;;  %7206 = vst [vmem:[#allocation32_spill] sm:$0xff] %v3886_v35  ;;  %v3888_v40 = vld [vmem:[#allocation6 + $0x490] sm:$0xff]  ;;  %v1690_v0 = vand.u32 2147483647, %v7208_v14  ;;  %v3899_v22 = vld [vmem:[#allocation3 + $0x4b8] sm:$0xff]  ;;  %v7213_v48 = vsub.f32 %v3396_v16, %v7212_v38  ;;  %v3910_v27 = vld [vmem:[#allocation3 + $0x4c0] sm:$0xff] }
  0xbf   :  { %7194 = vst [vmem:[#allocation53_spill] sm:$0xff] %v3851_v28  ;;  %v1687_v59 = vand.u32 2147483647, %v7205_v15  ;;  %7207 = vst [vmem:[#allocation160_spill] sm:$0xff] %v3888_v40  ;;  %v2134_v15 = vadd.f32 %v2133_v23, %v1682_v37  ;;  %v3897_v39 = vld [vmem:[#allocation3 + $0x4b0] sm:$0xff]  ;;  %v3901_v21 = vld [vmem:[#allocation6 + $0x498] sm:$0xff] }
  0xc0   :  { %7209 = vst [vmem:[#allocation161_spill] sm:$0xff] %v3897_v39  ;;  %7210 = vst [vmem:[#allocation162_spill] sm:$0xff] %v3899_v22  ;;  %v1691_v44 = vand.u32 2147483647, %v7213_v48  ;;  %v2261_v58 = vadd.f32 %v2260_v25, %v1683_v41  ;;  %v3914_v37 = vld [vmem:[#allocation6 + $0x4a0] sm:$0xff]  ;;  %v3916_v23 = vld [vmem:[#allocation6 + $0x4a8] sm:$0xff] }
  0xc1   :  { %7211 = vst [vmem:[#allocation163_spill] sm:$0xff] %v3901_v21  ;;  %7214 = vst [vmem:[#allocation126_spill] sm:$0xff] %v3912_v7  ;;  %v7215_v62 = vld [vmem:[#allocation58_spill] sm:$0xff]  ;;  %v7216_v18 = vld [vmem:[#allocation69_spill] sm:$0xff]  ;;  %v2135_v41 = vadd.f32 %v2134_v15, %v1686_v57 }
  0xc2   :  { %v7217_v43 = vsub.f32 %v7215_v62, %v7216_v18  ;;  %v7219_v33 = vld [vmem:[#allocation38_spill] sm:$0xff]  ;;  %v7220_v16 = vld [vmem:[#allocation127_spill] sm:$0xff]  ;;  %v3943_v57 = vld [vmem:[#allocation3 + $0x4e0] sm:$0xff]  ;;  %v7233_v62 = vsub.f32 %v3470_v19, %v3502_v36 }
  0xc3   :  { %v7221_v38 = vsub.f32 %v7219_v33, %v7220_v16  ;;  %v3928_v48 = vld [vmem:[#allocation3 + $0x4d0] sm:$0xff]  ;;  %v3930_v47 = vld [vmem:[#allocation3 + $0x4d8] sm:$0xff]  ;;  %v2262_v16 = vadd.f32 %v2261_v58, %v1687_v59  ;;  %v3945_v15 = vld [vmem:[#allocation6 + $0x4c0] sm:$0xff] }
  0xc4   :  { %v3923_v49 = vand.u32 2147483647, %v7217_v43  ;;  %7222 = vst [vmem:[#allocation69_spill] sm:$0xff] %v3928_v48  ;;  %7223 = vst [vmem:[#allocation38_spill] sm:$0xff] %v3930_v47  ;;  %v3932_v28 = vld [vmem:[#allocation6 + $0x4b0] sm:$0xff]  ;;  %v3934_v13 = vld [vmem:[#allocation6 + $0x4b8] sm:$0xff] }
  0xc5   :  { %v1694_v25 = vand.u32 2147483647, %v7221_v38  ;;  %7224 = vst [vmem:[#allocation127_spill] sm:$0xff] %v3932_v28  ;;  %7225 = vst [vmem:[#allocation164_spill] sm:$0xff] %v3934_v13  ;;  %v7226_v43 = vld [vmem:[#allocation31_spill] sm:$0xff]  ;;  %v3947_v38 = vld [vmem:[#allocation6 + $0x4c8] sm:$0xff] }
  0xc6   :  { %7218 = vst [vmem:[#allocation58_spill] sm:$0xff] %v3923_v49  ;;  %v7227_v18 = vsub.f32 %v3444_v63, %v7226_v43  ;;  %7228 = vst [vmem:[#allocation31_spill] sm:$0xff] %v3947_v38  ;;  %v7229_v11 = vld [vmem:[#allocation59_spill] sm:$0xff]  ;;  %v7230_v32 = vld [vmem:[#allocation70_spill] sm:$0xff]  ;;  %v1698_v63 = vand.u32 2147483647, %v7233_v62  ;;  %v2136_v43 = vadd.f32 %v2135_v41, %v1690_v0  ;;  %v7240_v49 = vsub.f32 %v3498_v54, %v3533_v26 }
  0xc7   :  { %v7231_v14 = vsub.f32 %v7229_v11, %v7230_v32  ;;  %v3959_v58 = vld [vmem:[#allocation3 + $0x4e8] sm:$0xff]  ;;  %v3961_v59 = vld [vmem:[#allocation6 + $0x4d0] sm:$0xff]  ;;  %v7236_v32 = vsub.f32 %v3472_v30, %v3504_v56  ;;  %v3974_v36 = vld [vmem:[#allocation3 + $0x4f8] sm:$0xff] }
  0xc8   :  { %v1695_v33 = vand.u32 2147483647, %v7227_v18  ;;  %7234 = vst [vmem:[#allocation70_spill] sm:$0xff] %v3961_v59  ;;  %v3963_v18 = vld [vmem:[#allocation6 + $0x4d8] sm:$0xff]  ;;  %v3972_v19 = vld [vmem:[#allocation3 + $0x4f0] sm:$0xff]  ;;  %7238 = vst [vmem:[#allocation167_spill] sm:$0xff] %v3974_v36  ;;  %v2137_v21 = vadd.f32 %v2136_v43, %v1694_v25 }
  0xc9   :  { %v3954_v35 = vand.u32 2147483647, %v7231_v14  ;;  %7235 = vst [vmem:[#allocation165_spill] sm:$0xff] %v3963_v18  ;;  %v1699_v11 = vand.u32 2147483647, %v7236_v32  ;;  %v2263_v14 = vadd.f32 %v2262_v16, %v1691_v44  ;;  %7237 = vst [vmem:[#allocation166_spill] sm:$0xff] %v3972_v19 }
  0xca   :  { %v3976_v0 = vld [vmem:[#allocation6 + $0x4e0] sm:$0xff]  ;;  %v1702_v40 = vand.u32 2147483647, %v7240_v49  ;;  %v3987_v56 = vld [vmem:[#allocation3 + $0x508] sm:$0xff]  ;;  %v3991_v16 = vld [vmem:[#allocation6 + $0x4f0] sm:$0xff] }
  0xcb   :  { %7232 = vst [vmem:[#allocation59_spill] sm:$0xff] %v3954_v35  ;;  %7239 = vst [vmem:[#allocation168_spill] sm:$0xff] %v3976_v0  ;;  %v3985_v30 = vld [vmem:[#allocation3 + $0x500] sm:$0xff]  ;;  %v3989_v44 = vld [vmem:[#allocation6 + $0x4e8] sm:$0xff]  ;;  %v2264_v26 = vadd.f32 %v2263_v14, %v1695_v33  ;;  %v2138_v35 = vadd.f32 %v2137_v21, %v1698_v63 }
  0xcc   :  { %7241 = vst [vmem:[#allocation169_spill] sm:$0xff] %v3987_v56  ;;  %7242 = vst [vmem:[#allocation170_spill] sm:$0xff] %v3989_v44  ;;  %v7244_v62 = vld [vmem:[#allocation55_spill] sm:$0xff]  ;;  %v7245_v13 = vld [vmem:[#allocation60_spill] sm:$0xff] }
  0xcd   :  { %7243 = vst [vmem:[#allocation171_spill] sm:$0xff] %v3991_v16  ;;  %v7246_v22 = vsub.f32 %v7244_v62, %v7245_v13  ;;  %v4000_v49 = vld [vmem:[#allocation3 + $0x510] sm:$0xff]  ;;  %v4002_v25 = vld [vmem:[#allocation3 + $0x518] sm:$0xff]  ;;  %v7250_v39 = vld [vmem:[#allocation48_spill] sm:$0xff]  ;;  %v2265_v63 = vadd.f32 %v2264_v26, %v1699_v11 }
  0xce   :  { %7247 = vst [vmem:[#allocation55_spill] sm:$0xff] %v4000_v49  ;;  %7248 = vst [vmem:[#allocation60_spill] sm:$0xff] %v4002_v25  ;;  %v4004_v43 = vld [vmem:[#allocation6 + $0x4f8] sm:$0xff]  ;;  %v4013_v13 = vld [vmem:[#allocation3 + $0x520] sm:$0xff] }
  0xcf   :  { %v1703_v54 = vand.u32 2147483647, %v7246_v22  ;;  %7249 = vst [vmem:[#allocation172_spill] sm:$0xff] %v4004_v43  ;;  %v7251_v55 = vld [vmem:[#allocation135_spill] sm:$0xff]  ;;  %v4015_v22 = vld [vmem:[#allocation3 + $0x528] sm:$0xff]  ;;  %v4017_v33 = vld [vmem:[#allocation6 + $0x500] sm:$0xff] }
  0xd0   :  { %v7252_v41 = vsub.f32 %v7250_v39, %v7251_v55  ;;  %7253 = vst [vmem:[#allocation48_spill] sm:$0xff] %v4015_v22  ;;  %v4019_v14 = vld [vmem:[#allocation6 + $0x508] sm:$0xff]  ;;  %v7255_v28 = vld [vmem:[#allocation62_spill] sm:$0xff]  ;;  %v7256_v59 = vld [vmem:[#allocation76_spill] sm:$0xff] }
  0xd1   :  { %7254 = vst [vmem:[#allocation135_spill] sm:$0xff] %v4019_v14  ;;  %v7257_v48 = vsub.f32 %v7255_v28, %v7256_v59  ;;  %v7259_v18 = vld [vmem:[#allocation44_spill] sm:$0xff]  ;;  %v4033_v47 = vld [vmem:[#allocation3 + $0x538] sm:$0xff]  ;;  %v4035_v38 = vld [vmem:[#allocation6 + $0x510] sm:$0xff] }
  0xd2   :  { %v1706_v9 = vand.u32 2147483647, %v7252_v41  ;;  %v7260_v55 = vld [vmem:[#allocation136_spill] sm:$0xff]  ;;  %v4031_v41 = vld [vmem:[#allocation3 + $0x530] sm:$0xff]  ;;  %7263 = vst [vmem:[#allocation44_spill] sm:$0xff] %v4033_v47  ;;  %v4037_v7 = vld [vmem:[#allocation6 + $0x518] sm:$0xff] }
  0xd3   :  { %v4026_v32 = vand.u32 2147483647, %v7257_v48  ;;  %v7261_v39 = vsub.f32 %v7259_v18, %v7260_v55  ;;  %7262 = vst [vmem:[#allocation76_spill] sm:$0xff] %v4031_v41  ;;  %7264 = vst [vmem:[#allocation136_spill] sm:$0xff] %v4035_v38  ;;  %v7266_v48 = vsub.f32 %v3573_v17, %v3605_v61  ;;  %v2139_v18 = vadd.f32 %v2138_v35, %v1702_v40  ;;  %v4046_v11 = vld [vmem:[#allocation3 + $0x540] sm:$0xff]  ;;  %v4050_v55 = vld [vmem:[#allocation6 + $0x528] sm:$0xff] }
  0xd4   :  { %7265 = vst [vmem:[#allocation173_spill] sm:$0xff] %v4037_v7  ;;  %v4048_v26 = vld [vmem:[#allocation6 + $0x520] sm:$0xff]  ;;  %7267 = vst [vmem:[#allocation174_spill] sm:$0xff] %v4050_v55  ;;  %v7269_v0 = vld [vmem:[#allocation77_spill] sm:$0xff]  ;;  %v2266_v61 = vadd.f32 %v2265_v63, %v1703_v54 }
  0xd5   :  { %7258 = vst [vmem:[#allocation62_spill] sm:$0xff] %v4026_v32  ;;  %v1707_v21 = vand.u32 2147483647, %v7261_v39  ;;  %v1710_v59 = vand.u32 2147483647, %v7266_v48  ;;  %v7268_v32 = vld [vmem:[#allocation63_spill] sm:$0xff]  ;;  %v2140_v36 = vadd.f32 %v2139_v18, %v1706_v9 }
  0xd6   :  { %v7270_v62 = vsub.f32 %v7268_v32, %v7269_v0  ;;  %v7272_v28 = vld [vmem:[#allocation142_spill] sm:$0xff]  ;;  %v4062_v35 = vld [vmem:[#allocation3 + $0x548] sm:$0xff]  ;;  %v4066_v48 = vld [vmem:[#allocation6 + $0x538] sm:$0xff] }
  0xd7   :  { %v7273_v16 = vsub.f32 %v3575_v6, %v7272_v28  ;;  %v4064_v40 = vld [vmem:[#allocation6 + $0x530] sm:$0xff]  ;;  %7275 = vst [vmem:[#allocation142_spill] sm:$0xff] %v4066_v48  ;;  %v7276_v0 = vld [vmem:[#allocation140_spill] sm:$0xff]  ;;  %v7277_v32 = vld [vmem:[#allocation85_spill] sm:$0xff]  ;;  %v2267_v56 = vadd.f32 %v2266_v61, %v1707_v21 }
  0xd8   :  { %v4057_v44 = vand.u32 2147483647, %v7270_v62  ;;  %7274 = vst [vmem:[#allocation77_spill] sm:$0xff] %v4064_v40  ;;  %v7278_v62 = vsub.f32 %v7276_v0, %v7277_v32  ;;  %v4075_v6 = vld [vmem:[#allocation3 + $0x550] sm:$0xff]  ;;  %v4079_v54 = vld [vmem:[#allocation6 + $0x540] sm:$0xff]  ;;  %v7282_v19 = vld [vmem:[#allocation141_spill] sm:$0xff] }
  0xd9   :  { %v1711_v17 = vand.u32 2147483647, %v7273_v16  ;;  %7279 = vst [vmem:[#allocation140_spill] sm:$0xff] %v4075_v6  ;;  %v4077_v16 = vld [vmem:[#allocation3 + $0x558] sm:$0xff]  ;;  %7281 = vst [vmem:[#allocation175_spill] sm:$0xff] %v4079_v54  ;;  %v4088_v0 = vld [vmem:[#allocation3 + $0x560] sm:$0xff] }
  0xda   :  { %7271 = vst [vmem:[#allocation63_spill] sm:$0xff] %v4057_v44  ;;  %v1714_v43 = vand.u32 2147483647, %v7278_v62  ;;  %7280 = vst [vmem:[#allocation85_spill] sm:$0xff] %v4077_v16  ;;  %v7283_v44 = vld [vmem:[#allocation145_spill] sm:$0xff]  ;;  %v4094_v32 = vld [vmem:[#allocation6 + $0x550] sm:$0xff] }
  0xdb   :  { %v7284_v39 = vsub.f32 %v7282_v19, %v7283_v44  ;;  %v4090_v9 = vld [vmem:[#allocation3 + $0x568] sm:$0xff]  ;;  %7286 = vst [vmem:[#allocation145_spill] sm:$0xff] %v4094_v32  ;;  %v7288_v7 = vld [vmem:[#allocation147_spill] sm:$0xff]  ;;  %v2141_v44 = vadd.f32 %v2140_v36, %v1710_v59  ;;  %v4103_v21 = vld [vmem:[#allocation3 + $0x570] sm:$0xff]  ;;  %v2268_v22 = vadd.f32 %v2267_v56, %v1711_v17 }
  0xdc   :  { %v4092_v18 = vld [vmem:[#allocation6 + $0x548] sm:$0xff]  ;;  %v4107_v61 = vld [vmem:[#allocation6 + $0x558] sm:$0xff]  ;;  %v7295_v38 = vld [vmem:[#allocation68_spill] sm:$0xff] }
  0xdd   :  { %v1715_v14 = vand.u32 2147483647, %v7284_v39  ;;  %7285 = vst [vmem:[#allocation141_spill] sm:$0xff] %v4092_v18  ;;  %v7287_v28 = vld [vmem:[#allocation73_spill] sm:$0xff]  ;;  %v4105_v39 = vld [vmem:[#allocation3 + $0x578] sm:$0xff]  ;;  %7292 = vst [vmem:[#allocation176_spill] sm:$0xff] %v4107_v61 }
  0xde   :  { %v7289_v25 = vsub.f32 %v7287_v28, %v7288_v7  ;;  %7290 = vst [vmem:[#allocation73_spill] sm:$0xff] %v4103_v21  ;;  %7291 = vst [vmem:[#allocation147_spill] sm:$0xff] %v4105_v39  ;;  %v7293_v49 = vld [vmem:[#allocation97_spill] sm:$0xff]  ;;  %v4116_v7 = vld [vmem:[#allocation3 + $0x580] sm:$0xff] }
  0xdf   :  { %v7294_v63 = vsub.f32 %v3650_v4, %v7293_v49  ;;  %v4118_v36 = vld [vmem:[#allocation3 + $0x588] sm:$0xff]  ;;  %v7299_v4 = vsub.f32 %v3676_v51, %v3708_v31  ;;  %v2142_v49 = vadd.f32 %v2141_v44, %v1714_v43  ;;  %v4134_v17 = vld [vmem:[#allocation3 + $0x590] sm:$0xff]  ;;  %v4140_v47 = vld [vmem:[#allocation6 + $0x578] sm:$0xff]  ;;  %v2269_v31 = vadd.f32 %v2268_v22, %v1715_v14 }
  0xe0   :  { %v1718_v19 = vand.u32 2147483647, %v7289_v25  ;;  %v4120_v25 = vld [vmem:[#allocation6 + $0x560] sm:$0xff]  ;;  %v4122_v59 = vld [vmem:[#allocation6 + $0x568] sm:$0xff]  ;;  %7300 = vst [vmem:[#allocation68_spill] sm:$0xff] %v4134_v17  ;;  %v4138_v48 = vld [vmem:[#allocation6 + $0x570] sm:$0xff] }
  0xe1   :  { %v1719_v55 = vand.u32 2147483647, %v7294_v63  ;;  %v7296_v40 = vld [vmem:[#allocation81_spill] sm:$0xff]  ;;  %v1722_v56 = vand.u32 2147483647, %v7299_v4  ;;  %v4136_v63 = vld [vmem:[#allocation3 + $0x598] sm:$0xff]  ;;  %v7315_v4 = vsub.f32 %v3737_v10, %v3770_v53 }
  0xe2   :  { %v7297_v41 = vsub.f32 %v7295_v38, %v7296_v40  ;;  %7301 = vst [vmem:[#allocation81_spill] sm:$0xff] %v4136_v63  ;;  %7302 = vst [vmem:[#allocation177_spill] sm:$0xff] %v4138_v48  ;;  %v4149_v43 = vld [vmem:[#allocation3 + $0x5a0] sm:$0xff]  ;;  %v4153_v44 = vld [vmem:[#allocation6 + $0x588] sm:$0xff]  ;;  %v7309_v38 = vsub.f32 %v3704_v52, %v3739_v50 }
  0xe3   :  { %7303 = vst [vmem:[#allocation178_spill] sm:$0xff] %v4140_v47  ;;  %v4151_v40 = vld [vmem:[#allocation6 + $0x580] sm:$0xff]  ;;  %v4165_v22 = vld [vmem:[#allocation3 + $0x5a8] sm:$0xff]  ;;  %v4167_v14 = vld [vmem:[#allocation6 + $0x590] sm:$0xff]  ;;  %v1730_v32 = vand.u32 2147483647, %v7315_v4 }
  0xe4   :  { %v4129_v62 = vand.u32 2147483647, %v7297_v41  ;;  %v7304_v41 = vsub.f32 %v3678_v8, %v3710_v3  ;;  %v7306_v54 = vld [vmem:[#allocation84_spill] sm:$0xff]  ;;  %v1726_v8 = vand.u32 2147483647, %v7309_v38  ;;  %v2143_v3 = vadd.f32 %v2142_v49, %v1718_v19  ;;  %v4178_v52 = vld [vmem:[#allocation3 + $0x5b0] sm:$0xff] }
  0xe5   :  { %7310 = vst [vmem:[#allocation84_spill] sm:$0xff] %v4167_v14  ;;  %7313 = vst [vmem:[#allocation180_spill] sm:$0xff] %v4178_v52  ;;  %v4180_v50 = vld [vmem:[#allocation3 + $0x5b8] sm:$0xff]  ;;  %v4182_v19 = vld [vmem:[#allocation6 + $0x5a0] sm:$0xff]  ;;  %v7323_v49 = vsub.f32 %v3779_v20, %v3811_v2  ;;  %v7329_v20 = vsub.f32 %v3781_v42, %v3813_v24 }
  0xe6   :  { %7298 = vst [vmem:[#allocation97_spill] sm:$0xff] %v4129_v62  ;;  %v1723_v51 = vand.u32 2147483647, %v7304_v41  ;;  %v7305_v62 = vld [vmem:[#allocation72_spill] sm:$0xff]  ;;  %v4169_v41 = vld [vmem:[#allocation6 + $0x598] sm:$0xff]  ;;  %7314 = vst [vmem:[#allocation181_spill] sm:$0xff] %v4180_v50  ;;  %v2144_v61 = vadd.f32 %v2143_v3, %v1722_v56 }
  0xe7   :  { %v7307_v28 = vsub.f32 %v7305_v62, %v7306_v54  ;;  %7311 = vst [vmem:[#allocation179_spill] sm:$0xff] %v4169_v41  ;;  %v7312_v54 = vsub.f32 %v3706_v1, %v3741_v5  ;;  %v4191_v1 = vld [vmem:[#allocation3 + $0x5c0] sm:$0xff]  ;;  %v4193_v5 = vld [vmem:[#allocation3 + $0x5c8] sm:$0xff]  ;;  %v7318_v47 = vld [vmem:[#allocation150_spill] sm:$0xff]  ;;  %v1734_v21 = vand.u32 2147483647, %v7323_v49 }
  0xe8   :  { %v7317_v38 = vld [vmem:[#allocation96_spill] sm:$0xff]  ;;  %v4206_v56 = vld [vmem:[#allocation3 + $0x5d0] sm:$0xff]  ;;  %v4208_v4 = vld [vmem:[#allocation3 + $0x5d8] sm:$0xff]  ;;  %v2145_v16 = vadd.f32 %v2144_v61, %v1726_v8  ;;  %v1735_v2 = vand.u32 2147483647, %v7329_v20 }
  0xe9   :  { %v4160_v18 = vand.u32 2147483647, %v7307_v28  ;;  %v1727_v62 = vand.u32 2147483647, %v7312_v54  ;;  %v2270_v28 = vadd.f32 %v2269_v31, %v1719_v55  ;;  %v4195_v55 = vld [vmem:[#allocation6 + $0x5a8] sm:$0xff]  ;;  %v4197_v31 = vld [vmem:[#allocation6 + $0x5b0] sm:$0xff]  ;;  %v7319_v39 = vsub.f32 %v7317_v38, %v7318_v47 }
  0xea   :  { %7316 = vst [vmem:[#allocation182_spill] sm:$0xff] %v4197_v31  ;;  %7320 = vst [vmem:[#allocation96_spill] sm:$0xff] %v4206_v56  ;;  %v4210_v3 = vld [vmem:[#allocation6 + $0x5b8] sm:$0xff]  ;;  %v4219_v47 = vld [vmem:[#allocation3 + $0x5e0] sm:$0xff]  ;;  %v2146_v24 = vadd.f32 %v2145_v16, %v1730_v32 }
  0xeb   :  { %7308 = vst [vmem:[#allocation72_spill] sm:$0xff] %v4160_v18  ;;  %v1731_v10 = vand.u32 2147483647, %v7319_v39  ;;  %v2271_v53 = vadd.f32 %v2270_v28, %v1723_v51  ;;  %7321 = vst [vmem:[#allocation150_spill] sm:$0xff] %v4208_v4  ;;  %v4221_v39 = vld [vmem:[#allocation3 + $0x5e8] sm:$0xff]  ;;  %v4223_v51 = vld [vmem:[#allocation6 + $0x5c0] sm:$0xff] }
  0xec   :  { %7322 = vst [vmem:[#allocation183_spill] sm:$0xff] %v4210_v3  ;;  %v4225_v28 = vld [vmem:[#allocation6 + $0x5c8] sm:$0xff]  ;;  %v7325_v48 = vld [vmem:[#allocation78_spill] sm:$0xff]  ;;  %v7326_v14 = vld [vmem:[#allocation91_spill] sm:$0xff]  ;;  %v2147_v50 = vadd.f32 %v2146_v24, %v1734_v21 }
  0xed   :  { %7324 = vst [vmem:[#allocation184_spill] sm:$0xff] %v4225_v28  ;;  %v7327_v17 = vsub.f32 %v7325_v48, %v7326_v14  ;;  %v2272_v61 = vadd.f32 %v2271_v53, %v1727_v62  ;;  %v4237_v8 = vld [vmem:[#allocation3 + $0x5f0] sm:$0xff]  ;;  %v4239_v49 = vld [vmem:[#allocation3 + $0x5f8] sm:$0xff]  ;;  %v4252_v14 = vld [vmem:[#allocation3 + $0x600] sm:$0xff] }
  0xee   :  { %7330 = vst [vmem:[#allocation91_spill] sm:$0xff] %v4237_v8  ;;  %7331 = vst [vmem:[#allocation185_spill] sm:$0xff] %v4239_v49  ;;  %v4241_v41 = vld [vmem:[#allocation6 + $0x5d0] sm:$0xff]  ;;  %v4243_v63 = vld [vmem:[#allocation6 + $0x5d8] sm:$0xff] }
  0xef   :  { %v4232_v54 = vand.u32 2147483647, %v7327_v17  ;;  %7332 = vst [vmem:[#allocation186_spill] sm:$0xff] %v4241_v41  ;;  %7333 = vst [vmem:[#allocation187_spill] sm:$0xff] %v4243_v63  ;;  %v7334_v17 = vsub.f32 %v3807_v45, %v3842_v12  ;;  %v4254_v62 = vld [vmem:[#allocation6 + $0x5e0] sm:$0xff]  ;;  %v4256_v53 = vld [vmem:[#allocation6 + $0x5e8] sm:$0xff]  ;;  %v2273_v12 = vadd.f32 %v2272_v61, %v1731_v10  ;;  %v7358_v61 = vsub.f32 %v3884_v29, %v3916_v23 }
  0xf0   :  { %7335 = vst [vmem:[#allocation188_spill] sm:$0xff] %v4252_v14  ;;  %v7336_v6 = vld [vmem:[#allocation79_spill] sm:$0xff]  ;;  %v7340_v48 = vld [vmem:[#allocation118_spill] sm:$0xff]  ;;  %v4268_v16 = vld [vmem:[#allocation3 + $0x608] sm:$0xff]  ;;  %v7364_v29 = vsub.f32 %v3910_v27, %v3945_v15 }
  0xf1   :  { %7328 = vst [vmem:[#allocation78_spill] sm:$0xff] %v4232_v54  ;;  %v1738_v42 = vand.u32 2147483647, %v7334_v17  ;;  %v7337_v54 = vld [vmem:[#allocation92_spill] sm:$0xff]  ;;  %v7341_v31 = vsub.f32 %v3809_v34, %v7340_v48  ;;  %v4270_v32 = vld [vmem:[#allocation6 + $0x5f0] sm:$0xff]  ;;  %v4272_v17 = vld [vmem:[#allocation6 + $0x5f8] sm:$0xff]  ;;  %v2274_v28 = vadd.f32 %v2273_v12, %v1735_v2  ;;  %v7354_v48 = vsub.f32 %v3882_v46, %v3914_v37 }
  0xf2   :  { %v7338_v38 = vsub.f32 %v7336_v6, %v7337_v54  ;;  %7342 = vst [vmem:[#allocation92_spill] sm:$0xff] %v4270_v32  ;;  %7343 = vst [vmem:[#allocation118_spill] sm:$0xff] %v4272_v17  ;;  %v7344_v6 = vld [vmem:[#allocation23_spill] sm:$0xff]  ;;  %v4281_v34 = vld [vmem:[#allocation3 + $0x610] sm:$0xff]  ;;  %v1747_v4 = vand.u32 2147483647, %v7358_v61 }
  0xf3   :  { %v1739_v45 = vand.u32 2147483647, %v7341_v31  ;;  %v7345_v54 = vld [vmem:[#allocation159_spill] sm:$0xff]  ;;  %7347 = vst [vmem:[#allocation23_spill] sm:$0xff] %v4281_v34  ;;  %v4285_v10 = vld [vmem:[#allocation6 + $0x600] sm:$0xff]  ;;  %v4296_v21 = vld [vmem:[#allocation3 + $0x628] sm:$0xff] }
  0xf4   :  { %v4263_v18 = vand.u32 2147483647, %v7338_v38  ;;  %v7346_v38 = vsub.f32 %v7344_v6, %v7345_v54  ;;  %v4283_v31 = vld [vmem:[#allocation3 + $0x618] sm:$0xff]  ;;  %7349 = vst [vmem:[#allocation189_spill] sm:$0xff] %v4285_v10  ;;  %v7350_v52 = vld [vmem:[#allocation32_spill] sm:$0xff]  ;;  %v4298_v24 = vld [vmem:[#allocation6 + $0x608] sm:$0xff] }
  0xf5   :  { %7348 = vst [vmem:[#allocation159_spill] sm:$0xff] %v4283_v31  ;;  %v7351_v20 = vsub.f32 %v3856_v60, %v7350_v52  ;;  %v4294_v6 = vld [vmem:[#allocation3 + $0x620] sm:$0xff]  ;;  %7352 = vst [vmem:[#allocation32_spill] sm:$0xff] %v4298_v24  ;;  %v4300_v54 = vld [vmem:[#allocation6 + $0x610] sm:$0xff]  ;;  %v1746_v60 = vand.u32 2147483647, %v7354_v48  ;;  %v2148_v52 = vadd.f32 %v2147_v50, %v1738_v42  ;;  %v2275_v41 = vadd.f32 %v2274_v28, %v1739_v45 }
  0xf6   :  { %7339 = vst [vmem:[#allocation79_spill] sm:$0xff] %v4263_v18  ;;  %v1742_v3 = vand.u32 2147483647, %v7346_v38  ;;  %7353 = vst [vmem:[#allocation190_spill] sm:$0xff] %v4300_v54  ;;  %v4309_v2 = vld [vmem:[#allocation3 + $0x630] sm:$0xff]  ;;  %v4313_v12 = vld [vmem:[#allocation6 + $0x618] sm:$0xff] }
  0xf7   :  { %v1743_v18 = vand.u32 2147483647, %v7351_v20  ;;  %7355 = vst [vmem:[#allocation191_spill] sm:$0xff] %v4309_v2  ;;  %v4311_v20 = vld [vmem:[#allocation3 + $0x638] sm:$0xff]  ;;  %7357 = vst [vmem:[#allocation193_spill] sm:$0xff] %v4313_v12  ;;  %v4322_v46 = vld [vmem:[#allocation3 + $0x640] sm:$0xff] }
  0xf8   :  { %7356 = vst [vmem:[#allocation192_spill] sm:$0xff] %v4311_v20  ;;  %v4324_v37 = vld [vmem:[#allocation3 + $0x648] sm:$0xff]  ;;  %v4326_v50 = vld [vmem:[#allocation6 + $0x620] sm:$0xff]  ;;  %v7360_v63 = vld [vmem:[#allocation82_spill] sm:$0xff]  ;;  %v1750_v23 = vand.u32 2147483647, %v7364_v29  ;;  %v2149_v28 = vadd.f32 %v2148_v52, %v1742_v3 }
  0xf9   :  { %7359 = vst [vmem:[#allocation194_spill] sm:$0xff] %v4324_v37  ;;  %v4328_v42 = vld [vmem:[#allocation6 + $0x628] sm:$0xff]  ;;  %v7361_v32 = vld [vmem:[#allocation98_spill] sm:$0xff]  ;;  %v4342_v61 = vld [vmem:[#allocation3 + $0x658] sm:$0xff]  ;;  %v2276_v15 = vadd.f32 %v2275_v41, %v1743_v18 }
  0xfa   :  { %v7362_v8 = vsub.f32 %v7360_v63, %v7361_v32  ;;  %v4340_v45 = vld [vmem:[#allocation3 + $0x650] sm:$0xff]  ;;  %7366 = vst [vmem:[#allocation195_spill] sm:$0xff] %v4342_v61  ;;  %v4346_v49 = vld [vmem:[#allocation6 + $0x638] sm:$0xff]  ;;  %v4355_v3 = vld [vmem:[#allocation3 + $0x660] sm:$0xff] }
  0xfb   :  { %7365 = vst [vmem:[#allocation98_spill] sm:$0xff] %v4340_v45  ;;  %v4344_v17 = vld [vmem:[#allocation6 + $0x630] sm:$0xff]  ;;  %7368 = vst [vmem:[#allocation197_spill] sm:$0xff] %v4346_v49  ;;  %v7370_v32 = vld [vmem:[#allocation31_spill] sm:$0xff]  ;;  %v2277_v12 = vadd.f32 %v2276_v15, %v1747_v4 }
  0xfc   :  { %v4335_v38 = vand.u32 2147483647, %v7362_v8  ;;  %7367 = vst [vmem:[#allocation196_spill] sm:$0xff] %v4344_v17  ;;  %v7369_v8 = vld [vmem:[#allocation126_spill] sm:$0xff]  ;;  %v4357_v52 = vld [vmem:[#allocation6 + $0x640] sm:$0xff]  ;;  %v4359_v29 = vld [vmem:[#allocation6 + $0x648] sm:$0xff] }
  0xfd   :  { %v7371_v56 = vsub.f32 %v7369_v8, %v7370_v32  ;;  %7372 = vst [vmem:[#allocation126_spill] sm:$0xff] %v4355_v3  ;;  %7373 = vst [vmem:[#allocation31_spill] sm:$0xff] %v4359_v29  ;;  %v7374_v10 = vld [vmem:[#allocation83_spill] sm:$0xff]  ;;  %v7378_v63 = vld [vmem:[#allocation168_spill] sm:$0xff] }
  0xfe   :  { %7363 = vst [vmem:[#allocation82_spill] sm:$0xff] %v4335_v38  ;;  %v7375_v14 = vld [vmem:[#allocation99_spill] sm:$0xff]  ;;  %v7379_v54 = vsub.f32 %v3943_v57, %v7378_v63  ;;  %v4371_v18 = vld [vmem:[#allocation3 + $0x668] sm:$0xff]  ;;  %v4373_v41 = vld [vmem:[#allocation6 + $0x650] sm:$0xff]  ;;  %v7387_v38 = vsub.f32 %v3985_v30, %v4017_v33 }
  0xff   :  { %v1751_v27 = vand.u32 2147483647, %v7371_v56  ;;  %v7376_v48 = vsub.f32 %v7374_v10, %v7375_v14  ;;  %v2150_v56 = vadd.f32 %v2149_v28, %v1746_v60  ;;  %7380 = vst [vmem:[#allocation99_spill] sm:$0xff] %v4373_v41  ;;  %v4375_v32 = vld [vmem:[#allocation6 + $0x658] sm:$0xff]  ;;  %v7382_v14 = vld [vmem:[#allocation170_spill] sm:$0xff]  ;;  %v4388_v60 = vld [vmem:[#allocation6 + $0x660] sm:$0xff]  ;;  %v7396_v28 = vsub.f32 %v4013_v13, %v4048_v26 }
 0x100   :  { %v1754_v8 = vand.u32 2147483647, %v7379_v54  ;;  %7381 = vst [vmem:[#allocation168_spill] sm:$0xff] %v4375_v32  ;;  %v7383_v10 = vsub.f32 %v3959_v58, %v7382_v14  ;;  %v4384_v57 = vld [vmem:[#allocation3 + $0x670] sm:$0xff]  ;;  %v4386_v54 = vld [vmem:[#allocation3 + $0x678] sm:$0xff]  ;;  %7386 = vst [vmem:[#allocation199_spill] sm:$0xff] %v4388_v60 }
 0x101   :  { %v4366_v24 = vand.u32 2147483647, %v7376_v48  ;;  %7384 = vst [vmem:[#allocation170_spill] sm:$0xff] %v4384_v57  ;;  %7385 = vst [vmem:[#allocation198_spill] sm:$0xff] %v4386_v54  ;;  %v1758_v34 = vand.u32 2147483647, %v7387_v38  ;;  %v2151_v31 = vadd.f32 %v2150_v56, %v1750_v23  ;;  %v2278_v33 = vadd.f32 %v2277_v12, %v1751_v27 }
 0x102   :  { %v1755_v48 = vand.u32 2147483647, %v7383_v10  ;;  %v4397_v58 = vld [vmem:[#allocation3 + $0x680] sm:$0xff]  ;;  %v4399_v4 = vld [vmem:[#allocation3 + $0x688] sm:$0xff]  ;;  %v4403_v14 = vld [vmem:[#allocation6 + $0x670] sm:$0xff] }
 0x103   :  { %7377 = vst [vmem:[#allocation83_spill] sm:$0xff] %v4366_v24  ;;  %v4401_v15 = vld [vmem:[#allocation6 + $0x668] sm:$0xff]  ;;  %7389 = vst [vmem:[#allocation201_spill] sm:$0xff] %v4403_v14  ;;  %v7391_v49 = vld [vmem:[#allocation135_spill] sm:$0xff]  ;;  %v1762_v2 = vand.u32 2147483647, %v7396_v28  ;;  %v2152_v24 = vadd.f32 %v2151_v31, %v1754_v8 }
 0x104   :  { %7388 = vst [vmem:[#allocation200_spill] sm:$0xff] %v4401_v15  ;;  %v7390_v63 = vld [vmem:[#allocation169_spill] sm:$0xff]  ;;  %v4412_v38 = vld [vmem:[#allocation3 + $0x690] sm:$0xff]  ;;  %v4414_v23 = vld [vmem:[#allocation3 + $0x698] sm:$0xff]  ;;  %v2279_v8 = vadd.f32 %v2278_v33, %v1755_v48 }
 0x105   :  { %v7392_v20 = vsub.f32 %v7390_v63, %v7391_v49  ;;  %7393 = vst [vmem:[#allocation169_spill] sm:$0xff] %v4412_v38  ;;  %7394 = vst [vmem:[#allocation135_spill] sm:$0xff] %v4414_v23  ;;  %v4416_v56 = vld [vmem:[#allocation6 + $0x678] sm:$0xff]  ;;  %v4425_v49 = vld [vmem:[#allocation3 + $0x6a0] sm:$0xff] }
 0x106   :  { %7395 = vst [vmem:[#allocation202_spill] sm:$0xff] %v4416_v56  ;;  %v4429_v12 = vld [vmem:[#allocation6 + $0x680] sm:$0xff]  ;;  %v4431_v27 = vld [vmem:[#allocation6 + $0x688] sm:$0xff]  ;;  %v7397_v17 = vld [vmem:[#allocation90_spill] sm:$0xff] }
 0x107   :  { %v1759_v30 = vand.u32 2147483647, %v7392_v20  ;;  %v4427_v20 = vld [vmem:[#allocation3 + $0x6a8] sm:$0xff]  ;;  %v7398_v41 = vld [vmem:[#allocation104_spill] sm:$0xff]  ;;  %v7402_v13 = vld [vmem:[#allocation174_spill] sm:$0xff] }
 0x108   :  { %v7399_v45 = vsub.f32 %v7397_v17, %v7398_v41  ;;  %v7401_v32 = vld [vmem:[#allocation48_spill] sm:$0xff]  ;;  %v4443_v28 = vld [vmem:[#allocation3 + $0x6b0] sm:$0xff]  ;;  %v4445_v61 = vld [vmem:[#allocation3 + $0x6b8] sm:$0xff] }
 0x109   :  { %v7403_v26 = vsub.f32 %v7401_v32, %v7402_v13  ;;  %7404 = vst [vmem:[#allocation104_spill] sm:$0xff] %v4443_v28  ;;  %7405 = vst [vmem:[#allocation48_spill] sm:$0xff] %v4445_v61  ;;  %v4447_v29 = vld [vmem:[#allocation6 + $0x690] sm:$0xff]  ;;  %v4449_v37 = vld [vmem:[#allocation6 + $0x698] sm:$0xff]  ;;  %v2153_v13 = vadd.f32 %v2152_v24, %v1758_v34 }
 0x10a   :  { %v4438_v10 = vand.u32 2147483647, %v7399_v45  ;;  %7406 = vst [vmem:[#allocation174_spill] sm:$0xff] %v4447_v29  ;;  %7407 = vst [vmem:[#allocation203_spill] sm:$0xff] %v4449_v37  ;;  %v7408_v45 = vld [vmem:[#allocation175_spill] sm:$0xff]  ;;  %v4458_v48 = vld [vmem:[#allocation3 + $0x6c0] sm:$0xff] }
 0x10b   :  { %v1763_v31 = vand.u32 2147483647, %v7403_v26  ;;  %v7409_v41 = vsub.f32 %v4046_v11, %v7408_v45  ;;  %v4460_v33 = vld [vmem:[#allocation6 + $0x6a0] sm:$0xff]  ;;  %v4462_v26 = vld [vmem:[#allocation6 + $0x6a8] sm:$0xff]  ;;  %v7410_v60 = vld [vmem:[#allocation94_spill] sm:$0xff]  ;;  %v2280_v45 = vadd.f32 %v2279_v8, %v1759_v30  ;;  %v7427_v8 = vsub.f32 %v4118_v36, %v4153_v44 }
 0x10c   :  { %7400 = vst [vmem:[#allocation90_spill] sm:$0xff] %v4438_v10  ;;  %v7411_v3 = vld [vmem:[#allocation105_spill] sm:$0xff]  ;;  %v4476_v24 = vld [vmem:[#allocation6 + $0x6b0] sm:$0xff]  ;;  %v4491_v30 = vld [vmem:[#allocation6 + $0x6c0] sm:$0xff]  ;;  %v7421_v10 = vsub.f32 %v4090_v9, %v4122_v59  ;;  %v7432_v36 = vsub.f32 %v4149_v43, %v4182_v19 }
 0x10d   :  { %v1766_v32 = vand.u32 2147483647, %v7409_v41  ;;  %v7412_v63 = vsub.f32 %v7410_v60, %v7411_v3  ;;  %v7414_v17 = vld [vmem:[#allocation141_spill] sm:$0xff]  ;;  %7416 = vst [vmem:[#allocation94_spill] sm:$0xff] %v4476_v24  ;;  %v4478_v41 = vld [vmem:[#allocation6 + $0x6b8] sm:$0xff]  ;;  %v7418_v3 = vsub.f32 %v4088_v0, %v4120_v25  ;;  %v2281_v56 = vadd.f32 %v2280_v45, %v1763_v31  ;;  %v4500_v0 = vld [vmem:[#allocation3 + $0x6e0] sm:$0xff] }
 0x10e   :  { %v7415_v14 = vsub.f32 %v4062_v35, %v7414_v17  ;;  %v4474_v34 = vld [vmem:[#allocation3 + $0x6c8] sm:$0xff]  ;;  %7417 = vst [vmem:[#allocation105_spill] sm:$0xff] %v4478_v41  ;;  %v4487_v35 = vld [vmem:[#allocation3 + $0x6d0] sm:$0xff]  ;;  %v1771_v57 = vand.u32 2147483647, %v7421_v10  ;;  %v7423_v17 = vsub.f32 %v4116_v7, %v4151_v40  ;;  %v4517_v31 = vld [vmem:[#allocation3 + $0x6f8] sm:$0xff] }
 0x10f   :  { %v4469_v15 = vand.u32 2147483647, %v7412_v63  ;;  %v1770_v60 = vand.u32 2147483647, %v7418_v3  ;;  %v2154_v63 = vadd.f32 %v2153_v13, %v1762_v2  ;;  %7419 = vst [vmem:[#allocation141_spill] sm:$0xff] %v4487_v35  ;;  %v4502_v25 = vld [vmem:[#allocation3 + $0x6e8] sm:$0xff] }
 0x110   :  { %v1767_v11 = vand.u32 2147483647, %v7415_v14  ;;  %v4489_v14 = vld [vmem:[#allocation3 + $0x6d8] sm:$0xff]  ;;  %v4504_v2 = vld [vmem:[#allocation6 + $0x6c8] sm:$0xff]  ;;  %v4506_v13 = vld [vmem:[#allocation6 + $0x6d0] sm:$0xff]  ;;  %7425 = vst [vmem:[#allocation207_spill] sm:$0xff] %v4517_v31 }
 0x111   :  { %7413 = vst [vmem:[#allocation175_spill] sm:$0xff] %v4469_v15  ;;  %7420 = vst [vmem:[#allocation204_spill] sm:$0xff] %v4489_v14  ;;  %v1774_v9 = vand.u32 2147483647, %v7423_v17  ;;  %v2155_v59 = vadd.f32 %v2154_v63, %v1766_v32  ;;  %v4515_v10 = vld [vmem:[#allocation3 + $0x6f0] sm:$0xff]  ;;  %v4519_v45 = vld [vmem:[#allocation6 + $0x6d8] sm:$0xff] }
 0x112   :  { %7422 = vst [vmem:[#allocation205_spill] sm:$0xff] %v4506_v13  ;;  %7424 = vst [vmem:[#allocation206_spill] sm:$0xff] %v4515_v10  ;;  %v1775_v23 = vand.u32 2147483647, %v7427_v8  ;;  %v2282_v29 = vadd.f32 %v2281_v56, %v1767_v11  ;;  %v4528_v7 = vld [vmem:[#allocation3 + $0x700] sm:$0xff]  ;;  %v4530_v40 = vld [vmem:[#allocation3 + $0x708] sm:$0xff] }
 0x113   :  { %7426 = vst [vmem:[#allocation208_spill] sm:$0xff] %v4519_v45  ;;  %v4532_v32 = vld [vmem:[#allocation6 + $0x6e0] sm:$0xff]  ;;  %v4534_v63 = vld [vmem:[#allocation6 + $0x6e8] sm:$0xff]  ;;  %v1778_v44 = vand.u32 2147483647, %v7432_v36  ;;  %v2156_v56 = vadd.f32 %v2155_v59, %v1770_v60  ;;  %v4546_v11 = vld [vmem:[#allocation3 + $0x710] sm:$0xff]  ;;  %v7449_v36 = vsub.f32 %v4219_v47, %v4254_v62 }
 0x114   :  { %v7428_v37 = vld [vmem:[#allocation100_spill] sm:$0xff]  ;;  %v7429_v24 = vld [vmem:[#allocation109_spill] sm:$0xff]  ;;  %v4548_v8 = vld [vmem:[#allocation3 + $0x718] sm:$0xff]  ;;  %v2283_v19 = vadd.f32 %v2282_v29, %v1771_v57 }
 0x115   :  { %v7430_v28 = vsub.f32 %v7428_v37, %v7429_v24  ;;  %7433 = vst [vmem:[#allocation109_spill] sm:$0xff] %v4546_v11  ;;  %7434 = vst [vmem:[#allocation209_spill] sm:$0xff] %v4548_v8  ;;  %v4550_v41 = vld [vmem:[#allocation6 + $0x6f0] sm:$0xff]  ;;  %v4552_v61 = vld [vmem:[#allocation6 + $0x6f8] sm:$0xff]  ;;  %v7442_v37 = vsub.f32 %v4191_v1, %v4223_v51  ;;  %v1786_v13 = vand.u32 2147483647, %v7449_v36 }
 0x116   :  { %7435 = vst [vmem:[#allocation210_spill] sm:$0xff] %v4550_v41  ;;  %7436 = vst [vmem:[#allocation211_spill] sm:$0xff] %v4552_v61  ;;  %v4561_v24 = vld [vmem:[#allocation3 + $0x720] sm:$0xff]  ;;  %v4565_v59 = vld [vmem:[#allocation6 + $0x708] sm:$0xff]  ;;  %v2284_v45 = vadd.f32 %v2283_v19, %v1775_v23 }
 0x117   :  { %v4541_v3 = vand.u32 2147483647, %v7430_v28  ;;  %v7437_v28 = vsub.f32 %v4165_v22, %v4195_v55  ;;  %v4563_v60 = vld [vmem:[#allocation6 + $0x700] sm:$0xff]  ;;  %v7438_v38 = vld [vmem:[#allocation101_spill] sm:$0xff]  ;;  %v7439_v54 = vld [vmem:[#allocation110_spill] sm:$0xff]  ;;  %v2157_v55 = vadd.f32 %v2156_v56, %v1774_v9 }
 0x118   :  { %v7440_v17 = vsub.f32 %v7438_v38, %v7439_v54  ;;  %v1782_v22 = vand.u32 2147483647, %v7442_v37  ;;  %v4577_v29 = vld [vmem:[#allocation3 + $0x728] sm:$0xff]  ;;  %v4579_v57 = vld [vmem:[#allocation6 + $0x710] sm:$0xff]  ;;  %v7445_v54 = vld [vmem:[#allocation184_spill] sm:$0xff]  ;;  %v7452_v37 = vsub.f32 %v4221_v39, %v4256_v53 }
 0x119   :  { %7431 = vst [vmem:[#allocation100_spill] sm:$0xff] %v4541_v3  ;;  %v1779_v43 = vand.u32 2147483647, %v7437_v28  ;;  %7443 = vst [vmem:[#allocation110_spill] sm:$0xff] %v4579_v57  ;;  %v4581_v28 = vld [vmem:[#allocation6 + $0x718] sm:$0xff]  ;;  %v7446_v38 = vsub.f32 %v4193_v5, %v7445_v54  ;;  %v4590_v1 = vld [vmem:[#allocation3 + $0x730] sm:$0xff]  ;;  %v2158_v14 = vadd.f32 %v2157_v55, %v1778_v44 }
 0x11a   :  { %v4572_v3 = vand.u32 2147483647, %v7440_v17  ;;  %7444 = vst [vmem:[#allocation212_spill] sm:$0xff] %v4581_v28  ;;  %7447 = vst [vmem:[#allocation184_spill] sm:$0xff] %v4590_v1  ;;  %v4592_v51 = vld [vmem:[#allocation3 + $0x738] sm:$0xff]  ;;  %v4594_v9 = vld [vmem:[#allocation6 + $0x720] sm:$0xff] }
 0x11b   :  { %v1783_v17 = vand.u32 2147483647, %v7446_v38  ;;  %7448 = vst [vmem:[#allocation213_spill] sm:$0xff] %v4592_v51  ;;  %v4603_v5 = vld [vmem:[#allocation3 + $0x740] sm:$0xff]  ;;  %v4605_v23 = vld [vmem:[#allocation3 + $0x748] sm:$0xff]  ;;  %v4609_v54 = vld [vmem:[#allocation6 + $0x730] sm:$0xff]  ;;  %v2285_v62 = vadd.f32 %v2284_v45, %v1779_v43  ;;  %v2159_v35 = vadd.f32 %v2158_v14, %v1782_v22 }
 0x11c   :  { %7441 = vst [vmem:[#allocation101_spill] sm:$0xff] %v4572_v3  ;;  %v4607_v19 = vld [vmem:[#allocation6 + $0x728] sm:$0xff]  ;;  %7451 = vst [vmem:[#allocation215_spill] sm:$0xff] %v4609_v54  ;;  %v1787_v47 = vand.u32 2147483647, %v7452_v37  ;;  %v4618_v44 = vld [vmem:[#allocation3 + $0x750] sm:$0xff] }
 0x11d   :  { %7450 = vst [vmem:[#allocation214_spill] sm:$0xff] %v4607_v19  ;;  %7453 = vst [vmem:[#allocation216_spill] sm:$0xff] %v4618_v44  ;;  %v4620_v36 = vld [vmem:[#allocation3 + $0x758] sm:$0xff]  ;;  %v7456_v31 = vld [vmem:[#allocation188_spill] sm:$0xff]  ;;  %v2286_v22 = vadd.f32 %v2285_v62, %v1783_v17 }
 0x11e   :  { %7454 = vst [vmem:[#allocation217_spill] sm:$0xff] %v4620_v36  ;;  %v4622_v55 = vld [vmem:[#allocation6 + $0x738] sm:$0xff]  ;;  %v7457_v41 = vld [vmem:[#allocation189_spill] sm:$0xff]  ;;  %v4631_v39 = vld [vmem:[#allocation3 + $0x760] sm:$0xff] }
 0x11f   :  { %7455 = vst [vmem:[#allocation218_spill] sm:$0xff] %v4622_v55  ;;  %v7458_v56 = vsub.f32 %v7456_v31, %v7457_v41  ;;  %v4633_v53 = vld [vmem:[#allocation3 + $0x768] sm:$0xff]  ;;  %v4635_v45 = vld [vmem:[#allocation6 + $0x740] sm:$0xff]  ;;  %v7459_v61 = vld [vmem:[#allocation18_spill] sm:$0xff] }
 0x120   :  { %v4637_v43 = vld [vmem:[#allocation6 + $0x748] sm:$0xff]  ;;  %v7460_v57 = vld [vmem:[#allocation22_spill] sm:$0xff]  ;;  %v7463_v41 = vld [vmem:[#allocation32_spill] sm:$0xff] }
 0x121   :  { %v1790_v10 = vand.u32 2147483647, %v7458_v56  ;;  %v7461_v11 = vsub.f32 %v7459_v61, %v7460_v57  ;;  %v7464_v31 = vsub.f32 %v4268_v16, %v7463_v41  ;;  %v4649_v56 = vld [vmem:[#allocation3 + $0x770] sm:$0xff]  ;;  %v4651_v28 = vld [vmem:[#allocation3 + $0x778] sm:$0xff]  ;;  %v2160_v57 = vadd.f32 %v2159_v35, %v1786_v13  ;;  %v4664_v17 = vld [vmem:[#allocation3 + $0x780] sm:$0xff] }
 0x122   :  { %7465 = vst [vmem:[#allocation189_spill] sm:$0xff] %v4649_v56  ;;  %7466 = vst [vmem:[#allocation18_spill] sm:$0xff] %v4651_v28  ;;  %v4653_v8 = vld [vmem:[#allocation6 + $0x750] sm:$0xff]  ;;  %v4655_v3 = vld [vmem:[#allocation6 + $0x758] sm:$0xff]  ;;  %v7475_v61 = vsub.f32 %v4296_v21, %v4328_v42 }
 0x123   :  { %v4644_v38 = vand.u32 2147483647, %v7461_v11  ;;  %v1791_v14 = vand.u32 2147483647, %v7464_v31  ;;  %7467 = vst [vmem:[#allocation22_spill] sm:$0xff] %v4653_v8  ;;  %7468 = vst [vmem:[#allocation32_spill] sm:$0xff] %v4655_v3  ;;  %v7469_v11 = vsub.f32 %v4294_v6, %v4326_v50  ;;  %v2287_v50 = vadd.f32 %v2286_v22, %v1787_v47 }
 0x124   :  { %v4666_v62 = vld [vmem:[#allocation6 + $0x760] sm:$0xff]  ;;  %v4668_v41 = vld [vmem:[#allocation6 + $0x768] sm:$0xff]  ;;  %v1795_v6 = vand.u32 2147483647, %v7475_v61  ;;  %v4682_v13 = vld [vmem:[#allocation6 + $0x770] sm:$0xff] }
 0x125   :  { %7462 = vst [vmem:[#allocation188_spill] sm:$0xff] %v4644_v38  ;;  %v1794_v16 = vand.u32 2147483647, %v7469_v11  ;;  %7470 = vst [vmem:[#allocation219_spill] sm:$0xff] %v4668_v41  ;;  %v7471_v38 = vld [vmem:[#allocation108_spill] sm:$0xff]  ;;  %v7472_v15 = vld [vmem:[#allocation113_spill] sm:$0xff]  ;;  %v2288_v1 = vadd.f32 %v2287_v50, %v1791_v14 }
 0x126   :  { %v7473_v37 = vsub.f32 %v7471_v38, %v7472_v15  ;;  %v4680_v35 = vld [vmem:[#allocation3 + $0x788] sm:$0xff]  ;;  %7476 = vst [vmem:[#allocation113_spill] sm:$0xff] %v4682_v13  ;;  %v4684_v11 = vld [vmem:[#allocation6 + $0x778] sm:$0xff]  ;;  %v7478_v15 = vsub.f32 %v4322_v46, %v4357_v52  ;;  %v4693_v21 = vld [vmem:[#allocation3 + $0x790] sm:$0xff] }
 0x127   :  { %7477 = vst [vmem:[#allocation220_spill] sm:$0xff] %v4684_v11  ;;  %v4695_v42 = vld [vmem:[#allocation3 + $0x798] sm:$0xff]  ;;  %v4697_v47 = vld [vmem:[#allocation6 + $0x780] sm:$0xff]  ;;  %v7481_v54 = vld [vmem:[#allocation194_spill] sm:$0xff]  ;;  %v2289_v41 = vadd.f32 %v2288_v1, %v1795_v6 }
 0x128   :  { %v4675_v19 = vand.u32 2147483647, %v7473_v37  ;;  %v1798_v38 = vand.u32 2147483647, %v7478_v15  ;;  %v2161_v37 = vadd.f32 %v2160_v57, %v1790_v10  ;;  %7479 = vst [vmem:[#allocation221_spill] sm:$0xff] %v4695_v42  ;;  %7480 = vst [vmem:[#allocation222_spill] sm:$0xff] %v4697_v47 }
 0x129   :  { %v7482_v55 = vld [vmem:[#allocation31_spill] sm:$0xff]  ;;  %v4706_v46 = vld [vmem:[#allocation3 + $0x7a0] sm:$0xff]  ;;  %v4708_v52 = vld [vmem:[#allocation3 + $0x7a8] sm:$0xff] }
 0x12a   :  { %7474 = vst [vmem:[#allocation108_spill] sm:$0xff] %v4675_v19  ;;  %v7483_v31 = vsub.f32 %v7481_v54, %v7482_v55  ;;  %v4710_v10 = vld [vmem:[#allocation6 + $0x788] sm:$0xff]  ;;  %v4712_v57 = vld [vmem:[#allocation6 + $0x790] sm:$0xff]  ;;  %v7487_v3 = vld [vmem:[#allocation199_spill] sm:$0xff]  ;;  %v2162_v55 = vadd.f32 %v2161_v37, %v1794_v16 }
 0x12b   :  { %7484 = vst [vmem:[#allocation194_spill] sm:$0xff] %v4710_v10  ;;  %7485 = vst [vmem:[#allocation31_spill] sm:$0xff] %v4712_v57  ;;  %v7486_v61 = vld [vmem:[#allocation126_spill] sm:$0xff]  ;;  %v4725_v50 = vld [vmem:[#allocation6 + $0x798] sm:$0xff] }
 0x12c   :  { %v1799_v51 = vand.u32 2147483647, %v7483_v31  ;;  %v7488_v36 = vsub.f32 %v7486_v61, %v7487_v3  ;;  %v4721_v14 = vld [vmem:[#allocation3 + $0x7b0] sm:$0xff]  ;;  %v4723_v31 = vld [vmem:[#allocation3 + $0x7b8] sm:$0xff]  ;;  %7491 = vst [vmem:[#allocation223_spill] sm:$0xff] %v4725_v50  ;;  %v7492_v44 = vld [vmem:[#allocation200_spill] sm:$0xff] }
 0x12d   :  { %7489 = vst [vmem:[#allocation126_spill] sm:$0xff] %v4721_v14  ;;  %7490 = vst [vmem:[#allocation199_spill] sm:$0xff] %v4723_v31  ;;  %v7493_v22 = vsub.f32 %v4371_v18, %v7492_v44  ;;  %v4734_v3 = vld [vmem:[#allocation3 + $0x7c0] sm:$0xff]  ;;  %v4740_v37 = vld [vmem:[#allocation6 + $0x7a8] sm:$0xff]  ;;  %v7498_v18 = vsub.f32 %v4397_v58, %v4429_v12  ;;  %v2163_v44 = vadd.f32 %v2162_v55, %v1798_v38 }
 0x12e   :  { %v1802_v54 = vand.u32 2147483647, %v7488_v36  ;;  %v4736_v36 = vld [vmem:[#allocation3 + $0x7c8] sm:$0xff]  ;;  %v4738_v16 = vld [vmem:[#allocation6 + $0x7a0] sm:$0xff]  ;;  %v7494_v8 = vld [vmem:[#allocation111_spill] sm:$0xff]  ;;  %v2290_v12 = vadd.f32 %v2289_v41, %v1799_v51 }
 0x12f   :  { %v1803_v19 = vand.u32 2147483647, %v7493_v22  ;;  %v7495_v13 = vld [vmem:[#allocation35_spill] sm:$0xff]  ;;  %v1806_v1 = vand.u32 2147483647, %v7498_v18  ;;  %v4752_v6 = vld [vmem:[#allocation3 + $0x7d0] sm:$0xff]  ;;  %v7511_v18 = vsub.f32 %v4458_v48, %v4491_v30 }
 0x130   :  { %v7496_v56 = vsub.f32 %v7494_v8, %v7495_v13  ;;  %7499 = vst [vmem:[#allocation111_spill] sm:$0xff] %v4752_v6  ;;  %v4754_v22 = vld [vmem:[#allocation3 + $0x7d8] sm:$0xff]  ;;  %v4756_v11 = vld [vmem:[#allocation6 + $0x7b0] sm:$0xff]  ;;  %v4767_v13 = vld [vmem:[#allocation3 + $0x7e0] sm:$0xff]  ;;  %v7507_v8 = vsub.f32 %v4425_v49, %v4460_v33 }
 0x131   :  { %7500 = vst [vmem:[#allocation35_spill] sm:$0xff] %v4754_v22  ;;  %7501 = vst [vmem:[#allocation224_spill] sm:$0xff] %v4756_v11  ;;  %v4758_v28 = vld [vmem:[#allocation6 + $0x7b8] sm:$0xff]  ;;  %v4769_v38 = vld [vmem:[#allocation6 + $0x7c0] sm:$0xff]  ;;  %v1814_v57 = vand.u32 2147483647, %v7511_v18 }
 0x132   :  { %v4747_v15 = vand.u32 2147483647, %v7496_v56  ;;  %7502 = vst [vmem:[#allocation225_spill] sm:$0xff] %v4758_v28  ;;  %v7503_v56 = vsub.f32 %v4399_v4, %v4431_v27  ;;  %v4771_v55 = vld [vmem:[#allocation6 + $0x7c8] sm:$0xff]  ;;  %v7505_v47 = vld [vmem:[#allocation19_spill] sm:$0xff]  ;;  %v2164_v27 = vadd.f32 %v2163_v44, %v1802_v54  ;;  %v4785_v41 = vld [vmem:[#allocation6 + $0x7d0] sm:$0xff]  ;;  %v7515_v44 = vsub.f32 %v4500_v0, %v4532_v32 }
 0x133   :  { %v1810_v4 = vand.u32 2147483647, %v7507_v8  ;;  %v4783_v51 = vld [vmem:[#allocation3 + $0x7e8] sm:$0xff]  ;;  %v4796_v49 = vld [vmem:[#allocation3 + $0x7f0] sm:$0xff]  ;;  %v4798_v33 = vld [vmem:[#allocation3 + $0x7f8] sm:$0xff]  ;;  %v7513_v8 = vsub.f32 %v4474_v34, %v4504_v2  ;;  %v7519_v0 = vsub.f32 %v4502_v25, %v4534_v63 }
 0x134   :  { %7497 = vst [vmem:[#allocation200_spill] sm:$0xff] %v4747_v15  ;;  %v1807_v58 = vand.u32 2147483647, %v7503_v56  ;;  %v7504_v15 = vld [vmem:[#allocation13_spill] sm:$0xff]  ;;  %v4787_v56 = vld [vmem:[#allocation6 + $0x7d8] sm:$0xff]  ;;  %v4800_v54 = vld [vmem:[#allocation6 + $0x7e0] sm:$0xff]  ;;  %v2165_v50 = vadd.f32 %v2164_v27, %v1806_v1 }
 0x135   :  { %v7506_v61 = vsub.f32 %v7504_v15, %v7505_v47  ;;  %7508 = vst [vmem:[#allocation13_spill] sm:$0xff] %v4785_v41  ;;  %7509 = vst [vmem:[#allocation19_spill] sm:$0xff] %v4787_v56  ;;  %v7510_v47 = vsub.f32 %v4427_v20, %v4462_v26  ;;  %v4809_v20 = vld [vmem:[#allocation3 + $0x800] sm:$0xff]  ;;  %v4811_v26 = vld [vmem:[#allocation3 + $0x808] sm:$0xff]  ;;  %v1815_v48 = vand.u32 2147483647, %v7513_v8  ;;  %v7526_v8 = vsub.f32 %v4530_v40, %v4565_v59 }
 0x136   :  { %v4824_v1 = vld [vmem:[#allocation3 + $0x810] sm:$0xff]  ;;  %v4826_v18 = vld [vmem:[#allocation3 + $0x818] sm:$0xff]  ;;  %v1818_v31 = vand.u32 2147483647, %v7515_v44  ;;  %v2166_v11 = vadd.f32 %v2165_v50, %v1810_v4  ;;  %v4837_v34 = vld [vmem:[#allocation3 + $0x820] sm:$0xff] }
 0x137   :  { %v4778_v10 = vand.u32 2147483647, %v7506_v61  ;;  %v1811_v15 = vand.u32 2147483647, %v7510_v47  ;;  %v2291_v61 = vadd.f32 %v2290_v12, %v1803_v19  ;;  %v4813_v19 = vld [vmem:[#allocation6 + $0x7e8] sm:$0xff]  ;;  %v4815_v12 = vld [vmem:[#allocation6 + $0x7f0] sm:$0xff] }
 0x138   :  { %7512 = vst [vmem:[#allocation226_spill] sm:$0xff] %v4815_v12  ;;  %v4828_v27 = vld [vmem:[#allocation6 + $0x7f8] sm:$0xff]  ;;  %v4839_v2 = vld [vmem:[#allocation3 + $0x828] sm:$0xff]  ;;  %v7517_v41 = vld [vmem:[#allocation116_spill] sm:$0xff]  ;;  %v1819_v32 = vand.u32 2147483647, %v7519_v0 }
 0x139   :  { %v2292_v30 = vadd.f32 %v2291_v61, %v1807_v58  ;;  %7514 = vst [vmem:[#allocation227_spill] sm:$0xff] %v4828_v27  ;;  %v4841_v58 = vld [vmem:[#allocation6 + $0x800] sm:$0xff]  ;;  %v4843_v61 = vld [vmem:[#allocation6 + $0x808] sm:$0xff]  ;;  %v7516_v28 = vld [vmem:[#allocation15_spill] sm:$0xff]  ;;  %v1823_v22 = vand.u32 2147483647, %v7526_v8 }
 0x13a   :  { %v7518_v6 = vsub.f32 %v7516_v28, %v7517_v41  ;;  %v4855_v4 = vld [vmem:[#allocation3 + $0x830] sm:$0xff]  ;;  %v4859_v56 = vld [vmem:[#allocation6 + $0x818] sm:$0xff]  ;;  %v7522_v28 = vsub.f32 %v4528_v7, %v4563_v60  ;;  %v2167_v41 = vadd.f32 %v2166_v11, %v1814_v57  ;;  %v4868_v25 = vld [vmem:[#allocation6 + $0x820] sm:$0xff] }
 0x13b   :  { %v2293_v50 = vadd.f32 %v2292_v30, %v1811_v15  ;;  %7520 = vst [vmem:[#allocation15_spill] sm:$0xff] %v4855_v4  ;;  %v4857_v44 = vld [vmem:[#allocation6 + $0x810] sm:$0xff]  ;;  %7521 = vst [vmem:[#allocation116_spill] sm:$0xff] %v4859_v56  ;;  %v4870_v63 = vld [vmem:[#allocation6 + $0x828] sm:$0xff] }
 0x13c   :  { %v4850_v47 = vand.u32 2147483647, %v7518_v6  ;;  %v1822_v6 = vand.u32 2147483647, %v7522_v28  ;;  %v7523_v30 = vld [vmem:[#allocation14_spill] sm:$0xff]  ;;  %v7524_v0 = vld [vmem:[#allocation117_spill] sm:$0xff] }
 0x13d   :  { %v7525_v14 = vsub.f32 %v7523_v30, %v7524_v0  ;;  %v2294_v12 = vadd.f32 %v2293_v50, %v1815_v48  ;;  %v4882_v7 = vld [vmem:[#allocation3 + $0x838] sm:$0xff]  ;;  %v4884_v60 = vld [vmem:[#allocation6 + $0x830] sm:$0xff]  ;;  %v2168_v0 = vadd.f32 %v2167_v41, %v1818_v31  ;;  %v4895_v40 = vld [vmem:[#allocation3 + $0x840] sm:$0xff]  ;;  %v7533_v31 = vsub.f32 %v4603_v5, %v4635_v45 }
 0x13e   :  { %7527 = vst [vmem:[#allocation14_spill] sm:$0xff] %v4882_v7  ;;  %7528 = vst [vmem:[#allocation117_spill] sm:$0xff] %v4884_v60  ;;  %v4886_v11 = vld [vmem:[#allocation6 + $0x838] sm:$0xff]  ;;  %v4897_v59 = vld [vmem:[#allocation6 + $0x840] sm:$0xff] }
 0x13f   :  { %v4877_v42 = vand.u32 2147483647, %v7525_v14  ;;  %7529 = vst [vmem:[#allocation228_spill] sm:$0xff] %v4886_v11  ;;  %v7530_v14 = vsub.f32 %v4561_v24, %v4594_v9  ;;  %v7531_v50 = vld [vmem:[#allocation214_spill] sm:$0xff]  ;;  %v2295_v28 = vadd.f32 %v2294_v12, %v1819_v32  ;;  %v4906_v27 = vld [vmem:[#allocation3 + $0x848] sm:$0xff]  ;;  %v7537_v45 = vld [vmem:[#allocation115_spill] sm:$0xff]  ;;  %v7540_v24 = vsub.f32 %v4631_v39, %v4666_v62 }
 0x140   :  { %v7532_v15 = vsub.f32 %v4577_v29, %v7531_v50  ;;  %v1830_v41 = vand.u32 2147483647, %v7533_v31  ;;  %v4915_v48 = vld [vmem:[#allocation3 + $0x850] sm:$0xff]  ;;  %v4917_v8 = vld [vmem:[#allocation6 + $0x848] sm:$0xff]  ;;  %v4938_v4 = vld [vmem:[#allocation3 + $0x858] sm:$0xff] }
 0x141   :  { %v1826_v30 = vand.u32 2147483647, %v7530_v14  ;;  %v2169_v14 = vadd.f32 %v2168_v0, %v1822_v6  ;;  %7534 = vst [vmem:[#allocation214_spill] sm:$0xff] %v4915_v48  ;;  %v4919_v29 = vld [vmem:[#allocation6 + $0x850] sm:$0xff]  ;;  %v2296_v9 = vadd.f32 %v2295_v28, %v1823_v22  ;;  %v7538_v6 = vld [vmem:[#allocation120_spill] sm:$0xff]  ;;  %v4940_v32 = vld [vmem:[#allocation6 + $0x858] sm:$0xff]  ;;  %v7556_v48 = vsub.f32 %v4706_v46, %v4738_v16 }
 0x142   :  { %v1827_v57 = vand.u32 2147483647, %v7532_v15  ;;  %7535 = vst [vmem:[#allocation229_spill] sm:$0xff] %v4919_v29  ;;  %v7536_v15 = vsub.f32 %v4605_v23, %v4637_v43  ;;  %v7539_v0 = vsub.f32 %v7537_v45, %v7538_v6  ;;  %v1834_v12 = vand.u32 2147483647, %v7540_v24  ;;  %v7541_v23 = vld [vmem:[#allocation219_spill] sm:$0xff] }
 0x143   :  { %v2170_v60 = vadd.f32 %v2169_v14, %v1826_v30  ;;  %v7542_v43 = vsub.f32 %v4633_v53, %v7541_v23  ;;  %v7544_v5 = vld [vmem:[#allocation47_spill] sm:$0xff]  ;;  %v7545_v45 = vld [vmem:[#allocation29_spill] sm:$0xff]  ;;  %v7546_v6 = vld [vmem:[#allocation52_spill] sm:$0xff] }
 0x144   :  { %v1831_v50 = vand.u32 2147483647, %v7536_v15  ;;  %v4933_v31 = vand.u32 2147483647, %v7539_v0  ;;  %v2297_v28 = vadd.f32 %v2296_v9, %v1827_v57  ;;  %v7543_v15 = vld [vmem:[#allocation24_spill] sm:$0xff]  ;;  %v2495_v0 = vadd.f32 %v7546_v6, %v7545_v45  ;;  %v7547_v30 = vld [vmem:[#allocation222_spill] sm:$0xff] }
 0x145   :  { %v1835_v22 = vand.u32 2147483647, %v7542_v43  ;;  %v2368_v11 = vadd.f32 %v7544_v5, %v7543_v15  ;;  %v4949_v7 = vld [vmem:[#allocation3 + $0x860] sm:$0xff]  ;;  %v7548_v24 = vsub.f32 %v4664_v17, %v7547_v30  ;;  %v2171_v14 = vadd.f32 %v2170_v60, %v1830_v41  ;;  %v4958_v57 = vld [vmem:[#allocation3 + $0x868] sm:$0xff]  ;;  %v7549_v23 = vld [vmem:[#allocation194_spill] sm:$0xff] }
 0x146   :  { %v4960_v9 = vld [vmem:[#allocation6 + $0x860] sm:$0xff]  ;;  %v4962_v5 = vld [vmem:[#allocation6 + $0x868] sm:$0xff]  ;;  %v7550_v43 = vsub.f32 %v4680_v35, %v7549_v23  ;;  %v2298_v45 = vadd.f32 %v2297_v28, %v1831_v50  ;;  %v7551_v6 = vld [vmem:[#allocation67_spill] sm:$0xff]  ;;  %v1842_v35 = vand.u32 2147483647, %v7556_v48  ;;  %v7557_v28 = vsub.f32 %v4708_v52, %v4740_v37 }
 0x147   :  { %v1838_v53 = vand.u32 2147483647, %v7548_v24  ;;  %v2369_v39 = vadd.f32 %v2368_v11, %v7551_v6  ;;  %v7552_v56 = vld [vmem:[#allocation71_spill] sm:$0xff]  ;;  %v4969_v29 = vld [vmem:[#allocation3 + $0x870] sm:$0xff]  ;;  %v7554_v41 = vld [vmem:[#allocation121_spill] sm:$0xff]  ;;  %v2172_v23 = vadd.f32 %v2171_v14, %v1834_v12  ;;  %v1354_v46 = vsub.f32 %v4949_v7, %v4960_v9 }
 0x148   :  { %v1839_v15 = vand.u32 2147483647, %v7550_v43  ;;  %v2496_v62 = vadd.f32 %v2495_v0, %v7552_v56  ;;  %v7553_v60 = vld [vmem:[#allocation27_spill] sm:$0xff]  ;;  %v4983_v11 = vld [vmem:[#allocation6 + $0x870] sm:$0xff]  ;;  %v1843_v0 = vand.u32 2147483647, %v7557_v28  ;;  %v2299_v43 = vadd.f32 %v2298_v45, %v1835_v22 }
 0x149   :  { %v7555_v30 = vsub.f32 %v7553_v60, %v7554_v41  ;;  %v4981_v50 = vld [vmem:[#allocation3 + $0x878] sm:$0xff]  ;;  %v7559_v41 = vld [vmem:[#allocation93_spill] sm:$0xff]  ;;  %v4992_v17 = vld [vmem:[#allocation3 + $0x880] sm:$0xff]  ;;  %v7560_v48 = vsub.f32 %v4734_v3, %v4769_v38  ;;  %v2173_v14 = vadd.f32 %v2172_v23, %v1838_v53  ;;  %v7564_v53 = vsub.f32 %v4767_v13, %v4800_v54 }
 0x14a   :  { %v4985_v56 = vld [vmem:[#allocation6 + $0x878] sm:$0xff]  ;;  %v5001_v52 = vld [vmem:[#allocation3 + $0x888] sm:$0xff]  ;;  %v5003_v37 = vld [vmem:[#allocation6 + $0x880] sm:$0xff]  ;;  %v2300_v45 = vadd.f32 %v2299_v43, %v1839_v15  ;;  %v7565_v43 = vsub.f32 %v4783_v51, %v4813_v19  ;;  %v7569_v51 = vsub.f32 %v4811_v26, %v4843_v61 }
 0x14b   :  { %v4976_v24 = vand.u32 2147483647, %v7555_v30  ;;  %v7558_v6 = vld [vmem:[#allocation87_spill] sm:$0xff]  ;;  %v2497_v30 = vadd.f32 %v2496_v62, %v7559_v41  ;;  %v1846_v12 = vand.u32 2147483647, %v7560_v48  ;;  %v5005_v22 = vld [vmem:[#allocation6 + $0x888] sm:$0xff]  ;;  %v2174_v48 = vadd.f32 %v2173_v14, %v1842_v35 }
 0x14c   :  { %v2370_v60 = vadd.f32 %v2369_v39, %v7558_v6  ;;  %v7561_v39 = vsub.f32 %v4736_v36, %v4771_v55  ;;  %v7562_v7 = vld [vmem:[#allocation12_spill] sm:$0xff]  ;;  %v7563_v28 = vld [vmem:[#allocation21_spill] sm:$0xff]  ;;  %v5012_v41 = vld [vmem:[#allocation3 + $0x890] sm:$0xff]  ;;  %v1850_v23 = vand.u32 2147483647, %v7564_v53  ;;  %v1358_v13 = vsub.f32 %v4992_v17, %v5003_v37 }
 0x14d   :  { %v2498_v6 = vadd.f32 %v2497_v30, %v7563_v28  ;;  %v5021_v36 = vld [vmem:[#allocation3 + $0x898] sm:$0xff]  ;;  %v5023_v55 = vld [vmem:[#allocation6 + $0x890] sm:$0xff]  ;;  %v2301_v30 = vadd.f32 %v2300_v45, %v1843_v0  ;;  %v7567_v28 = vld [vmem:[#allocation16_spill] sm:$0xff]  ;;  %v1359_v54 = vsub.f32 %v5001_v52, %v5005_v22  ;;  %v7568_v35 = vsub.f32 %v4809_v20, %v4841_v58 }
 0x14e   :  { %v1847_v62 = vand.u32 2147483647, %v7561_v39  ;;  %v2371_v9 = vadd.f32 %v2370_v60, %v7562_v7  ;;  %v5025_v15 = vld [vmem:[#allocation6 + $0x898] sm:$0xff]  ;;  %v1851_v60 = vand.u32 2147483647, %v7565_v43  ;;  %v7566_v39 = vld [vmem:[#allocation41_spill] sm:$0xff]  ;;  %v2175_v53 = vadd.f32 %v2174_v48, %v1846_v12 }
 0x14f   :  { %v2499_v38 = vadd.f32 %v2498_v6, %v7567_v28  ;;  %v1854_v14 = vand.u32 2147483647, %v7568_v35  ;;  %v338_v3 = vld [vmem:[#allocation3 + $0x8a0] sm:$0xff]  ;;  %v1855_v19 = vand.u32 2147483647, %v7569_v51  ;;  %v7570_v45 = vld [vmem:[#allocation33_spill] sm:$0xff]  ;;  %v7572_v58 = vsub.f32 %v4837_v34, %v4868_v25 }
 0x150   :  { %v2372_v7 = vadd.f32 %v2371_v9, %v7566_v39  ;;  %v850_v16 = vld [vmem:[#allocation6 + $0x8a0] sm:$0xff]  ;;  %v2302_v0 = vadd.f32 %v2301_v30, %v1847_v62  ;;  %v339_v17 = vld [vmem:[#allocation3 + $0x8a8] sm:$0xff]  ;;  %v2176_v37 = vadd.f32 %v2175_v53, %v1850_v23  ;;  %v5051_v22 = vld [vmem:[#allocation3 + $0x8b0] sm:$0xff]  ;;  %v7575_v62 = vsub.f32 %v4839_v2, %v4870_v63 }
 0x151   :  { %v7571_v6 = vld [vmem:[#allocation20_spill] sm:$0xff]  ;;  %v1858_v12 = vand.u32 2147483647, %v7572_v58  ;;  %7573 = vst [vmem:[#allocation115_spill] sm:$0xff] %v5051_v22  ;;  %v851_v26 = vld [vmem:[#allocation6 + $0x8a8] sm:$0xff]  ;;  %v5053_v61 = vld [vmem:[#allocation6 + $0x8b0] sm:$0xff]  ;;  %v1362_v51 = vsub.f32 %v338_v3, %v850_v16  ;;  %v7581_v53 = vsub.f32 %v4895_v40, %v4897_v59 }
 0x152   :  { %v2373_v9 = vadd.f32 %v2372_v7, %v7570_v45  ;;  %v2500_v43 = vadd.f32 %v2499_v38, %v7571_v6  ;;  %7574 = vst [vmem:[#allocation120_spill] sm:$0xff] %v5053_v61  ;;  %v1859_v38 = vand.u32 2147483647, %v7575_v62  ;;  %v2303_v48 = vadd.f32 %v2302_v0, %v1851_v60  ;;  %v7576_v30 = vld [vmem:[#allocation26_spill] sm:$0xff]  ;;  %v342_v35 = vld [vmem:[#allocation3 + $0x8c0] sm:$0xff]  ;;  %v7578_v45 = vld [vmem:[#allocation17_spill] sm:$0xff] }
 0x153   :  { %v7577_v7 = vld [vmem:[#allocation30_spill] sm:$0xff]  ;;  %v7579_v34 = vld [vmem:[#allocation124_spill] sm:$0xff]  ;;  %v1862_v6 = vand.u32 2147483647, %v7581_v53  ;;  %v2177_v58 = vadd.f32 %v2176_v37, %v1854_v14  ;;  %v343_v20 = vld [vmem:[#allocation3 + $0x8c8] sm:$0xff]  ;;  %v7582_v60 = vsub.f32 %v4906_v27, %v4917_v8 }
 0x154   :  { %v2374_v39 = vadd.f32 %v2373_v9, %v7576_v30  ;;  %v2501_v28 = vadd.f32 %v2500_v43, %v7577_v7  ;;  %v7580_v25 = vsub.f32 %v7578_v45, %v7579_v34  ;;  %v854_v2 = vld [vmem:[#allocation6 + $0x8c0] sm:$0xff]  ;;  %v855_v63 = vld [vmem:[#allocation6 + $0x8c8] sm:$0xff]  ;;  %v2304_v9 = vadd.f32 %v2303_v48, %v1855_v19 }
 0x155   :  { %v1863_v0 = vand.u32 2147483647, %v7582_v60  ;;  %v7583_v43 = vld [vmem:[#allocation36_spill] sm:$0xff]  ;;  %v7584_v3 = vld [vmem:[#allocation37_spill] sm:$0xff]  ;;  %v1363_v7 = vsub.f32 %v339_v17, %v851_v26  ;;  %v1866_v40 = vand.u32 2147483647, %v1354_v46  ;;  %v2178_v59 = vadd.f32 %v2177_v58, %v1858_v12 }
 0x156   :  { %v5063_v23 = vand.u32 2147483647, %v7580_v25  ;;  %v2375_v16 = vadd.f32 %v2374_v39, %v7583_v43  ;;  %v2502_v62 = vadd.f32 %v2501_v28, %v7584_v3  ;;  %v346_v30 = vld [vmem:[#allocation3 + $0x8e0] sm:$0xff]  ;;  %v347_v14 = vld [vmem:[#allocation3 + $0x8e8] sm:$0xff]  ;;  %v7585_v25 = vsub.f32 %v4958_v57, %v4962_v5  ;;  %v7587_v39 = vld [vmem:[#allocation106_spill] sm:$0xff] }
 0x157   :  { %v858_v37 = vld [vmem:[#allocation6 + $0x8e0] sm:$0xff]  ;;  %v859_v34 = vld [vmem:[#allocation6 + $0x8e8] sm:$0xff]  ;;  %v2305_v8 = vadd.f32 %v2304_v9, %v1859_v38  ;;  %v1366_v60 = vsub.f32 %v342_v35, %v854_v2  ;;  %v1367_v17 = vsub.f32 %v343_v20, %v855_v63  ;;  %v1870_v26 = vand.u32 2147483647, %v1358_v13  ;;  %v7591_v63 = vld [vmem:[#allocation59_spill] sm:$0xff] }
 0x158   :  { %v1867_v27 = vand.u32 2147483647, %v7585_v25  ;;  %v7586_v19 = vld [vmem:[#allocation89_spill] sm:$0xff]  ;;  %v2503_v53 = vadd.f32 %v2502_v62, %v7587_v39  ;;  %v350_v28 = vld [vmem:[#allocation3 + $0x900] sm:$0xff]  ;;  %v2179_v43 = vadd.f32 %v2178_v59, %v1862_v6  ;;  %v1871_v58 = vand.u32 2147483647, %v1359_v54 }
 0x159   :  { %v2376_v48 = vadd.f32 %v2375_v16, %v7586_v19  ;;  %v351_v3 = vld [vmem:[#allocation3 + $0x908] sm:$0xff]  ;;  %v862_v46 = vld [vmem:[#allocation6 + $0x900] sm:$0xff]  ;;  %v2306_v45 = vadd.f32 %v2305_v8, %v1863_v0  ;;  %v1370_v38 = vsub.f32 %v346_v30, %v858_v37  ;;  %v1371_v9 = vsub.f32 %v347_v14, %v859_v34  ;;  %v7590_v6 = vld [vmem:[#allocation58_spill] sm:$0xff] }
 0x15a   :  { %v863_v12 = vld [vmem:[#allocation6 + $0x908] sm:$0xff]  ;;  %v354_v5 = vld [vmem:[#allocation3 + $0x920] sm:$0xff]  ;;  %v1874_v16 = vand.u32 2147483647, %v1362_v51  ;;  %v2180_v25 = vadd.f32 %v2179_v43, %v1866_v40  ;;  %v1875_v20 = vand.u32 2147483647, %v1363_v7  ;;  %v1374_v0 = vsub.f32 %v350_v28, %v862_v46 }
 0x15b   :  { %v7588_v52 = vld [vmem:[#allocation49_spill] sm:$0xff]  ;;  %v866_v19 = vld [vmem:[#allocation6 + $0x920] sm:$0xff]  ;;  %v2307_v13 = vadd.f32 %v2306_v45, %v1867_v27  ;;  %v1375_v8 = vsub.f32 %v351_v3, %v863_v12  ;;  %v1879_v14 = vand.u32 2147483647, %v1367_v17  ;;  %v7592_v40 = vld [vmem:[#allocation62_spill] sm:$0xff] }
 0x15c   :  { %v2377_v61 = vadd.f32 %v2376_v48, %v7588_v52  ;;  %v7589_v22 = vld [vmem:[#allocation53_spill] sm:$0xff]  ;;  %v358_v54 = vld [vmem:[#allocation3 + $0x940] sm:$0xff]  ;;  %v1878_v52 = vand.u32 2147483647, %v1366_v60  ;;  %v2181_v48 = vadd.f32 %v2180_v25, %v1870_v26  ;;  %v7593_v34 = vld [vmem:[#allocation63_spill] sm:$0xff]  ;;  %v1378_v7 = vsub.f32 %v354_v5, %v866_v19 }
 0x15d   :  { %v2504_v57 = vadd.f32 %v2503_v53, %v7589_v22  ;;  %v355_v62 = vld [vmem:[#allocation3 + $0x928] sm:$0xff]  ;;  %v870_v39 = vld [vmem:[#allocation6 + $0x940] sm:$0xff]  ;;  %v2308_v51 = vadd.f32 %v2307_v13, %v1871_v58  ;;  %v1882_v27 = vand.u32 2147483647, %v1370_v38  ;;  %v5086_v43 = vld [vmem:[#allocation3 + $0x8b8] sm:$0xff] }
 0x15e   :  { %v867_v35 = vld [vmem:[#allocation6 + $0x928] sm:$0xff]  ;;  %v2378_v2 = vadd.f32 %v2377_v61, %v7590_v6  ;;  %v2182_v61 = vadd.f32 %v2181_v48, %v1874_v16  ;;  %v1883_v28 = vand.u32 2147483647, %v1371_v9  ;;  %v7596_v46 = vld [vmem:[#allocation72_spill] sm:$0xff]  ;;  %v1382_v58 = vsub.f32 %v358_v54, %v870_v39  ;;  %v7599_v9 = vld [vmem:[#allocation79_spill] sm:$0xff] }
 0x15f   :  { %v2505_v59 = vadd.f32 %v2504_v57, %v7591_v63  ;;  %v359_v22 = vld [vmem:[#allocation3 + $0x948] sm:$0xff]  ;;  %v1379_v45 = vsub.f32 %v355_v62, %v867_v35  ;;  %v5088_v57 = vld [vmem:[#allocation6 + $0x8b8] sm:$0xff]  ;;  %v2309_v60 = vadd.f32 %v2308_v51, %v1875_v20  ;;  %v362_v17 = vld [vmem:[#allocation3 + $0x960] sm:$0xff]  ;;  %v1886_v13 = vand.u32 2147483647, %v1374_v0 }
 0x160   :  { %v871_v30 = vld [vmem:[#allocation6 + $0x948] sm:$0xff]  ;;  %v2379_v37 = vadd.f32 %v2378_v2, %v7592_v40  ;;  %7594 = vst [vmem:[#allocation219_spill] sm:$0xff] %v5088_v57  ;;  %v2183_v6 = vadd.f32 %v2182_v61, %v1878_v52  ;;  %v5092_v2 = vld [vmem:[#allocation3 + $0x8d0] sm:$0xff]  ;;  %v874_v38 = vld [vmem:[#allocation6 + $0x960] sm:$0xff]  ;;  %v1887_v62 = vand.u32 2147483647, %v1375_v8 }
 0x161   :  { %v2506_v53 = vadd.f32 %v2505_v59, %v7593_v34  ;;  %v7595_v26 = vld [vmem:[#allocation97_spill] sm:$0xff]  ;;  %v1383_v25 = vsub.f32 %v359_v22, %v871_v30  ;;  %7597 = vst [vmem:[#allocation24_spill] sm:$0xff] %v5092_v2  ;;  %v2310_v19 = vadd.f32 %v2309_v60, %v1879_v14  ;;  %v7598_v35 = vld [vmem:[#allocation78_spill] sm:$0xff]  ;;  %v5096_v59 = vld [vmem:[#allocation3 + $0x8d8] sm:$0xff]  ;;  %v1890_v30 = vand.u32 2147483647, %v1378_v7 }
 0x162   :  { %v2380_v3 = vadd.f32 %v2379_v37, %v7595_v26  ;;  %v363_v5 = vld [vmem:[#allocation3 + $0x968] sm:$0xff]  ;;  %7600 = vst [vmem:[#allocation47_spill] sm:$0xff] %v5096_v59  ;;  %v5098_v48 = vld [vmem:[#allocation3 + $0x8f0] sm:$0xff]  ;;  %v7602_v0 = vld [vmem:[#allocation28_spill] sm:$0xff]  ;;  %v2184_v51 = vadd.f32 %v2183_v6, %v1882_v27  ;;  %v1891_v37 = vand.u32 2147483647, %v1379_v45 }
 0x163   :  { %v2507_v12 = vadd.f32 %v2506_v53, %v7596_v46  ;;  %v875_v16 = vld [vmem:[#allocation6 + $0x968] sm:$0xff]  ;;  %7601 = vst [vmem:[#allocation29_spill] sm:$0xff] %v5098_v48  ;;  %v5107_v8 = vld [vmem:[#allocation6 + $0x8d0] sm:$0xff]  ;;  %v5109_v14 = vld [vmem:[#allocation6 + $0x8d8] sm:$0xff]  ;;  %v2311_v34 = vadd.f32 %v2310_v19, %v1883_v28  ;;  %v1894_v27 = vand.u32 2147483647, %v1382_v58 }
 0x164   :  { %v2381_v63 = vadd.f32 %v2380_v3, %v7598_v35  ;;  %v7603_v52 = vld [vmem:[#allocation125_spill] sm:$0xff]  ;;  %7605 = vst [vmem:[#allocation52_spill] sm:$0xff] %v5107_v8  ;;  %7606 = vst [vmem:[#allocation222_spill] sm:$0xff] %v5109_v14  ;;  %v5111_v40 = vld [vmem:[#allocation6 + $0x8f0] sm:$0xff]  ;;  %v1386_v35 = vsub.f32 %v362_v17, %v874_v38  ;;  %v1387_v7 = vsub.f32 %v363_v5, %v875_v16  ;;  %v1895_v45 = vand.u32 2147483647, %v1383_v25 }
 0x165   :  { %v2508_v20 = vadd.f32 %v2507_v12, %v7599_v9  ;;  %v7604_v22 = vsub.f32 %v7602_v0, %v7603_v52  ;;  %7607 = vst [vmem:[#allocation194_spill] sm:$0xff] %v5111_v40  ;;  %v7608_v53 = vld [vmem:[#allocation82_spill] sm:$0xff]  ;;  %v7609_v60 = vld [vmem:[#allocation83_spill] sm:$0xff]  ;;  %v366_v46 = vld [vmem:[#allocation3 + $0x980] sm:$0xff]  ;;  %v2185_v6 = vadd.f32 %v2184_v51, %v1886_v13  ;;  %v2312_v28 = vadd.f32 %v2311_v34, %v1887_v62 }
 0x166   :  { %v2382_v61 = vadd.f32 %v2381_v63, %v7608_v53  ;;  %v5115_v3 = vld [vmem:[#allocation3 + $0x8f8] sm:$0xff]  ;;  %v5119_v9 = vld [vmem:[#allocation3 + $0x910] sm:$0xff]  ;;  %v367_v0 = vld [vmem:[#allocation3 + $0x988] sm:$0xff]  ;;  %v1899_v17 = vand.u32 2147483647, %v1387_v7 }
 0x167   :  { %v5105_v39 = vand.u32 2147483647, %v7604_v22  ;;  %v2509_v26 = vadd.f32 %v2508_v20, %v7609_v60  ;;  %7610 = vst [vmem:[#allocation67_spill] sm:$0xff] %v5115_v3  ;;  %v5117_v12 = vld [vmem:[#allocation6 + $0x8f8] sm:$0xff]  ;;  %7612 = vst [vmem:[#allocation27_spill] sm:$0xff] %v5119_v9  ;;  %v878_v52 = vld [vmem:[#allocation6 + $0x980] sm:$0xff]  ;;  %v2186_v13 = vadd.f32 %v2185_v6, %v1890_v30  ;;  %v2313_v51 = vadd.f32 %v2312_v28, %v1891_v37 }
 0x168   :  { %7611 = vst [vmem:[#allocation71_spill] sm:$0xff] %v5117_v12  ;;  %v879_v22 = vld [vmem:[#allocation6 + $0x988] sm:$0xff]  ;;  %v7613_v19 = vld [vmem:[#allocation90_spill] sm:$0xff]  ;;  %v7614_v53 = vld [vmem:[#allocation175_spill] sm:$0xff]  ;;  %v1390_v25 = vsub.f32 %v366_v46, %v878_v52  ;;  %v1898_v6 = vand.u32 2147483647, %v1386_v35 }
 0x169   :  { %v2383_v63 = vadd.f32 %v2382_v61, %v7613_v19  ;;  %v2510_v20 = vadd.f32 %v2509_v26, %v7614_v53  ;;  %v5123_v60 = vld [vmem:[#allocation3 + $0x918] sm:$0xff]  ;;  %v5125_v54 = vld [vmem:[#allocation3 + $0x930] sm:$0xff]  ;;  %v5135_v5 = vld [vmem:[#allocation3 + $0x9a0] sm:$0xff]  ;;  %v1391_v30 = vsub.f32 %v367_v0, %v879_v22  ;;  %v2187_v37 = vadd.f32 %v2186_v13, %v1894_v27 }
 0x16a   :  { %7615 = vst [vmem:[#allocation121_spill] sm:$0xff] %v5123_v60  ;;  %v5127_v57 = vld [vmem:[#allocation3 + $0x938] sm:$0xff]  ;;  %v5137_v38 = vld [vmem:[#allocation6 + $0x910] sm:$0xff]  ;;  %v7618_v34 = vld [vmem:[#allocation100_spill] sm:$0xff]  ;;  %v2314_v28 = vadd.f32 %v2313_v51, %v1895_v45 }
 0x16b   :  { %7616 = vst [vmem:[#allocation87_spill] sm:$0xff] %v5137_v38  ;;  %v5139_v16 = vld [vmem:[#allocation6 + $0x918] sm:$0xff]  ;;  %v2384_v61 = vadd.f32 %v2383_v63, %v7618_v34  ;;  %v7619_v26 = vld [vmem:[#allocation101_spill] sm:$0xff]  ;;  %v5145_v53 = vld [vmem:[#allocation6 + $0x930] sm:$0xff]  ;;  %v1903_v60 = vand.u32 2147483647, %v1391_v30  ;;  %v2188_v2 = vadd.f32 %v2187_v37, %v1898_v6 }
 0x16c   :  { %7617 = vst [vmem:[#allocation93_spill] sm:$0xff] %v5139_v16  ;;  %v2511_v19 = vadd.f32 %v2510_v20, %v7619_v26  ;;  %7620 = vst [vmem:[#allocation12_spill] sm:$0xff] %v5145_v53  ;;  %v5147_v58 = vld [vmem:[#allocation6 + $0x938] sm:$0xff]  ;;  %v5149_v40 = vld [vmem:[#allocation3 + $0x950] sm:$0xff] }
 0x16d   :  { %7621 = vst [vmem:[#allocation21_spill] sm:$0xff] %v5149_v40  ;;  %v5151_v48 = vld [vmem:[#allocation3 + $0x958] sm:$0xff]  ;;  %v371_v14 = vld [vmem:[#allocation3 + $0x9a8] sm:$0xff]  ;;  %v882_v59 = vld [vmem:[#allocation6 + $0x9a0] sm:$0xff] }
 0x16e   :  { %7622 = vst [vmem:[#allocation41_spill] sm:$0xff] %v5151_v48  ;;  %v883_v62 = vld [vmem:[#allocation6 + $0x9a8] sm:$0xff]  ;;  %v7623_v63 = vld [vmem:[#allocation188_spill] sm:$0xff]  ;;  %v5155_v12 = vld [vmem:[#allocation3 + $0x970] sm:$0xff] }
 0x16f   :  { %v2385_v34 = vadd.f32 %v2384_v61, %v7623_v63  ;;  %v7624_v20 = vld [vmem:[#allocation108_spill] sm:$0xff]  ;;  %7625 = vst [vmem:[#allocation16_spill] sm:$0xff] %v5155_v12  ;;  %v5157_v3 = vld [vmem:[#allocation3 + $0x978] sm:$0xff]  ;;  %v7627_v7 = vld [vmem:[#allocation122_spill] sm:$0xff] }
 0x170   :  { %v2512_v26 = vadd.f32 %v2511_v19, %v7624_v20  ;;  %7626 = vst [vmem:[#allocation33_spill] sm:$0xff] %v5157_v3  ;;  %v7628_v0 = vld [vmem:[#allocation34_spill] sm:$0xff]  ;;  %v7630_v27 = vld [vmem:[#allocation123_spill] sm:$0xff]  ;;  %v7631_v45 = vld [vmem:[#allocation25_spill] sm:$0xff]  ;;  %v2315_v20 = vadd.f32 %v2314_v28, %v1899_v17 }
 0x171   :  { %v7629_v52 = vsub.f32 %v7627_v7, %v7628_v0  ;;  %v7632_v13 = vsub.f32 %v7630_v27, %v7631_v45  ;;  %v5169_v61 = vld [vmem:[#allocation6 + $0x950] sm:$0xff]  ;;  %v5171_v19 = vld [vmem:[#allocation6 + $0x958] sm:$0xff]  ;;  %v7636_v46 = vld [vmem:[#allocation200_spill] sm:$0xff]  ;;  %v1394_v27 = vsub.f32 %v5135_v5, %v882_v59  ;;  %v1395_v45 = vsub.f32 %v371_v14, %v883_v62 }
 0x172   :  { %7633 = vst [vmem:[#allocation20_spill] sm:$0xff] %v5169_v61  ;;  %7634 = vst [vmem:[#allocation26_spill] sm:$0xff] %v5171_v19  ;;  %v5173_v63 = vld [vmem:[#allocation6 + $0x970] sm:$0xff]  ;;  %v2386_v16 = vadd.f32 %v2385_v34, %v7636_v46  ;;  %v2513_v7 = vadd.f32 %v2512_v26, %v4778_v10  ;;  %v374_v0 = vld [vmem:[#allocation3 + $0x9c0] sm:$0xff] }
 0x173   :  { %v1692_v22 = vand.u32 2147483647, %v7629_v52  ;;  %v1693_v51 = vand.u32 2147483647, %v7632_v13  ;;  %7635 = vst [vmem:[#allocation30_spill] sm:$0xff] %v5173_v63  ;;  %v5181_v52 = vld [vmem:[#allocation6 + $0x978] sm:$0xff] }
 0x174   :  { %7637 = vst [vmem:[#allocation17_spill] sm:$0xff] %v5181_v52  ;;  %v1902_v13 = vand.u32 2147483647, %v1390_v25  ;;  %v375_v38 = vld [vmem:[#allocation3 + $0x9c8] sm:$0xff]  ;;  %v886_v9 = vld [vmem:[#allocation6 + $0x9c0] sm:$0xff]  ;;  %v2387_v53 = vadd.f32 %v2386_v16, %v4850_v47  ;;  %v2514_v35 = vadd.f32 %v2513_v7, %v4877_v42  ;;  %v5186_v34 = vld [vmem:[#allocation3 + $0x990] sm:$0xff]  ;;  %v2316_v16 = vadd.f32 %v2315_v20, %v1903_v60 }
 0x175   :  { %v887_v8 = vld [vmem:[#allocation6 + $0x9c8] sm:$0xff]  ;;  %7638 = vst [vmem:[#allocation124_spill] sm:$0xff] %v5186_v34  ;;  %v7639_v25 = vld [vmem:[#allocation39_spill] sm:$0xff]  ;;  %v7640_v5 = vld [vmem:[#allocation46_spill] sm:$0xff]  ;;  %v1906_v59 = vand.u32 2147483647, %v1394_v27 }
 0x176   :  { %v7641_v62 = vsub.f32 %v7639_v25, %v7640_v5  ;;  %v5197_v17 = vld [vmem:[#allocation3 + $0x998] sm:$0xff]  ;;  %v5199_v47 = vld [vmem:[#allocation6 + $0x990] sm:$0xff]  ;;  %v7645_v6 = vld [vmem:[#allocation45_spill] sm:$0xff]  ;;  %v2388_v46 = vadd.f32 %v2387_v53, %v4933_v31  ;;  %v2515_v7 = vadd.f32 %v2514_v35, %v4976_v24  ;;  %v1398_v5 = vsub.f32 %v374_v0, %v886_v9 }
 0x177   :  { %7642 = vst [vmem:[#allocation36_spill] sm:$0xff] %v5197_v17  ;;  %7643 = vst [vmem:[#allocation37_spill] sm:$0xff] %v5199_v47  ;;  %v5201_v42 = vld [vmem:[#allocation6 + $0x998] sm:$0xff]  ;;  %v7646_v37 = vld [vmem:[#allocation130_spill] sm:$0xff]  ;;  %v1907_v10 = vand.u32 2147483647, %v1395_v45  ;;  %v2189_v48 = vadd.f32 %v2188_v2, %v1902_v13 }
 0x178   :  { %v1696_v30 = vand.u32 2147483647, %v7641_v62  ;;  %7644 = vst [vmem:[#allocation89_spill] sm:$0xff] %v5201_v42  ;;  %v7647_v28 = vsub.f32 %v7645_v6, %v7646_v37  ;;  %v378_v14 = vld [vmem:[#allocation3 + $0x9e0] sm:$0xff]  ;;  %v1399_v62 = vsub.f32 %v375_v38, %v887_v8  ;;  %v5210_v63 = vld [vmem:[#allocation3 + $0x9b0] sm:$0xff]  ;;  %v379_v12 = vld [vmem:[#allocation3 + $0x9e8] sm:$0xff]  ;;  %v2389_v52 = vadd.f32 %v2388_v46, %v5063_v23 }
 0x179   :  { %v890_v25 = vld [vmem:[#allocation6 + $0x9e0] sm:$0xff]  ;;  %7648 = vst [vmem:[#allocation106_spill] sm:$0xff] %v5210_v63  ;;  %v891_v19 = vld [vmem:[#allocation6 + $0x9e8] sm:$0xff]  ;;  %v2516_v6 = vadd.f32 %v2515_v7, %v5105_v39  ;;  %v5214_v37 = vld [vmem:[#allocation3 + $0x9b8] sm:$0xff]  ;;  %v1910_v47 = vand.u32 2147483647, %v1398_v5  ;;  %v2190_v3 = vadd.f32 %v2189_v48, %v1906_v59  ;;  %v2317_v61 = vadd.f32 %v2316_v16, %v1907_v10 }
 0x17a   :  { %v1697_v26 = vand.u32 2147483647, %v7647_v28  ;;  %7649 = vst [vmem:[#allocation49_spill] sm:$0xff] %v5214_v37  ;;  %v382_v31 = vld [vmem:[#allocation3 + $0xa00] sm:$0xff]  ;;  %v7653_v0 = vld [vmem:[#allocation129_spill] sm:$0xff]  ;;  %v5226_v23 = vld [vmem:[#allocation6 + $0x9b0] sm:$0xff]  ;;  %v1402_v45 = vsub.f32 %v378_v14, %v890_v25  ;;  %v2390_v24 = vadd.f32 %v2389_v52, %v1692_v22  ;;  %v1403_v42 = vsub.f32 %v379_v12, %v891_v19 }
 0x17b   :  { %v7650_v9 = vld [vmem:[#allocation128_spill] sm:$0xff]  ;;  %v7654_v2 = vld [vmem:[#allocation133_spill] sm:$0xff]  ;;  %7656 = vst [vmem:[#allocation53_spill] sm:$0xff] %v5226_v23  ;;  %v5228_v39 = vld [vmem:[#allocation6 + $0x9b8] sm:$0xff]  ;;  %v2517_v8 = vadd.f32 %v2516_v6, %v1693_v51  ;;  %v2191_v23 = vadd.f32 %v2190_v3, %v1910_v47 }
 0x17c   :  { %v7651_v38 = vld [vmem:[#allocation132_spill] sm:$0xff]  ;;  %v7655_v60 = vsub.f32 %v7653_v0, %v7654_v2  ;;  %7657 = vst [vmem:[#allocation58_spill] sm:$0xff] %v5228_v39  ;;  %v7659_v28 = vld [vmem:[#allocation65_spill] sm:$0xff]  ;;  %v7661_v17 = vld [vmem:[#allocation131_spill] sm:$0xff]  ;;  %v1911_v0 = vand.u32 2147483647, %v1399_v62  ;;  %v2391_v14 = vadd.f32 %v2390_v24, %v1696_v30 }
 0x17d   :  { %v7652_v53 = vsub.f32 %v7650_v9, %v7651_v38  ;;  %v894_v27 = vld [vmem:[#allocation6 + $0xa00] sm:$0xff]  ;;  %v7662_v9 = vld [vmem:[#allocation134_spill] sm:$0xff]  ;;  %v895_v34 = vld [vmem:[#allocation6 + $0xa08] sm:$0xff]  ;;  %v2518_v25 = vadd.f32 %v2517_v8, %v1697_v26 }
 0x17e   :  { %v1701_v20 = vand.u32 2147483647, %v7655_v60  ;;  %v7658_v13 = vld [vmem:[#allocation40_spill] sm:$0xff]  ;;  %v7663_v38 = vsub.f32 %v7661_v17, %v7662_v9  ;;  %v5236_v2 = vld [vmem:[#allocation3 + $0x9d0] sm:$0xff]  ;;  %v383_v60 = vld [vmem:[#allocation3 + $0xa08] sm:$0xff]  ;;  %v1406_v19 = vsub.f32 %v382_v31, %v894_v27 }
 0x17f   :  { %v1700_v35 = vand.u32 2147483647, %v7652_v53  ;;  %v7660_v46 = vsub.f32 %v7658_v13, %v7659_v28  ;;  %7664 = vst [vmem:[#allocation59_spill] sm:$0xff] %v5236_v2  ;;  %v5238_v40 = vld [vmem:[#allocation3 + $0x9d8] sm:$0xff]  ;;  %v386_v13 = vld [vmem:[#allocation3 + $0xa20] sm:$0xff]  ;;  %v5240_v22 = vld [vmem:[#allocation6 + $0x9d0] sm:$0xff] }
 0x180   :  { %v1705_v53 = vand.u32 2147483647, %v7663_v38  ;;  %7665 = vst [vmem:[#allocation62_spill] sm:$0xff] %v5238_v40  ;;  %7666 = vst [vmem:[#allocation63_spill] sm:$0xff] %v5240_v22  ;;  %v7667_v52 = vld [vmem:[#allocation54_spill] sm:$0xff]  ;;  %v7668_v17 = vld [vmem:[#allocation137_spill] sm:$0xff]  ;;  %v2519_v9 = vadd.f32 %v2518_v25, %v1701_v20  ;;  %v1407_v38 = vsub.f32 %v383_v60, %v895_v34 }
 0x181   :  { %v1704_v7 = vand.u32 2147483647, %v7660_v46  ;;  %v7669_v5 = vsub.f32 %v7667_v52, %v7668_v17  ;;  %v5249_v48 = vld [vmem:[#allocation6 + $0x9d8] sm:$0xff]  ;;  %v898_v10 = vld [vmem:[#allocation6 + $0xa20] sm:$0xff]  ;;  %v7671_v59 = vld [vmem:[#allocation66_spill] sm:$0xff]  ;;  %v2392_v46 = vadd.f32 %v2391_v14, %v1700_v35 }
 0x182   :  { %7670 = vst [vmem:[#allocation97_spill] sm:$0xff] %v5249_v48  ;;  %v7672_v30 = vld [vmem:[#allocation139_spill] sm:$0xff]  ;;  %v7677_v51 = vld [vmem:[#allocation138_spill] sm:$0xff]  ;;  %v7678_v31 = vld [vmem:[#allocation144_spill] sm:$0xff]  ;;  %v1914_v52 = vand.u32 2147483647, %v1402_v45 }
 0x183   :  { %v1708_v62 = vand.u32 2147483647, %v7669_v5  ;;  %v7673_v16 = vsub.f32 %v7671_v59, %v7672_v30  ;;  %v7674_v6 = vld [vmem:[#allocation75_spill] sm:$0xff]  ;;  %v7679_v27 = vsub.f32 %v7677_v51, %v7678_v31  ;;  %v1915_v17 = vand.u32 2147483647, %v1403_v42  ;;  %v5260_v5 = vld [vmem:[#allocation3 + $0x9f0] sm:$0xff] }
 0x184   :  { %v7675_v24 = vld [vmem:[#allocation143_spill] sm:$0xff]  ;;  %7680 = vst [vmem:[#allocation72_spill] sm:$0xff] %v5260_v5  ;;  %v387_v39 = vld [vmem:[#allocation3 + $0xa28] sm:$0xff]  ;;  %v2318_v59 = vadd.f32 %v2317_v61, %v1911_v0  ;;  %v2393_v30 = vadd.f32 %v2392_v46, %v1704_v7  ;;  %v5264_v35 = vld [vmem:[#allocation6 + $0x9f0] sm:$0xff]  ;;  %v1410_v42 = vsub.f32 %v386_v13, %v898_v10  ;;  %v2192_v22 = vadd.f32 %v2191_v23, %v1914_v52 }
 0x185   :  { %v1709_v26 = vand.u32 2147483647, %v7673_v16  ;;  %v7676_v8 = vsub.f32 %v7674_v6, %v7675_v24  ;;  %v1713_v12 = vand.u32 2147483647, %v7679_v27  ;;  %v899_v37 = vld [vmem:[#allocation6 + $0xa28] sm:$0xff]  ;;  %v2520_v16 = vadd.f32 %v2519_v9, %v1705_v53  ;;  %v5262_v63 = vld [vmem:[#allocation3 + $0x9f8] sm:$0xff] }
 0x186   :  { %7681 = vst [vmem:[#allocation78_spill] sm:$0xff] %v5262_v63  ;;  %v390_v6 = vld [vmem:[#allocation3 + $0xa40] sm:$0xff]  ;;  %7682 = vst [vmem:[#allocation79_spill] sm:$0xff] %v5264_v35  ;;  %v7683_v45 = vld [vmem:[#allocation50_spill] sm:$0xff]  ;;  %v2394_v9 = vadd.f32 %v2393_v30, %v1708_v62  ;;  %v1411_v27 = vsub.f32 %v387_v39, %v899_v37 }
 0x187   :  { %v1712_v28 = vand.u32 2147483647, %v7676_v8  ;;  %v7684_v60 = vld [vmem:[#allocation51_spill] sm:$0xff]  ;;  %v902_v61 = vld [vmem:[#allocation6 + $0xa40] sm:$0xff]  ;;  %v7688_v7 = vld [vmem:[#allocation74_spill] sm:$0xff]  ;;  %v2521_v31 = vadd.f32 %v2520_v16, %v1709_v26 }
 0x188   :  { %v7685_v14 = vsub.f32 %v7683_v45, %v7684_v60  ;;  %v5273_v3 = vld [vmem:[#allocation6 + $0x9f8] sm:$0xff]  ;;  %v7687_v47 = vld [vmem:[#allocation80_spill] sm:$0xff]  ;;  %v7690_v51 = vld [vmem:[#allocation86_spill] sm:$0xff]  ;;  %v1918_v45 = vand.u32 2147483647, %v1406_v19  ;;  %v1414_v19 = vsub.f32 %v390_v6, %v902_v61 }
 0x189   :  { %7686 = vst [vmem:[#allocation28_spill] sm:$0xff] %v5273_v3  ;;  %v7689_v53 = vsub.f32 %v7687_v47, %v7688_v7  ;;  %v7691_v24 = vld [vmem:[#allocation148_spill] sm:$0xff]  ;;  %v7693_v20 = vld [vmem:[#allocation146_spill] sm:$0xff]  ;;  %v7694_v13 = vld [vmem:[#allocation149_spill] sm:$0xff]  ;;  %v1919_v60 = vand.u32 2147483647, %v1407_v38  ;;  %v2319_v47 = vadd.f32 %v2318_v59, %v1915_v17  ;;  %v2395_v7 = vadd.f32 %v2394_v9, %v1712_v28 }
 0x18a   :  { %v1716_v25 = vand.u32 2147483647, %v7685_v14  ;;  %v7692_v8 = vsub.f32 %v7690_v51, %v7691_v24  ;;  %v7695_v10 = vsub.f32 %v7693_v20, %v7694_v13  ;;  %v5284_v14 = vld [vmem:[#allocation3 + $0xa10] sm:$0xff]  ;;  %v391_v48 = vld [vmem:[#allocation3 + $0xa48] sm:$0xff]  ;;  %v5286_v2 = vld [vmem:[#allocation3 + $0xa18] sm:$0xff]  ;;  %v2193_v35 = vadd.f32 %v2192_v22, %v1918_v45 }
 0x18b   :  { %v1717_v0 = vand.u32 2147483647, %v7689_v53  ;;  %7696 = vst [vmem:[#allocation125_spill] sm:$0xff] %v5284_v14  ;;  %v903_v40 = vld [vmem:[#allocation6 + $0xa48] sm:$0xff]  ;;  %v2522_v53 = vadd.f32 %v2521_v31, %v1713_v12  ;;  %7697 = vst [vmem:[#allocation82_spill] sm:$0xff] %v5286_v2  ;;  %v394_v51 = vld [vmem:[#allocation3 + $0xa60] sm:$0xff] }
 0x18c   :  { %v1720_v46 = vand.u32 2147483647, %v7692_v8  ;;  %v1721_v34 = vand.u32 2147483647, %v7695_v10  ;;  %v5288_v62 = vld [vmem:[#allocation6 + $0xa10] sm:$0xff]  ;;  %v7699_v26 = vld [vmem:[#allocation88_spill] sm:$0xff]  ;;  %v2396_v31 = vadd.f32 %v2395_v7, %v1716_v25  ;;  %v1415_v10 = vsub.f32 %v391_v48, %v903_v40 }
 0x18d   :  { %7698 = vst [vmem:[#allocation83_spill] sm:$0xff] %v5288_v62  ;;  %v7700_v38 = vld [vmem:[#allocation56_spill] sm:$0xff]  ;;  %v5297_v23 = vld [vmem:[#allocation6 + $0xa18] sm:$0xff]  ;;  %v7703_v12 = vld [vmem:[#allocation102_spill] sm:$0xff]  ;;  %v2523_v13 = vadd.f32 %v2522_v53, %v1717_v0 }
 0x18e   :  { %v7701_v30 = vsub.f32 %v7699_v26, %v7700_v38  ;;  %7702 = vst [vmem:[#allocation90_spill] sm:$0xff] %v5297_v23  ;;  %v906_v28 = vld [vmem:[#allocation6 + $0xa60] sm:$0xff]  ;;  %v7704_v52 = vld [vmem:[#allocation95_spill] sm:$0xff]  ;;  %v7709_v39 = vld [vmem:[#allocation42_spill] sm:$0xff]  ;;  %v1922_v26 = vand.u32 2147483647, %v1410_v42 }
 0x18f   :  { %v7705_v17 = vsub.f32 %v7703_v12, %v7704_v52  ;;  %v7706_v20 = vld [vmem:[#allocation103_spill] sm:$0xff]  ;;  %v1923_v38 = vand.u32 2147483647, %v1411_v27  ;;  %v395_v3 = vld [vmem:[#allocation3 + $0xa68] sm:$0xff]  ;;  %v2320_v12 = vadd.f32 %v2319_v47, %v1919_v60  ;;  %v2397_v52 = vadd.f32 %v2396_v31, %v1720_v46  ;;  %v5312_v25 = vld [vmem:[#allocation6 + $0xa30] sm:$0xff] }
 0x190   :  { %v1724_v16 = vand.u32 2147483647, %v7701_v30  ;;  %v7707_v24 = vld [vmem:[#allocation107_spill] sm:$0xff]  ;;  %v5308_v30 = vld [vmem:[#allocation3 + $0xa30] sm:$0xff]  ;;  %v907_v63 = vld [vmem:[#allocation6 + $0xa68] sm:$0xff]  ;;  %7714 = vst [vmem:[#allocation101_spill] sm:$0xff] %v5312_v25  ;;  %v1418_v42 = vsub.f32 %v394_v51, %v906_v28  ;;  %v2194_v62 = vadd.f32 %v2193_v35, %v1922_v26 }
 0x191   :  { %v1725_v59 = vand.u32 2147483647, %v7705_v17  ;;  %v7708_v8 = vsub.f32 %v7706_v20, %v7707_v24  ;;  %v7710_v6 = vld [vmem:[#allocation43_spill] sm:$0xff]  ;;  %7712 = vst [vmem:[#allocation175_spill] sm:$0xff] %v5308_v30  ;;  %v2524_v17 = vadd.f32 %v2523_v13, %v1721_v34  ;;  %v398_v20 = vld [vmem:[#allocation3 + $0xa80] sm:$0xff]  ;;  %v7715_v0 = vld [vmem:[#allocation57_spill] sm:$0xff] }
 0x192   :  { %v7711_v61 = vsub.f32 %v7709_v39, %v7710_v6  ;;  %v5310_v5 = vld [vmem:[#allocation3 + $0xa38] sm:$0xff]  ;;  %v910_v46 = vld [vmem:[#allocation6 + $0xa80] sm:$0xff]  ;;  %v7720_v45 = vld [vmem:[#allocation154_spill] sm:$0xff]  ;;  %v2398_v13 = vadd.f32 %v2397_v52, %v1724_v16 }
 0x193   :  { %v1728_v9 = vand.u32 2147483647, %v7708_v8  ;;  %7713 = vst [vmem:[#allocation100_spill] sm:$0xff] %v5310_v5  ;;  %v7716_v27 = vld [vmem:[#allocation151_spill] sm:$0xff]  ;;  %v7719_v34 = vld [vmem:[#allocation112_spill] sm:$0xff]  ;;  %v2525_v6 = vadd.f32 %v2524_v17, %v1725_v59  ;;  %v7725_v48 = vld [vmem:[#allocation153_spill] sm:$0xff] }
 0x194   :  { %v1729_v37 = vand.u32 2147483647, %v7711_v61  ;;  %v7717_v7 = vsub.f32 %v7715_v0, %v7716_v27  ;;  %v5321_v22 = vld [vmem:[#allocation6 + $0xa38] sm:$0xff]  ;;  %v7721_v60 = vsub.f32 %v7719_v34, %v7720_v45  ;;  %v7722_v39 = vld [vmem:[#allocation152_spill] sm:$0xff]  ;;  %v1419_v61 = vsub.f32 %v395_v3, %v907_v63  ;;  %v7726_v51 = vld [vmem:[#allocation157_spill] sm:$0xff] }
 0x195   :  { %7718 = vst [vmem:[#allocation188_spill] sm:$0xff] %v5321_v22  ;;  %v7723_v24 = vld [vmem:[#allocation156_spill] sm:$0xff]  ;;  %v7727_v28 = vsub.f32 %v7725_v48, %v7726_v51  ;;  %v1926_v0 = vand.u32 2147483647, %v1414_v19  ;;  %v1927_v27 = vand.u32 2147483647, %v1415_v10  ;;  %v2321_v34 = vadd.f32 %v2320_v12, %v1923_v38 }
 0x196   :  { %v1732_v53 = vand.u32 2147483647, %v7717_v7  ;;  %v1733_v47 = vand.u32 2147483647, %v7721_v60  ;;  %v7724_v8 = vsub.f32 %v7722_v39, %v7723_v24  ;;  %v5332_v7 = vld [vmem:[#allocation3 + $0xa50] sm:$0xff]  ;;  %v399_v23 = vld [vmem:[#allocation3 + $0xa88] sm:$0xff]  ;;  %v2399_v45 = vadd.f32 %v2398_v13, %v1728_v9 }
 0x197   :  { %v1737_v40 = vand.u32 2147483647, %v7727_v28  ;;  %7728 = vst [vmem:[#allocation108_spill] sm:$0xff] %v5332_v7  ;;  %v911_v2 = vld [vmem:[#allocation6 + $0xa88] sm:$0xff]  ;;  %v2526_v60 = vadd.f32 %v2525_v6, %v1729_v37  ;;  %v5334_v14 = vld [vmem:[#allocation3 + $0xa58] sm:$0xff]  ;;  %v402_v39 = vld [vmem:[#allocation3 + $0xaa0] sm:$0xff]  ;;  %v1422_v19 = vsub.f32 %v398_v20, %v910_v46  ;;  %v2195_v25 = vadd.f32 %v2194_v62, %v1926_v0 }
 0x198   :  { %v1736_v31 = vand.u32 2147483647, %v7724_v8  ;;  %7729 = vst [vmem:[#allocation122_spill] sm:$0xff] %v5334_v14  ;;  %v5336_v16 = vld [vmem:[#allocation6 + $0xa50] sm:$0xff]  ;;  %v7731_v59 = vld [vmem:[#allocation61_spill] sm:$0xff]  ;;  %v7732_v10 = vld [vmem:[#allocation64_spill] sm:$0xff]  ;;  %v2400_v6 = vadd.f32 %v2399_v45, %v1732_v53  ;;  %v1423_v28 = vsub.f32 %v399_v23, %v911_v2 }
 0x199   :  { %7730 = vst [vmem:[#allocation34_spill] sm:$0xff] %v5336_v16  ;;  %v7733_v52 = vsub.f32 %v7731_v59, %v7732_v10  ;;  %v5345_v35 = vld [vmem:[#allocation6 + $0xa58] sm:$0xff]  ;;  %v914_v9 = vld [vmem:[#allocation6 + $0xaa0] sm:$0xff]  ;;  %v7736_v26 = vld [vmem:[#allocation114_spill] sm:$0xff]  ;;  %v2527_v51 = vadd.f32 %v2526_v60, %v1733_v47  ;;  %v1930_v59 = vand.u32 2147483647, %v1418_v42 }
 0x19a   :  { %7734 = vst [vmem:[#allocation123_spill] sm:$0xff] %v5345_v35  ;;  %v7735_v37 = vld [vmem:[#allocation155_spill] sm:$0xff]  ;;  %v7739_v24 = vld [vmem:[#allocation160_spill] sm:$0xff]  ;;  %v7741_v3 = vld [vmem:[#allocation158_spill] sm:$0xff]  ;;  %v1931_v10 = vand.u32 2147483647, %v1419_v61  ;;  %v1426_v42 = vsub.f32 %v402_v39, %v914_v9 }
 0x19b   :  { %v1740_v17 = vand.u32 2147483647, %v7733_v52  ;;  %v7737_v38 = vsub.f32 %v7735_v37, %v7736_v26  ;;  %v7738_v48 = vld [vmem:[#allocation119_spill] sm:$0xff]  ;;  %v5356_v52 = vld [vmem:[#allocation3 + $0xa70] sm:$0xff]  ;;  %v403_v22 = vld [vmem:[#allocation3 + $0xaa8] sm:$0xff]  ;;  %v2322_v37 = vadd.f32 %v2321_v34, %v1927_v27  ;;  %v2401_v26 = vadd.f32 %v2400_v6, %v1736_v31 }
 0x19c   :  { %v7740_v8 = vsub.f32 %v7738_v48, %v7739_v24  ;;  %v7742_v20 = vld [vmem:[#allocation163_spill] sm:$0xff]  ;;  %7744 = vst [vmem:[#allocation25_spill] sm:$0xff] %v5356_v52  ;;  %v915_v5 = vld [vmem:[#allocation6 + $0xaa8] sm:$0xff]  ;;  %v406_v48 = vld [vmem:[#allocation3 + $0xac0] sm:$0xff]  ;;  %v2196_v16 = vadd.f32 %v2195_v25, %v1930_v59 }
 0x19d   :  { %v1741_v12 = vand.u32 2147483647, %v7737_v38  ;;  %v7743_v46 = vsub.f32 %v7741_v3, %v7742_v20  ;;  %v2528_v38 = vadd.f32 %v2527_v51, %v1737_v40  ;;  %v5358_v30 = vld [vmem:[#allocation3 + $0xa78] sm:$0xff]  ;;  %v5360_v53 = vld [vmem:[#allocation6 + $0xa70] sm:$0xff]  ;;  %v7747_v47 = vld [vmem:[#allocation161_spill] sm:$0xff]  ;;  %v2402_v51 = vadd.f32 %v2401_v26, %v1740_v17 }
 0x19e   :  { %v1744_v13 = vand.u32 2147483647, %v7740_v8  ;;  %7745 = vst [vmem:[#allocation200_spill] sm:$0xff] %v5358_v30  ;;  %7746 = vst [vmem:[#allocation39_spill] sm:$0xff] %v5360_v53  ;;  %v7748_v61 = vld [vmem:[#allocation127_spill] sm:$0xff]  ;;  %v918_v31 = vld [vmem:[#allocation6 + $0xac0] sm:$0xff] }
 0x19f   :  { %v1745_v63 = vand.u32 2147483647, %v7743_v46  ;;  %v7749_v45 = vsub.f32 %v7747_v47, %v7748_v61  ;;  %v5369_v62 = vld [vmem:[#allocation6 + $0xa78] sm:$0xff]  ;;  %v7751_v40 = vld [vmem:[#allocation162_spill] sm:$0xff]  ;;  %v7752_v0 = vld [vmem:[#allocation164_spill] sm:$0xff]  ;;  %v2529_v20 = vadd.f32 %v2528_v38, %v1741_v12  ;;  %v1427_v46 = vsub.f32 %v403_v22, %v915_v5 }
 0x1a0   :  { %7750 = vst [vmem:[#allocation46_spill] sm:$0xff] %v5369_v62  ;;  %v7753_v27 = vsub.f32 %v7751_v40, %v7752_v0  ;;  %v7754_v3 = vld [vmem:[#allocation69_spill] sm:$0xff]  ;;  %v7755_v24 = vld [vmem:[#allocation70_spill] sm:$0xff]  ;;  %v1934_v47 = vand.u32 2147483647, %v1422_v19  ;;  %v2323_v40 = vadd.f32 %v2322_v37, %v1931_v10  ;;  %v2403_v0 = vadd.f32 %v2402_v51, %v1744_v13  ;;  %v5382_v7 = vld [vmem:[#allocation3 + $0xa98] sm:$0xff] }
 0x1a1   :  { %v1748_v60 = vand.u32 2147483647, %v7749_v45  ;;  %v7756_v8 = vsub.f32 %v7754_v3, %v7755_v24  ;;  %v7757_v23 = vld [vmem:[#allocation38_spill] sm:$0xff]  ;;  %v7758_v39 = vld [vmem:[#allocation165_spill] sm:$0xff]  ;;  %v1935_v61 = vand.u32 2147483647, %v1423_v28  ;;  %v1430_v19 = vsub.f32 %v406_v48, %v918_v31 }
 0x1a2   :  { %v1749_v34 = vand.u32 2147483647, %v7753_v27  ;;  %v7759_v9 = vsub.f32 %v7757_v23, %v7758_v39  ;;  %v5380_v45 = vld [vmem:[#allocation3 + $0xa90] sm:$0xff]  ;;  %v407_v35 = vld [vmem:[#allocation3 + $0xac8] sm:$0xff]  ;;  %v2530_v27 = vadd.f32 %v2529_v20, %v1745_v63  ;;  %7761 = vst [vmem:[#allocation130_spill] sm:$0xff] %v5382_v7  ;;  %v410_v3 = vld [vmem:[#allocation3 + $0xae0] sm:$0xff]  ;;  %v2197_v53 = vadd.f32 %v2196_v16, %v1934_v47 }
 0x1a3   :  { %v1752_v6 = vand.u32 2147483647, %v7756_v8  ;;  %7760 = vst [vmem:[#allocation45_spill] sm:$0xff] %v5380_v45  ;;  %v919_v14 = vld [vmem:[#allocation6 + $0xac8] sm:$0xff]  ;;  %v5384_v17 = vld [vmem:[#allocation6 + $0xa90] sm:$0xff]  ;;  %v7764_v28 = vld [vmem:[#allocation171_spill] sm:$0xff]  ;;  %v2404_v20 = vadd.f32 %v2403_v0, %v1748_v60 }
 0x1a4   :  { %v1753_v2 = vand.u32 2147483647, %v7759_v9  ;;  %7762 = vst [vmem:[#allocation128_spill] sm:$0xff] %v5384_v17  ;;  %v7763_v12 = vld [vmem:[#allocation166_spill] sm:$0xff]  ;;  %v5393_v25 = vld [vmem:[#allocation6 + $0xa98] sm:$0xff]  ;;  %v922_v13 = vld [vmem:[#allocation6 + $0xae0] sm:$0xff]  ;;  %v2531_v39 = vadd.f32 %v2530_v27, %v1749_v34  ;;  %v1431_v9 = vsub.f32 %v407_v35, %v919_v14 }
 0x1a5   :  { %v7765_v26 = vsub.f32 %v7763_v12, %v7764_v28  ;;  %7766 = vst [vmem:[#allocation132_spill] sm:$0xff] %v5393_v25  ;;  %v7767_v63 = vld [vmem:[#allocation167_spill] sm:$0xff]  ;;  %v7768_v59 = vld [vmem:[#allocation172_spill] sm:$0xff]  ;;  %v7774_v48 = vld [vmem:[#allocation173_spill] sm:$0xff]  ;;  %v1938_v12 = vand.u32 2147483647, %v1426_v42  ;;  %v1434_v42 = vsub.f32 %v410_v3, %v922_v13 }
 0x1a6   :  { %v7769_v10 = vsub.f32 %v7767_v63, %v7768_v59  ;;  %v7770_v23 = vld [vmem:[#allocation55_spill] sm:$0xff]  ;;  %v7771_v24 = vld [vmem:[#allocation136_spill] sm:$0xff]  ;;  %v1939_v28 = vand.u32 2147483647, %v1427_v46  ;;  %v411_v62 = vld [vmem:[#allocation3 + $0xae8] sm:$0xff]  ;;  %v2324_v63 = vadd.f32 %v2323_v40, %v1935_v61  ;;  %v2405_v59 = vadd.f32 %v2404_v20, %v1752_v6 }
 0x1a7   :  { %v1756_v38 = vand.u32 2147483647, %v7765_v26  ;;  %v7772_v8 = vsub.f32 %v7770_v23, %v7771_v24  ;;  %v7773_v22 = vld [vmem:[#allocation60_spill] sm:$0xff]  ;;  %v5404_v26 = vld [vmem:[#allocation3 + $0xab0] sm:$0xff]  ;;  %v923_v30 = vld [vmem:[#allocation6 + $0xae8] sm:$0xff]  ;;  %v2198_v17 = vadd.f32 %v2197_v53, %v1938_v12 }
 0x1a8   :  { %v1757_v37 = vand.u32 2147483647, %v7769_v10  ;;  %v7775_v31 = vsub.f32 %v7773_v22, %v7774_v48  ;;  %7776 = vst [vmem:[#allocation129_spill] sm:$0xff] %v5404_v26  ;;  %v2532_v10 = vadd.f32 %v2531_v39, %v1753_v2  ;;  %v5406_v52 = vld [vmem:[#allocation3 + $0xab8] sm:$0xff]  ;;  %v414_v23 = vld [vmem:[#allocation3 + $0xb00] sm:$0xff]  ;;  %v5408_v60 = vld [vmem:[#allocation6 + $0xab0] sm:$0xff] }
 0x1a9   :  { %v1760_v51 = vand.u32 2147483647, %v7772_v8  ;;  %7777 = vst [vmem:[#allocation133_spill] sm:$0xff] %v5406_v52  ;;  %7778 = vst [vmem:[#allocation40_spill] sm:$0xff] %v5408_v60  ;;  %v7779_v34 = vld [vmem:[#allocation76_spill] sm:$0xff]  ;;  %v7780_v46 = vld [vmem:[#allocation77_spill] sm:$0xff]  ;;  %v2406_v39 = vadd.f32 %v2405_v59, %v1756_v38 }
 0x1aa   :  { %v1761_v5 = vand.u32 2147483647, %v7775_v31  ;;  %v7781_v0 = vsub.f32 %v7779_v34, %v7780_v46  ;;  %v5417_v16 = vld [vmem:[#allocation6 + $0xab8] sm:$0xff]  ;;  %v926_v6 = vld [vmem:[#allocation6 + $0xb00] sm:$0xff]  ;;  %v7784_v47 = vld [vmem:[#allocation142_spill] sm:$0xff]  ;;  %v2533_v48 = vadd.f32 %v2532_v10, %v1757_v37  ;;  %v1435_v31 = vsub.f32 %v411_v62, %v923_v30 }
 0x1ab   :  { %7782 = vst [vmem:[#allocation65_spill] sm:$0xff] %v5417_v16  ;;  %v7783_v2 = vld [vmem:[#allocation44_spill] sm:$0xff]  ;;  %v7787_v24 = vld [vmem:[#allocation145_spill] sm:$0xff]  ;;  %v1942_v34 = vand.u32 2147483647, %v1430_v19  ;;  %v5430_v45 = vld [vmem:[#allocation3 + $0xad8] sm:$0xff]  ;;  %v1438_v19 = vsub.f32 %v414_v23, %v926_v6 }
 0x1ac   :  { %v1764_v27 = vand.u32 2147483647, %v7781_v0  ;;  %v7785_v61 = vsub.f32 %v7783_v2, %v7784_v47  ;;  %v7786_v22 = vld [vmem:[#allocation140_spill] sm:$0xff]  ;;  %v7789_v35 = vld [vmem:[#allocation85_spill] sm:$0xff]  ;;  %v1943_v46 = vand.u32 2147483647, %v1431_v9  ;;  %v2325_v2 = vadd.f32 %v2324_v63, %v1939_v28 }
 0x1ad   :  { %v7788_v8 = vsub.f32 %v7786_v22, %v7787_v24  ;;  %v7790_v3 = vld [vmem:[#allocation176_spill] sm:$0xff]  ;;  %v5428_v0 = vld [vmem:[#allocation3 + $0xad0] sm:$0xff]  ;;  %v415_v25 = vld [vmem:[#allocation3 + $0xb08] sm:$0xff]  ;;  %v2407_v47 = vadd.f32 %v2406_v39, %v1760_v51  ;;  %7793 = vst [vmem:[#allocation134_spill] sm:$0xff] %v5430_v45  ;;  %v2199_v60 = vadd.f32 %v2198_v17, %v1942_v34 }
 0x1ae   :  { %v1765_v40 = vand.u32 2147483647, %v7785_v61  ;;  %v7791_v13 = vsub.f32 %v7789_v35, %v7790_v3  ;;  %7792 = vst [vmem:[#allocation131_spill] sm:$0xff] %v5428_v0  ;;  %v927_v7 = vld [vmem:[#allocation6 + $0xb08] sm:$0xff]  ;;  %v2534_v61 = vadd.f32 %v2533_v48, %v1761_v5  ;;  %v418_v22 = vld [vmem:[#allocation3 + $0xb20] sm:$0xff]  ;;  %v5432_v38 = vld [vmem:[#allocation6 + $0xad0] sm:$0xff] }
 0x1af   :  { %v1768_v20 = vand.u32 2147483647, %v7788_v8  ;;  %7794 = vst [vmem:[#allocation54_spill] sm:$0xff] %v5432_v38  ;;  %v7795_v37 = vld [vmem:[#allocation73_spill] sm:$0xff]  ;;  %v5441_v53 = vld [vmem:[#allocation6 + $0xad8] sm:$0xff]  ;;  %v930_v51 = vld [vmem:[#allocation6 + $0xb20] sm:$0xff]  ;;  %v2408_v48 = vadd.f32 %v2407_v47, %v1764_v27 }
 0x1b0   :  { %v1769_v14 = vand.u32 2147483647, %v7791_v13  ;;  %v7796_v9 = vld [vmem:[#allocation177_spill] sm:$0xff]  ;;  %7798 = vst [vmem:[#allocation137_spill] sm:$0xff] %v5441_v53  ;;  %v7799_v5 = vld [vmem:[#allocation147_spill] sm:$0xff]  ;;  %v7800_v12 = vld [vmem:[#allocation178_spill] sm:$0xff]  ;;  %v2535_v3 = vadd.f32 %v2534_v61, %v1765_v40  ;;  %v1439_v13 = vsub.f32 %v415_v25, %v927_v7 }
 0x1b1   :  { %v7797_v59 = vsub.f32 %v7795_v37, %v7796_v9  ;;  %v7801_v28 = vsub.f32 %v7799_v5, %v7800_v12  ;;  %v7802_v35 = vld [vmem:[#allocation68_spill] sm:$0xff]  ;;  %v7805_v62 = vld [vmem:[#allocation81_spill] sm:$0xff]  ;;  %v7806_v23 = vld [vmem:[#allocation179_spill] sm:$0xff]  ;;  %v1946_v37 = vand.u32 2147483647, %v1434_v42  ;;  %v2326_v5 = vadd.f32 %v2325_v2, %v1943_v46 }
 0x1b2   :  { %v7803_v24 = vld [vmem:[#allocation84_spill] sm:$0xff]  ;;  %v7807_v6 = vsub.f32 %v7805_v62, %v7806_v23  ;;  %v1947_v9 = vand.u32 2147483647, %v1435_v31  ;;  %v419_v16 = vld [vmem:[#allocation3 + $0xb28] sm:$0xff]  ;;  %v2409_v12 = vadd.f32 %v2408_v48, %v1768_v20  ;;  %v5454_v26 = vld [vmem:[#allocation3 + $0xaf8] sm:$0xff]  ;;  %v1442_v42 = vsub.f32 %v418_v22, %v930_v51 }
 0x1b3   :  { %v1772_v10 = vand.u32 2147483647, %v7797_v59  ;;  %v1773_v63 = vand.u32 2147483647, %v7801_v28  ;;  %v7804_v8 = vsub.f32 %v7802_v35, %v7803_v24  ;;  %v5452_v59 = vld [vmem:[#allocation3 + $0xaf0] sm:$0xff]  ;;  %v931_v52 = vld [vmem:[#allocation6 + $0xb28] sm:$0xff]  ;;  %v2536_v28 = vadd.f32 %v2535_v3, %v1769_v14 }
 0x1b4   :  { %v1777_v30 = vand.u32 2147483647, %v7807_v6  ;;  %7808 = vst [vmem:[#allocation66_spill] sm:$0xff] %v5452_v59  ;;  %7809 = vst [vmem:[#allocation139_spill] sm:$0xff] %v5454_v26  ;;  %v422_v35 = vld [vmem:[#allocation3 + $0xb40] sm:$0xff]  ;;  %v5456_v27 = vld [vmem:[#allocation6 + $0xaf0] sm:$0xff]  ;;  %v1443_v6 = vsub.f32 %v419_v16, %v931_v52  ;;  %v2200_v38 = vadd.f32 %v2199_v60, %v1946_v37 }
 0x1b5   :  { %v1776_v39 = vand.u32 2147483647, %v7804_v8  ;;  %7810 = vst [vmem:[#allocation75_spill] sm:$0xff] %v5456_v27  ;;  %v7811_v40 = vld [vmem:[#allocation180_spill] sm:$0xff]  ;;  %v7812_v31 = vld [vmem:[#allocation182_spill] sm:$0xff]  ;;  %v5465_v17 = vld [vmem:[#allocation6 + $0xaf8] sm:$0xff]  ;;  %v2410_v3 = vadd.f32 %v2409_v12, %v1772_v10  ;;  %v2537_v23 = vadd.f32 %v2536_v28, %v1773_v63 }
 0x1b6   :  { %v7813_v47 = vsub.f32 %v7811_v40, %v7812_v31  ;;  %7814 = vst [vmem:[#allocation143_spill] sm:$0xff] %v5465_v17  ;;  %v934_v20 = vld [vmem:[#allocation6 + $0xb40] sm:$0xff]  ;;  %v7815_v14 = vld [vmem:[#allocation181_spill] sm:$0xff]  ;;  %v7816_v34 = vld [vmem:[#allocation183_spill] sm:$0xff]  ;;  %v1950_v40 = vand.u32 2147483647, %v1438_v19 }
 0x1b7   :  { %v7817_v46 = vsub.f32 %v7815_v14, %v7816_v34  ;;  %v7818_v62 = vld [vmem:[#allocation96_spill] sm:$0xff]  ;;  %v7819_v24 = vld [vmem:[#allocation186_spill] sm:$0xff]  ;;  %v7822_v22 = vld [vmem:[#allocation187_spill] sm:$0xff]  ;;  %v1951_v31 = vand.u32 2147483647, %v1439_v13  ;;  %v2327_v14 = vadd.f32 %v2326_v5, %v1947_v9  ;;  %v2411_v34 = vadd.f32 %v2410_v3, %v1776_v39 }
 0x1b8   :  { %v1780_v61 = vand.u32 2147483647, %v7813_v47  ;;  %v7820_v8 = vsub.f32 %v7818_v62, %v7819_v24  ;;  %v7821_v25 = vld [vmem:[#allocation150_spill] sm:$0xff]  ;;  %v423_v53 = vld [vmem:[#allocation3 + $0xb48] sm:$0xff]  ;;  %v5478_v0 = vld [vmem:[#allocation3 + $0xb18] sm:$0xff]  ;;  %v1446_v19 = vsub.f32 %v422_v35, %v934_v20  ;;  %v2201_v27 = vadd.f32 %v2200_v38, %v1950_v40 }
 0x1b9   :  { %v1781_v2 = vand.u32 2147483647, %v7817_v46  ;;  %v7823_v51 = vsub.f32 %v7821_v25, %v7822_v22  ;;  %v5476_v47 = vld [vmem:[#allocation3 + $0xb10] sm:$0xff]  ;;  %v935_v45 = vld [vmem:[#allocation6 + $0xb48] sm:$0xff]  ;;  %v2538_v46 = vadd.f32 %v2537_v23, %v1777_v30  ;;  %7825 = vst [vmem:[#allocation144_spill] sm:$0xff] %v5478_v0  ;;  %v426_v62 = vld [vmem:[#allocation3 + $0xb60] sm:$0xff] }
 0x1ba   :  { %v1784_v48 = vand.u32 2147483647, %v7820_v8  ;;  %7824 = vst [vmem:[#allocation138_spill] sm:$0xff] %v5476_v47  ;;  %v5480_v10 = vld [vmem:[#allocation6 + $0xb10] sm:$0xff]  ;;  %v7827_v63 = vld [vmem:[#allocation91_spill] sm:$0xff]  ;;  %v7828_v13 = vld [vmem:[#allocation92_spill] sm:$0xff]  ;;  %v2412_v23 = vadd.f32 %v2411_v34, %v1780_v61 }
 0x1bb   :  { %v1785_v7 = vand.u32 2147483647, %v7823_v51  ;;  %7826 = vst [vmem:[#allocation50_spill] sm:$0xff] %v5480_v10  ;;  %v7829_v12 = vsub.f32 %v7827_v63, %v7828_v13  ;;  %v5489_v60 = vld [vmem:[#allocation6 + $0xb18] sm:$0xff]  ;;  %v938_v39 = vld [vmem:[#allocation6 + $0xb60] sm:$0xff]  ;;  %v7831_v30 = vld [vmem:[#allocation185_spill] sm:$0xff]  ;;  %v2539_v22 = vadd.f32 %v2538_v46, %v1781_v2  ;;  %v1447_v51 = vsub.f32 %v423_v53, %v935_v45 }
 0x1bc   :  { %7830 = vst [vmem:[#allocation51_spill] sm:$0xff] %v5489_v60  ;;  %v7832_v37 = vld [vmem:[#allocation118_spill] sm:$0xff]  ;;  %v7834_v25 = vld [vmem:[#allocation23_spill] sm:$0xff]  ;;  %v7838_v35 = vld [vmem:[#allocation193_spill] sm:$0xff]  ;;  %v1954_v63 = vand.u32 2147483647, %v1442_v42  ;;  %v1450_v42 = vsub.f32 %v426_v62, %v938_v39 }
 0x1bd   :  { %v1788_v28 = vand.u32 2147483647, %v7829_v12  ;;  %v7833_v9 = vsub.f32 %v7831_v30, %v7832_v37  ;;  %v7835_v24 = vld [vmem:[#allocation190_spill] sm:$0xff]  ;;  %v7837_v16 = vld [vmem:[#allocation159_spill] sm:$0xff]  ;;  %v1955_v13 = vand.u32 2147483647, %v1443_v6  ;;  %v2328_v30 = vadd.f32 %v2327_v14, %v1951_v31 }
 0x1be   :  { %v7836_v8 = vsub.f32 %v7834_v25, %v7835_v24  ;;  %v7839_v20 = vsub.f32 %v7837_v16, %v7838_v35  ;;  %v5500_v12 = vld [vmem:[#allocation3 + $0xb30] sm:$0xff]  ;;  %v427_v17 = vld [vmem:[#allocation3 + $0xb68] sm:$0xff]  ;;  %v2413_v37 = vadd.f32 %v2412_v23, %v1784_v48  ;;  %v5502_v59 = vld [vmem:[#allocation3 + $0xb38] sm:$0xff]  ;;  %v2202_v10 = vadd.f32 %v2201_v27, %v1954_v63 }
 0x1bf   :  { %v1789_v5 = vand.u32 2147483647, %v7833_v9  ;;  %7840 = vst [vmem:[#allocation80_spill] sm:$0xff] %v5500_v12  ;;  %v939_v26 = vld [vmem:[#allocation6 + $0xb68] sm:$0xff]  ;;  %v2540_v9 = vadd.f32 %v2539_v22, %v1785_v7  ;;  %7841 = vst [vmem:[#allocation74_spill] sm:$0xff] %v5502_v59  ;;  %v430_v25 = vld [vmem:[#allocation3 + $0xb80] sm:$0xff] }
 0x1c0   :  { %v1792_v3 = vand.u32 2147483647, %v7836_v8  ;;  %v1793_v52 = vand.u32 2147483647, %v7839_v20  ;;  %v5504_v61 = vld [vmem:[#allocation6 + $0xb30] sm:$0xff]  ;;  %v7843_v2 = vld [vmem:[#allocation191_spill] sm:$0xff]  ;;  %v2414_v22 = vadd.f32 %v2413_v37, %v1788_v28  ;;  %v1451_v20 = vsub.f32 %v427_v17, %v939_v26 }
 0x1c1   :  { %7842 = vst [vmem:[#allocation86_spill] sm:$0xff] %v5504_v61  ;;  %v7844_v6 = vld [vmem:[#allocation196_spill] sm:$0xff]  ;;  %v5513_v38 = vld [vmem:[#allocation6 + $0xb38] sm:$0xff]  ;;  %v7848_v40 = vld [vmem:[#allocation197_spill] sm:$0xff]  ;;  %v2541_v35 = vadd.f32 %v2540_v9, %v1789_v5 }
 0x1c2   :  { %v7845_v34 = vsub.f32 %v7843_v2, %v7844_v6  ;;  %7846 = vst [vmem:[#allocation148_spill] sm:$0xff] %v5513_v38  ;;  %v942_v48 = vld [vmem:[#allocation6 + $0xb80] sm:$0xff]  ;;  %v7850_v16 = vld [vmem:[#allocation98_spill] sm:$0xff]  ;;  %v7851_v24 = vld [vmem:[#allocation99_spill] sm:$0xff]  ;;  %v1958_v2 = vand.u32 2147483647, %v1446_v19 }
 0x1c3   :  { %v7847_v7 = vld [vmem:[#allocation192_spill] sm:$0xff]  ;;  %v7852_v8 = vsub.f32 %v7850_v16, %v7851_v24  ;;  %v7853_v53 = vld [vmem:[#allocation195_spill] sm:$0xff]  ;;  %v1959_v6 = vand.u32 2147483647, %v1447_v51  ;;  %v431_v60 = vld [vmem:[#allocation3 + $0xb88] sm:$0xff]  ;;  %v1454_v19 = vsub.f32 %v430_v25, %v942_v48 }
 0x1c4   :  { %v1796_v46 = vand.u32 2147483647, %v7845_v34  ;;  %v7849_v31 = vsub.f32 %v7847_v7, %v7848_v40  ;;  %v7854_v62 = vld [vmem:[#allocation168_spill] sm:$0xff]  ;;  %v5524_v34 = vld [vmem:[#allocation3 + $0xb50] sm:$0xff]  ;;  %v943_v0 = vld [vmem:[#allocation6 + $0xb88] sm:$0xff]  ;;  %v2329_v7 = vadd.f32 %v2328_v30, %v1955_v13  ;;  %v2415_v40 = vadd.f32 %v2414_v22, %v1792_v3 }
 0x1c5   :  { %v1800_v23 = vand.u32 2147483647, %v7852_v8  ;;  %v7855_v39 = vsub.f32 %v7853_v53, %v7854_v62  ;;  %7856 = vst [vmem:[#allocation146_spill] sm:$0xff] %v5524_v34  ;;  %v5526_v47 = vld [vmem:[#allocation3 + $0xb58] sm:$0xff]  ;;  %v434_v16 = vld [vmem:[#allocation3 + $0xba0] sm:$0xff]  ;;  %v5528_v28 = vld [vmem:[#allocation6 + $0xb50] sm:$0xff]  ;;  %v2203_v61 = vadd.f32 %v2202_v10, %v1958_v2 }
 0x1c6   :  { %v1797_v14 = vand.u32 2147483647, %v7849_v31  ;;  %v2542_v31 = vadd.f32 %v2541_v35, %v1793_v52  ;;  %7857 = vst [vmem:[#allocation149_spill] sm:$0xff] %v5526_v47  ;;  %7858 = vst [vmem:[#allocation88_spill] sm:$0xff] %v5528_v28  ;;  %v7859_v5 = vld [vmem:[#allocation170_spill] sm:$0xff]  ;;  %v7860_v51 = vld [vmem:[#allocation201_spill] sm:$0xff]  ;;  %v2416_v35 = vadd.f32 %v2415_v40, %v1796_v46 }
 0x1c7   :  { %v1801_v45 = vand.u32 2147483647, %v7855_v39  ;;  %v7861_v37 = vsub.f32 %v7859_v5, %v7860_v51  ;;  %v5537_v27 = vld [vmem:[#allocation6 + $0xb58] sm:$0xff]  ;;  %v946_v3 = vld [vmem:[#allocation6 + $0xba0] sm:$0xff]  ;;  %v7863_v52 = vld [vmem:[#allocation198_spill] sm:$0xff]  ;;  %v1455_v39 = vsub.f32 %v431_v60, %v943_v0 }
 0x1c8   :  { %7862 = vst [vmem:[#allocation56_spill] sm:$0xff] %v5537_v27  ;;  %v7864_v63 = vld [vmem:[#allocation202_spill] sm:$0xff]  ;;  %v7866_v53 = vld [vmem:[#allocation169_spill] sm:$0xff]  ;;  %v2543_v62 = vadd.f32 %v2542_v31, %v1797_v14  ;;  %v7869_v17 = vld [vmem:[#allocation135_spill] sm:$0xff]  ;;  %v1962_v5 = vand.u32 2147483647, %v1450_v42  ;;  %v1458_v42 = vsub.f32 %v434_v16, %v946_v3 }
 0x1c9   :  { %v1804_v9 = vand.u32 2147483647, %v7861_v37  ;;  %v7865_v13 = vsub.f32 %v7863_v52, %v7864_v63  ;;  %v7867_v24 = vld [vmem:[#allocation174_spill] sm:$0xff]  ;;  %v7870_v25 = vld [vmem:[#allocation203_spill] sm:$0xff]  ;;  %v1963_v51 = vand.u32 2147483647, %v1451_v20  ;;  %v2330_v52 = vadd.f32 %v2329_v7, %v1959_v6 }
 0x1ca   :  { %v7868_v8 = vsub.f32 %v7866_v53, %v7867_v24  ;;  %v7871_v48 = vsub.f32 %v7869_v17, %v7870_v25  ;;  %v5548_v37 = vld [vmem:[#allocation3 + $0xb70] sm:$0xff]  ;;  %v435_v38 = vld [vmem:[#allocation3 + $0xba8] sm:$0xff]  ;;  %v2417_v63 = vadd.f32 %v2416_v35, %v1800_v23  ;;  %v5550_v12 = vld [vmem:[#allocation3 + $0xb78] sm:$0xff]  ;;  %v2204_v28 = vadd.f32 %v2203_v61, %v1962_v5 }
 0x1cb   :  { %v1805_v30 = vand.u32 2147483647, %v7865_v13  ;;  %7872 = vst [vmem:[#allocation102_spill] sm:$0xff] %v5548_v37  ;;  %v947_v59 = vld [vmem:[#allocation6 + $0xba8] sm:$0xff]  ;;  %v2544_v13 = vadd.f32 %v2543_v62, %v1801_v45  ;;  %7873 = vst [vmem:[#allocation95_spill] sm:$0xff] %v5550_v12  ;;  %v438_v53 = vld [vmem:[#allocation3 + $0xbc0] sm:$0xff] }
 0x1cc   :  { %v1808_v22 = vand.u32 2147483647, %v7868_v8  ;;  %v1809_v26 = vand.u32 2147483647, %v7871_v48  ;;  %v5552_v46 = vld [vmem:[#allocation6 + $0xb70] sm:$0xff]  ;;  %v7875_v14 = vld [vmem:[#allocation104_spill] sm:$0xff]  ;;  %v2418_v62 = vadd.f32 %v2417_v63, %v1804_v9  ;;  %v1459_v48 = vsub.f32 %v435_v38, %v947_v59 }
 0x1cd   :  { %7874 = vst [vmem:[#allocation103_spill] sm:$0xff] %v5552_v46  ;;  %v7876_v20 = vld [vmem:[#allocation94_spill] sm:$0xff]  ;;  %v5561_v10 = vld [vmem:[#allocation6 + $0xb78] sm:$0xff]  ;;  %v950_v23 = vld [vmem:[#allocation6 + $0xbc0] sm:$0xff]  ;;  %v2545_v25 = vadd.f32 %v2544_v13, %v1805_v30 }
 0x1ce   :  { %v7877_v40 = vsub.f32 %v7875_v14, %v7876_v20  ;;  %7878 = vst [vmem:[#allocation107_spill] sm:$0xff] %v5561_v10  ;;  %v7879_v45 = vld [vmem:[#allocation48_spill] sm:$0xff]  ;;  %v7880_v2 = vld [vmem:[#allocation105_spill] sm:$0xff]  ;;  %v1966_v14 = vand.u32 2147483647, %v1454_v19  ;;  %v5574_v34 = vld [vmem:[#allocation3 + $0xb98] sm:$0xff]  ;;  %v1462_v19 = vsub.f32 %v438_v53, %v950_v23 }
 0x1cf   :  { %v7881_v6 = vsub.f32 %v7879_v45, %v7880_v2  ;;  %v7882_v17 = vld [vmem:[#allocation141_spill] sm:$0xff]  ;;  %v7885_v60 = vld [vmem:[#allocation204_spill] sm:$0xff]  ;;  %v1967_v20 = vand.u32 2147483647, %v1455_v39  ;;  %v2331_v45 = vadd.f32 %v2330_v52, %v1963_v51  ;;  %v2419_v2 = vadd.f32 %v2418_v62, %v1808_v22  ;;  %7889 = vst [vmem:[#allocation43_spill] sm:$0xff] %v5574_v34  ;;  %v5576_v9 = vld [vmem:[#allocation6 + $0xb90] sm:$0xff] }
 0x1d0   :  { %v1812_v31 = vand.u32 2147483647, %v7877_v40  ;;  %v7883_v24 = vld [vmem:[#allocation205_spill] sm:$0xff]  ;;  %v7886_v16 = vld [vmem:[#allocation208_spill] sm:$0xff]  ;;  %v5572_v40 = vld [vmem:[#allocation3 + $0xb90] sm:$0xff]  ;;  %7890 = vst [vmem:[#allocation57_spill] sm:$0xff] %v5576_v9  ;;  %v2205_v46 = vadd.f32 %v2204_v28, %v1966_v14 }
 0x1d1   :  { %v1813_v7 = vand.u32 2147483647, %v7881_v6  ;;  %v7884_v8 = vsub.f32 %v7882_v17, %v7883_v24  ;;  %v7887_v3 = vsub.f32 %v7885_v60, %v7886_v16  ;;  %7888 = vst [vmem:[#allocation42_spill] sm:$0xff] %v5572_v40  ;;  %v439_v27 = vld [vmem:[#allocation3 + $0xbc8] sm:$0xff]  ;;  %v2546_v6 = vadd.f32 %v2545_v25, %v1809_v26  ;;  %v442_v17 = vld [vmem:[#allocation3 + $0xbe0] sm:$0xff]  ;;  %v7891_v30 = vld [vmem:[#allocation206_spill] sm:$0xff] }
 0x1d2   :  { %v951_v47 = vld [vmem:[#allocation6 + $0xbc8] sm:$0xff]  ;;  %v7892_v39 = vld [vmem:[#allocation210_spill] sm:$0xff]  ;;  %v5585_v61 = vld [vmem:[#allocation6 + $0xb98] sm:$0xff]  ;;  %v2420_v25 = vadd.f32 %v2419_v2, %v1812_v31 }
 0x1d3   :  { %v1816_v35 = vand.u32 2147483647, %v7884_v8  ;;  %v1817_v0 = vand.u32 2147483647, %v7887_v3  ;;  %v7893_v63 = vsub.f32 %v7891_v30, %v7892_v39  ;;  %7894 = vst [vmem:[#allocation151_spill] sm:$0xff] %v5585_v61  ;;  %v954_v22 = vld [vmem:[#allocation6 + $0xbe0] sm:$0xff]  ;;  %v2547_v16 = vadd.f32 %v2546_v6, %v1813_v7 }
 0x1d4   :  { %v7895_v26 = vld [vmem:[#allocation207_spill] sm:$0xff]  ;;  %v7898_v60 = vld [vmem:[#allocation109_spill] sm:$0xff]  ;;  %v7899_v24 = vld [vmem:[#allocation110_spill] sm:$0xff]  ;;  %v1463_v3 = vsub.f32 %v439_v27, %v951_v47  ;;  %v1970_v30 = vand.u32 2147483647, %v1458_v42  ;;  %v1466_v42 = vsub.f32 %v442_v17, %v954_v22 }
 0x1d5   :  { %v1820_v13 = vand.u32 2147483647, %v7893_v63  ;;  %v7896_v5 = vld [vmem:[#allocation211_spill] sm:$0xff]  ;;  %v7900_v8 = vsub.f32 %v7898_v60, %v7899_v24  ;;  %v7901_v38 = vld [vmem:[#allocation209_spill] sm:$0xff]  ;;  %v7902_v53 = vld [vmem:[#allocation212_spill] sm:$0xff] }
 0x1d6   :  { %v7897_v51 = vsub.f32 %v7895_v26, %v7896_v5  ;;  %v7903_v23 = vsub.f32 %v7901_v38, %v7902_v53  ;;  %v1971_v39 = vand.u32 2147483647, %v1459_v48  ;;  %v5596_v63 = vld [vmem:[#allocation3 + $0xbb0] sm:$0xff]  ;;  %v443_v10 = vld [vmem:[#allocation3 + $0xbe8] sm:$0xff]  ;;  %v2332_v26 = vadd.f32 %v2331_v45, %v1967_v20  ;;  %v5598_v37 = vld [vmem:[#allocation3 + $0xbb8] sm:$0xff] }
 0x1d7   :  { %v1824_v62 = vand.u32 2147483647, %v7900_v8  ;;  %v955_v12 = vld [vmem:[#allocation6 + $0xbe8] sm:$0xff]  ;;  %v2421_v5 = vadd.f32 %v2420_v25, %v1816_v35  ;;  %7904 = vst [vmem:[#allocation112_spill] sm:$0xff] %v5598_v37  ;;  %v446_v60 = vld [vmem:[#allocation3 + $0xc00] sm:$0xff]  ;;  %v5600_v31 = vld [vmem:[#allocation6 + $0xbb0] sm:$0xff]  ;;  %v2206_v9 = vadd.f32 %v2205_v46, %v1970_v30 }
 0x1d8   :  { %v1821_v52 = vand.u32 2147483647, %v7897_v51  ;;  %v1825_v59 = vand.u32 2147483647, %v7903_v23  ;;  %v2548_v51 = vadd.f32 %v2547_v16, %v1817_v0  ;;  %7905 = vst [vmem:[#allocation154_spill] sm:$0xff] %v5600_v31  ;;  %v7906_v7 = vld [vmem:[#allocation184_spill] sm:$0xff]  ;;  %v1467_v23 = vsub.f32 %v443_v10, %v955_v12 }
 0x1d9   :  { %v7907_v48 = vld [vmem:[#allocation215_spill] sm:$0xff]  ;;  %v958_v35 = vld [vmem:[#allocation6 + $0xc00] sm:$0xff]  ;;  %v7910_v0 = vld [vmem:[#allocation213_spill] sm:$0xff]  ;;  %v2422_v16 = vadd.f32 %v2421_v5, %v1820_v13 }
 0x1da   :  { %v7908_v2 = vsub.f32 %v7906_v7, %v7907_v48  ;;  %v5609_v28 = vld [vmem:[#allocation6 + $0xbb8] sm:$0xff]  ;;  %v7911_v14 = vld [vmem:[#allocation218_spill] sm:$0xff]  ;;  %v7913_v38 = vld [vmem:[#allocation216_spill] sm:$0xff]  ;;  %v2549_v53 = vadd.f32 %v2548_v51, %v1821_v52  ;;  %v1974_v7 = vand.u32 2147483647, %v1462_v19  ;;  %v1470_v19 = vsub.f32 %v446_v60, %v958_v35 }
 0x1db   :  { %7909 = vst [vmem:[#allocation152_spill] sm:$0xff] %v5609_v28  ;;  %v7912_v20 = vsub.f32 %v7910_v0, %v7911_v14  ;;  %v7914_v24 = vld [vmem:[#allocation22_spill] sm:$0xff]  ;;  %v7916_v27 = vld [vmem:[#allocation217_spill] sm:$0xff]  ;;  %v7917_v17 = vld [vmem:[#allocation32_spill] sm:$0xff]  ;;  %v1975_v48 = vand.u32 2147483647, %v1463_v3  ;;  %v2333_v0 = vadd.f32 %v2332_v26, %v1971_v39  ;;  %v2423_v14 = vadd.f32 %v2422_v16, %v1824_v62 }
 0x1dc   :  { %v1828_v6 = vand.u32 2147483647, %v7908_v2  ;;  %v7915_v8 = vsub.f32 %v7913_v38, %v7914_v24  ;;  %v7918_v22 = vsub.f32 %v7916_v27, %v7917_v17  ;;  %v5620_v2 = vld [vmem:[#allocation3 + $0xbd0] sm:$0xff]  ;;  %v447_v61 = vld [vmem:[#allocation3 + $0xc08] sm:$0xff]  ;;  %v5622_v40 = vld [vmem:[#allocation3 + $0xbd8] sm:$0xff]  ;;  %v2207_v37 = vadd.f32 %v2206_v9, %v1974_v7 }
 0x1dd   :  { %v1829_v45 = vand.u32 2147483647, %v7912_v20  ;;  %7919 = vst [vmem:[#allocation156_spill] sm:$0xff] %v5620_v2  ;;  %v959_v34 = vld [vmem:[#allocation6 + $0xc08] sm:$0xff]  ;;  %v2550_v20 = vadd.f32 %v2549_v53, %v1825_v59  ;;  %7920 = vst [vmem:[#allocation153_spill] sm:$0xff] %v5622_v40  ;;  %v450_v38 = vld [vmem:[#allocation3 + $0xc20] sm:$0xff] }
 0x1de   :  { %v1832_v25 = vand.u32 2147483647, %v7915_v8  ;;  %v1833_v47 = vand.u32 2147483647, %v7918_v22  ;;  %v5624_v13 = vld [vmem:[#allocation6 + $0xbd0] sm:$0xff]  ;;  %v7922_v52 = vld [vmem:[#allocation189_spill] sm:$0xff]  ;;  %v2424_v16 = vadd.f32 %v2423_v14, %v1828_v6  ;;  %v1471_v17 = vsub.f32 %v447_v61, %v959_v34 }
 0x1df   :  { %7921 = vst [vmem:[#allocation157_spill] sm:$0xff] %v5624_v13  ;;  %v7923_v3 = vld [vmem:[#allocation113_spill] sm:$0xff]  ;;  %v5633_v46 = vld [vmem:[#allocation6 + $0xbd8] sm:$0xff]  ;;  %v962_v62 = vld [vmem:[#allocation6 + $0xc20] sm:$0xff]  ;;  %v2551_v53 = vadd.f32 %v2550_v20, %v1829_v45 }
 0x1e0   :  { %v7924_v5 = vsub.f32 %v7922_v52, %v7923_v3  ;;  %7925 = vst [vmem:[#allocation61_spill] sm:$0xff] %v5633_v46  ;;  %v7926_v59 = vld [vmem:[#allocation18_spill] sm:$0xff]  ;;  %v7927_v30 = vld [vmem:[#allocation220_spill] sm:$0xff]  ;;  %v7929_v27 = vld [vmem:[#allocation31_spill] sm:$0xff]  ;;  %v1978_v52 = vand.u32 2147483647, %v1466_v42  ;;  %v1474_v42 = vsub.f32 %v450_v38, %v962_v62 }
 0x1e1   :  { %v7928_v39 = vsub.f32 %v7926_v59, %v7927_v30  ;;  %v7930_v24 = vsub.f32 %v4693_v21, %v7929_v27  ;;  %v7931_v22 = vld [vmem:[#allocation221_spill] sm:$0xff]  ;;  %v7932_v60 = vld [vmem:[#allocation223_spill] sm:$0xff]  ;;  %v1979_v3 = vand.u32 2147483647, %v1467_v23  ;;  %v2334_v59 = vadd.f32 %v2333_v0, %v1975_v48  ;;  %v454_v21 = vld [vmem:[#allocation3 + $0xc40] sm:$0xff] }
 0x1e2   :  { %v1836_v51 = vand.u32 2147483647, %v7924_v5  ;;  %v7933_v35 = vsub.f32 %v7931_v22, %v7932_v60  ;;  %v5644_v5 = vld [vmem:[#allocation3 + $0xbf0] sm:$0xff]  ;;  %v451_v12 = vld [vmem:[#allocation3 + $0xc28] sm:$0xff]  ;;  %v2425_v30 = vadd.f32 %v2424_v16, %v1832_v25  ;;  %v5646_v31 = vld [vmem:[#allocation3 + $0xbf8] sm:$0xff]  ;;  %v2208_v13 = vadd.f32 %v2207_v37, %v1978_v52 }
 0x1e3   :  { %v1837_v26 = vand.u32 2147483647, %v7928_v39  ;;  %v1840_v8 = vand.u32 2147483647, %v7930_v24  ;;  %v963_v28 = vld [vmem:[#allocation6 + $0xc28] sm:$0xff]  ;;  %v2552_v39 = vadd.f32 %v2551_v53, %v1833_v47  ;;  %v5648_v6 = vld [vmem:[#allocation6 + $0xbf0] sm:$0xff] }
 0x1e4   :  { %v1841_v10 = vand.u32 2147483647, %v7933_v35  ;;  %v7934_v45 = vld [vmem:[#allocation126_spill] sm:$0xff]  ;;  %v7935_v23 = vld [vmem:[#allocation224_spill] sm:$0xff]  ;;  %v5657_v9 = vld [vmem:[#allocation6 + $0xbf8] sm:$0xff]  ;;  %v2426_v22 = vadd.f32 %v2425_v30, %v1836_v51  ;;  %v1475_v35 = vsub.f32 %v451_v12, %v963_v28 }
 0x1e5   :  { %v7936_v14 = vsub.f32 %v7934_v45, %v7935_v23  ;;  %v966_v25 = vld [vmem:[#allocation6 + $0xc40] sm:$0xff]  ;;  %v7937_v47 = vld [vmem:[#allocation199_spill] sm:$0xff]  ;;  %v7938_v7 = vld [vmem:[#allocation225_spill] sm:$0xff]  ;;  %v2553_v60 = vadd.f32 %v2552_v39, %v1837_v26  ;;  %v1982_v45 = vand.u32 2147483647, %v1470_v19 }
 0x1e6   :  { %v7939_v48 = vsub.f32 %v7937_v47, %v7938_v7  ;;  %v7940_v27 = vld [vmem:[#allocation111_spill] sm:$0xff]  ;;  %v7941_v24 = vld [vmem:[#allocation13_spill] sm:$0xff]  ;;  %v1983_v23 = vand.u32 2147483647, %v1471_v17  ;;  %v2335_v47 = vadd.f32 %v2334_v59, %v1979_v3  ;;  %v2427_v7 = vadd.f32 %v2426_v22, %v1840_v8  ;;  %v5672_v51 = vld [vmem:[#allocation6 + $0xc10] sm:$0xff] }
 0x1e7   :  { %v1844_v20 = vand.u32 2147483647, %v7936_v14  ;;  %v7942_v16 = vsub.f32 %v7940_v27, %v7941_v24  ;;  %v7943_v61 = vld [vmem:[#allocation35_spill] sm:$0xff]  ;;  %v5668_v14 = vld [vmem:[#allocation3 + $0xc10] sm:$0xff]  ;;  %v455_v46 = vld [vmem:[#allocation3 + $0xc48] sm:$0xff]  ;;  %v1478_v19 = vsub.f32 %v454_v21, %v966_v25  ;;  %v7951_v59 = vsub.f32 %v4824_v1, %v4857_v44 }
 0x1e8   :  { %v1845_v0 = vand.u32 2147483647, %v7939_v48  ;;  %v7944_v38 = vld [vmem:[#allocation19_spill] sm:$0xff]  ;;  %v967_v40 = vld [vmem:[#allocation6 + $0xc48] sm:$0xff]  ;;  %v2554_v48 = vadd.f32 %v2553_v60, %v1841_v10  ;;  %v458_v27 = vld [vmem:[#allocation3 + $0xc60] sm:$0xff] }
 0x1e9   :  { %v1848_v53 = vand.u32 2147483647, %v7942_v16  ;;  %v7945_v62 = vsub.f32 %v7943_v61, %v7944_v38  ;;  %v5670_v2 = vld [vmem:[#allocation3 + $0xc18] sm:$0xff]  ;;  %v7946_v26 = vld [vmem:[#allocation226_spill] sm:$0xff]  ;;  %v970_v8 = vld [vmem:[#allocation6 + $0xc60] sm:$0xff]  ;;  %v2428_v61 = vadd.f32 %v2427_v7, %v1844_v20  ;;  %v1479_v16 = vsub.f32 %v455_v46, %v967_v40 }
 0x1ea   :  { %v7947_v17 = vsub.f32 %v4796_v49, %v7946_v26  ;;  %v5681_v37 = vld [vmem:[#allocation6 + $0xc18] sm:$0xff]  ;;  %v1856_v39 = vand.u32 2147483647, %v7951_v59  ;;  %v2555_v24 = vadd.f32 %v2554_v48, %v1845_v0  ;;  %v7952_v21 = vld [vmem:[#allocation116_spill] sm:$0xff]  ;;  %v1986_v49 = vand.u32 2147483647, %v1474_v42 }
 0x1eb   :  { %v1849_v34 = vand.u32 2147483647, %v7945_v62  ;;  %7948 = vst [vmem:[#allocation64_spill] sm:$0xff] %v5681_v37  ;;  %v7949_v10 = vld [vmem:[#allocation227_spill] sm:$0xff]  ;;  %v7953_v25 = vsub.f32 %v4826_v18, %v7952_v21  ;;  %v1987_v60 = vand.u32 2147483647, %v1475_v35  ;;  %v1482_v46 = vsub.f32 %v458_v27, %v970_v8 }
 0x1ec   :  { %v1852_v30 = vand.u32 2147483647, %v7947_v17  ;;  %v7950_v52 = vsub.f32 %v4798_v33, %v7949_v10  ;;  %v5692_v38 = vld [vmem:[#allocation3 + $0xc30] sm:$0xff]  ;;  %v459_v62 = vld [vmem:[#allocation3 + $0xc68] sm:$0xff]  ;;  %v2209_v17 = vadd.f32 %v2208_v13, %v1982_v45  ;;  %v2336_v33 = vadd.f32 %v2335_v47, %v1983_v23  ;;  %v5694_v12 = vld [vmem:[#allocation3 + $0xc38] sm:$0xff] }
 0x1ed   :  { %v1857_v22 = vand.u32 2147483647, %v7953_v25  ;;  %v971_v26 = vld [vmem:[#allocation6 + $0xc68] sm:$0xff]  ;;  %v2429_v10 = vadd.f32 %v2428_v61, %v1848_v53  ;;  %v462_v1 = vld [vmem:[#allocation3 + $0xc80] sm:$0xff]  ;;  %v5696_v44 = vld [vmem:[#allocation6 + $0xc30] sm:$0xff]  ;;  %v7963_v27 = vsub.f32 %v4938_v4, %v4940_v32 }
 0x1ee   :  { %v1853_v3 = vand.u32 2147483647, %v7950_v52  ;;  %v2556_v52 = vadd.f32 %v2555_v24, %v1849_v34  ;;  %v7954_v42 = vld [vmem:[#allocation15_spill] sm:$0xff]  ;;  %v7955_v20 = vld [vmem:[#allocation117_spill] sm:$0xff]  ;;  %v974_v53 = vld [vmem:[#allocation6 + $0xc80] sm:$0xff]  ;;  %v1483_v25 = vsub.f32 %v459_v62, %v971_v26  ;;  %v2210_v28 = vadd.f32 %v2209_v17, %v1986_v49 }
 0x1ef   :  { %v7956_v0 = vsub.f32 %v7954_v42, %v7955_v20  ;;  %v5705_v13 = vld [vmem:[#allocation6 + $0xc38] sm:$0xff]  ;;  %v7957_v34 = vld [vmem:[#allocation14_spill] sm:$0xff]  ;;  %v7958_v45 = vld [vmem:[#allocation228_spill] sm:$0xff]  ;;  %v2430_v24 = vadd.f32 %v2429_v10, %v1852_v30  ;;  %v1865_v8 = vand.u32 2147483647, %v7963_v27  ;;  %v1486_v32 = vsub.f32 %v462_v1, %v974_v53 }
 0x1f0   :  { %v7959_v23 = vsub.f32 %v7957_v34, %v7958_v45  ;;  %v7960_v7 = vld [vmem:[#allocation214_spill] sm:$0xff]  ;;  %v7961_v48 = vld [vmem:[#allocation229_spill] sm:$0xff]  ;;  %v2557_v21 = vadd.f32 %v2556_v52, %v1853_v3  ;;  %v1990_v42 = vand.u32 2147483647, %v1478_v19  ;;  %v1991_v20 = vand.u32 2147483647, %v1479_v16 }
 0x1f1   :  { %v1860_v35 = vand.u32 2147483647, %v7956_v0  ;;  %v7962_v59 = vsub.f32 %v7960_v7, %v7961_v48  ;;  %v5716_v0 = vld [vmem:[#allocation3 + $0xc50] sm:$0xff]  ;;  %v463_v18 = vld [vmem:[#allocation3 + $0xc88] sm:$0xff]  ;;  %v2337_v34 = vadd.f32 %v2336_v33, %v1987_v60  ;;  %v2431_v45 = vadd.f32 %v2430_v24, %v1856_v39  ;;  %v5718_v37 = vld [vmem:[#allocation3 + $0xc58] sm:$0xff] }
 0x1f2   :  { %v1861_v47 = vand.u32 2147483647, %v7959_v23  ;;  %v975_v40 = vld [vmem:[#allocation6 + $0xc88] sm:$0xff]  ;;  %v2558_v23 = vadd.f32 %v2557_v21, %v1857_v22  ;;  %v466_v7 = vld [vmem:[#allocation3 + $0xca0] sm:$0xff]  ;;  %v5720_v30 = vld [vmem:[#allocation6 + $0xc50] sm:$0xff]  ;;  %v7964_v19 = vsub.f32 %v4969_v29, %v4983_v11  ;;  %v7965_v22 = vsub.f32 %v4981_v50, %v4985_v56 }
 0x1f3   :  { %v1864_v61 = vand.u32 2147483647, %v7962_v59  ;;  %v5729_v49 = vld [vmem:[#allocation6 + $0xc58] sm:$0xff]  ;;  %v978_v39 = vld [vmem:[#allocation6 + $0xca0] sm:$0xff]  ;;  %v7966_v62 = vsub.f32 %v5012_v41, %v5023_v55  ;;  %v2432_v17 = vadd.f32 %v2431_v45, %v1860_v35  ;;  %v1487_v10 = vsub.f32 %v463_v18, %v975_v40  ;;  %v5740_v53 = vld [vmem:[#allocation3 + $0xc70] sm:$0xff] }
 0x1f4   :  { %v1868_v16 = vand.u32 2147483647, %v7964_v19  ;;  %v1869_v60 = vand.u32 2147483647, %v7965_v22  ;;  %v2559_v33 = vadd.f32 %v2558_v23, %v1861_v47  ;;  %v7967_v52 = vsub.f32 %v5021_v36, %v5025_v15  ;;  %v467_v48 = vld [vmem:[#allocation3 + $0xca8] sm:$0xff]  ;;  %v5742_v27 = vld [vmem:[#allocation3 + $0xc78] sm:$0xff] }
 0x1f5   :  { %v1872_v26 = vand.u32 2147483647, %v7966_v62  ;;  %v1994_v29 = vand.u32 2147483647, %v1482_v46  ;;  %v1995_v11 = vand.u32 2147483647, %v1483_v25  ;;  %v2211_v24 = vadd.f32 %v2210_v28, %v1990_v42 }
 0x1f6   :  { %v1873_v1 = vand.u32 2147483647, %v7967_v52  ;;  %v979_v59 = vld [vmem:[#allocation6 + $0xca8] sm:$0xff]  ;;  %v2338_v50 = vadd.f32 %v2337_v34, %v1991_v20  ;;  %v2433_v56 = vadd.f32 %v2432_v17, %v1864_v61  ;;  %v2560_v21 = vadd.f32 %v2559_v33, %v1865_v8  ;;  %7968 = vst [vmem:[#allocation155_spill] sm:$0xff] %v5742_v27  ;;  %v470_v41 = vld [vmem:[#allocation3 + $0xcc0] sm:$0xff]  ;;  %v5744_v55 = vld [vmem:[#allocation6 + $0xc70] sm:$0xff] }
 0x1f7   :  { %7969 = vst [vmem:[#allocation114_spill] sm:$0xff] %v5744_v55  ;;  %v1490_v15 = vsub.f32 %v466_v7, %v978_v39  ;;  %v7970_v18 = vld [vmem:[#allocation115_spill] sm:$0xff]  ;;  %v7971_v46 = vld [vmem:[#allocation120_spill] sm:$0xff]  ;;  %v1491_v62 = vsub.f32 %v467_v48, %v979_v59  ;;  %v7980_v7 = vld [vmem:[#allocation222_spill] sm:$0xff]  ;;  %v1998_v52 = vand.u32 2147483647, %v1486_v32  ;;  %v2212_v40 = vadd.f32 %v2211_v24, %v1994_v29 }
 0x1f8   :  { %v7972_v35 = vsub.f32 %v7970_v18, %v7971_v46  ;;  %v5753_v28 = vld [vmem:[#allocation6 + $0xc78] sm:$0xff]  ;;  %v982_v61 = vld [vmem:[#allocation6 + $0xcc0] sm:$0xff]  ;;  %v2434_v19 = vadd.f32 %v2433_v56, %v1868_v16  ;;  %v2561_v22 = vadd.f32 %v2560_v21, %v1869_v60  ;;  %v1999_v18 = vand.u32 2147483647, %v1487_v10  ;;  %v5764_v46 = vld [vmem:[#allocation3 + $0xc90] sm:$0xff] }
 0x1f9   :  { %7973 = vst [vmem:[#allocation119_spill] sm:$0xff] %v5753_v28  ;;  %v7974_v25 = vld [vmem:[#allocation219_spill] sm:$0xff]  ;;  %v7976_v20 = vld [vmem:[#allocation24_spill] sm:$0xff]  ;;  %v983_v36 = vld [vmem:[#allocation6 + $0xcc8] sm:$0xff]  ;;  %v1494_v10 = vsub.f32 %v470_v41, %v982_v61  ;;  %v2213_v27 = vadd.f32 %v2212_v40, %v1998_v52 }
 0x1fa   :  { %v1876_v47 = vand.u32 2147483647, %v7972_v35  ;;  %v7975_v8 = vsub.f32 %v5086_v43, %v7974_v25  ;;  %v7977_v34 = vld [vmem:[#allocation52_spill] sm:$0xff]  ;;  %v7979_v17 = vld [vmem:[#allocation47_spill] sm:$0xff]  ;;  %v471_v35 = vld [vmem:[#allocation3 + $0xcc8] sm:$0xff]  ;;  %v2339_v43 = vadd.f32 %v2338_v50, %v1995_v11  ;;  %v2435_v25 = vadd.f32 %v2434_v19, %v1872_v26 }
 0x1fb   :  { %v7978_v45 = vsub.f32 %v7976_v20, %v7977_v34  ;;  %v7981_v39 = vsub.f32 %v7979_v17, %v7980_v7  ;;  %v5766_v4 = vld [vmem:[#allocation3 + $0xc98] sm:$0xff]  ;;  %v474_v20 = vld [vmem:[#allocation3 + $0xce0] sm:$0xff]  ;;  %v5768_v16 = vld [vmem:[#allocation6 + $0xc90] sm:$0xff] }
 0x1fc   :  { %v1877_v42 = vand.u32 2147483647, %v7975_v8  ;;  %v2562_v8 = vadd.f32 %v2561_v22, %v1873_v1  ;;  %v7982_v48 = vld [vmem:[#allocation29_spill] sm:$0xff]  ;;  %v7983_v59 = vld [vmem:[#allocation194_spill] sm:$0xff]  ;;  %v5777_v29 = vld [vmem:[#allocation6 + $0xc98] sm:$0xff]  ;;  %v2436_v17 = vadd.f32 %v2435_v25, %v1876_v47 }
 0x1fd   :  { %v1880_v23 = vand.u32 2147483647, %v7978_v45  ;;  %v1881_v33 = vand.u32 2147483647, %v7981_v39  ;;  %v7984_v56 = vsub.f32 %v7982_v48, %v7983_v59  ;;  %7985 = vst [vmem:[#allocation160_spill] sm:$0xff] %v5777_v29  ;;  %v986_v26 = vld [vmem:[#allocation6 + $0xce0] sm:$0xff]  ;;  %v1495_v39 = vsub.f32 %v471_v35, %v983_v36 }
 0x1fe   :  { %v7986_v1 = vld [vmem:[#allocation67_spill] sm:$0xff]  ;;  %v2563_v7 = vadd.f32 %v2562_v8, %v1877_v42  ;;  %v7992_v32 = vld [vmem:[#allocation121_spill] sm:$0xff]  ;;  %v2002_v48 = vand.u32 2147483647, %v1490_v15  ;;  %v2003_v59 = vand.u32 2147483647, %v1491_v62  ;;  %v1498_v42 = vsub.f32 %v474_v20, %v986_v26 }
 0x1ff   :  { %v1884_v21 = vand.u32 2147483647, %v7984_v56  ;;  %v7987_v11 = vld [vmem:[#allocation71_spill] sm:$0xff]  ;;  %v7993_v41 = vld [vmem:[#allocation93_spill] sm:$0xff]  ;;  %v5788_v56 = vld [vmem:[#allocation3 + $0xcb0] sm:$0xff] }
 0x200   :  { %v7988_v24 = vsub.f32 %v7986_v1, %v7987_v11  ;;  %v7989_v34 = vld [vmem:[#allocation27_spill] sm:$0xff]  ;;  %v7994_v61 = vsub.f32 %v7992_v32, %v7993_v41  ;;  %7995 = vst [vmem:[#allocation158_spill] sm:$0xff] %v5788_v56  ;;  %v475_v3 = vld [vmem:[#allocation3 + $0xce8] sm:$0xff]  ;;  %v2340_v1 = vadd.f32 %v2339_v43, %v1999_v18  ;;  %v2437_v11 = vadd.f32 %v2436_v17, %v1880_v23  ;;  %v5792_v47 = vld [vmem:[#allocation6 + $0xcb0] sm:$0xff] }
 0x201   :  { %v7990_v45 = vld [vmem:[#allocation87_spill] sm:$0xff]  ;;  %v987_v28 = vld [vmem:[#allocation6 + $0xce8] sm:$0xff]  ;;  %7997 = vst [vmem:[#allocation161_spill] sm:$0xff] %v5792_v47  ;;  %v7998_v62 = vld [vmem:[#allocation12_spill] sm:$0xff]  ;;  %v2214_v36 = vadd.f32 %v2213_v27, %v2002_v48 }
 0x202   :  { %v1885_v50 = vand.u32 2147483647, %v7988_v24  ;;  %v7991_v19 = vsub.f32 %v7989_v34, %v7990_v45  ;;  %v1889_v60 = vand.u32 2147483647, %v7994_v61  ;;  %v2564_v24 = vadd.f32 %v2563_v7, %v1881_v33  ;;  %v5790_v55 = vld [vmem:[#allocation3 + $0xcb8] sm:$0xff]  ;;  %v478_v34 = vld [vmem:[#allocation3 + $0xd00] sm:$0xff] }
 0x203   :  { %7996 = vst [vmem:[#allocation163_spill] sm:$0xff] %v5790_v55  ;;  %v7999_v35 = vsub.f32 %v5125_v54, %v7998_v62  ;;  %v5801_v40 = vld [vmem:[#allocation6 + $0xcb8] sm:$0xff]  ;;  %v990_v23 = vld [vmem:[#allocation6 + $0xd00] sm:$0xff]  ;;  %v8001_v33 = vsub.f32 %v5127_v57, %v5147_v58  ;;  %v8002_v18 = vld [vmem:[#allocation21_spill] sm:$0xff]  ;;  %v2438_v45 = vadd.f32 %v2437_v11, %v1884_v21  ;;  %v1499_v17 = vsub.f32 %v475_v3, %v987_v28 }
 0x204   :  { %v1888_v22 = vand.u32 2147483647, %v7991_v19  ;;  %8000 = vst [vmem:[#allocation127_spill] sm:$0xff] %v5801_v40  ;;  %v8003_v43 = vld [vmem:[#allocation20_spill] sm:$0xff]  ;;  %v2565_v19 = vadd.f32 %v2564_v24, %v1885_v50  ;;  %v8005_v7 = vld [vmem:[#allocation41_spill] sm:$0xff]  ;;  %v8006_v20 = vld [vmem:[#allocation26_spill] sm:$0xff]  ;;  %v2341_v57 = vadd.f32 %v2340_v1, %v2003_v59 }
 0x205   :  { %v1892_v25 = vand.u32 2147483647, %v7999_v35  ;;  %v1893_v52 = vand.u32 2147483647, %v8001_v33  ;;  %v8004_v8 = vsub.f32 %v8002_v18, %v8003_v43  ;;  %v8007_v26 = vsub.f32 %v8005_v7, %v8006_v20  ;;  %v5812_v62 = vld [vmem:[#allocation3 + $0xcd0] sm:$0xff]  ;;  %v479_v35 = vld [vmem:[#allocation3 + $0xd08] sm:$0xff] }
 0x206   :  { %v2006_v54 = vand.u32 2147483647, %v1494_v10  ;;  %v2007_v61 = vand.u32 2147483647, %v1495_v39  ;;  %8008 = vst [vmem:[#allocation162_spill] sm:$0xff] %v5812_v62  ;;  %v991_v15 = vld [vmem:[#allocation6 + $0xd08] sm:$0xff]  ;;  %v2439_v58 = vadd.f32 %v2438_v45, %v1888_v22  ;;  %v2566_v33 = vadd.f32 %v2565_v19, %v1889_v60 }
 0x207   :  { %v1896_v32 = vand.u32 2147483647, %v8004_v8  ;;  %v1897_v41 = vand.u32 2147483647, %v8007_v26  ;;  %v5814_v29 = vld [vmem:[#allocation3 + $0xcd8] sm:$0xff]  ;;  %v482_v18 = vld [vmem:[#allocation3 + $0xd20] sm:$0xff]  ;;  %v1502_v10 = vsub.f32 %v478_v34, %v990_v23  ;;  %v1503_v26 = vsub.f32 %v479_v35, %v991_v15 }
 0x208   :  { %8009 = vst [vmem:[#allocation164_spill] sm:$0xff] %v5814_v29  ;;  %v5816_v21 = vld [vmem:[#allocation6 + $0xcd0] sm:$0xff]  ;;  %v8011_v50 = vld [vmem:[#allocation16_spill] sm:$0xff]  ;;  %v5825_v27 = vld [vmem:[#allocation6 + $0xcd8] sm:$0xff]  ;;  %v2440_v7 = vadd.f32 %v2439_v58, %v1892_v25  ;;  %v2567_v20 = vadd.f32 %v2566_v33, %v1893_v52  ;;  %v2215_v47 = vadd.f32 %v2214_v36, %v2006_v54 }
 0x209   :  { %8010 = vst [vmem:[#allocation69_spill] sm:$0xff] %v5816_v21  ;;  %v8012_v39 = vld [vmem:[#allocation30_spill] sm:$0xff]  ;;  %8014 = vst [vmem:[#allocation70_spill] sm:$0xff] %v5825_v27  ;;  %v994_v22 = vld [vmem:[#allocation6 + $0xd20] sm:$0xff] }
 0x20a   :  { %v8013_v11 = vsub.f32 %v8011_v50, %v8012_v39  ;;  %v8015_v60 = vld [vmem:[#allocation33_spill] sm:$0xff]  ;;  %v8018_v43 = vld [vmem:[#allocation124_spill] sm:$0xff]  ;;  %v2010_v50 = vand.u32 2147483647, %v1498_v42  ;;  %v2011_v39 = vand.u32 2147483647, %v1499_v17  ;;  %v1506_v52 = vsub.f32 %v482_v18, %v994_v22 }
 0x20b   :  { %v8016_v48 = vld [vmem:[#allocation17_spill] sm:$0xff]  ;;  %v8021_v28 = vld [vmem:[#allocation36_spill] sm:$0xff]  ;;  %v5838_v56 = vld [vmem:[#allocation3 + $0xcf8] sm:$0xff] }
 0x20c   :  { %v1900_v24 = vand.u32 2147483647, %v8013_v11  ;;  %v8017_v59 = vsub.f32 %v8015_v60, %v8016_v48  ;;  %v8019_v8 = vld [vmem:[#allocation37_spill] sm:$0xff]  ;;  %v5836_v11 = vld [vmem:[#allocation3 + $0xcf0] sm:$0xff]  ;;  %v2342_v60 = vadd.f32 %v2341_v57, %v2007_v61  ;;  %v2441_v48 = vadd.f32 %v2440_v7, %v1896_v32  ;;  %8025 = vst [vmem:[#allocation165_spill] sm:$0xff] %v5838_v56  ;;  %v5849_v36 = vld [vmem:[#allocation6 + $0xcf8] sm:$0xff] }
 0x20d   :  { %v8020_v45 = vsub.f32 %v8018_v43, %v8019_v8  ;;  %v8022_v34 = vld [vmem:[#allocation89_spill] sm:$0xff]  ;;  %8024 = vst [vmem:[#allocation38_spill] sm:$0xff] %v5836_v11  ;;  %v486_v43 = vld [vmem:[#allocation3 + $0xd40] sm:$0xff]  ;;  %v5840_v25 = vld [vmem:[#allocation6 + $0xcf0] sm:$0xff]  ;;  %v2216_v21 = vadd.f32 %v2215_v47, %v2010_v50 }
 0x20e   :  { %v1901_v1 = vand.u32 2147483647, %v8017_v59  ;;  %v8023_v23 = vsub.f32 %v8021_v28, %v8022_v34  ;;  %v483_v40 = vld [vmem:[#allocation3 + $0xd28] sm:$0xff]  ;;  %v2568_v59 = vadd.f32 %v2567_v20, %v1897_v41  ;;  %8026 = vst [vmem:[#allocation166_spill] sm:$0xff] %v5840_v25  ;;  %v8027_v17 = vld [vmem:[#allocation106_spill] sm:$0xff]  ;;  %8030 = vst [vmem:[#allocation171_spill] sm:$0xff] %v5849_v36  ;;  %v2442_v20 = vadd.f32 %v2441_v48, %v1900_v24 }
 0x20f   :  { %v1904_v19 = vand.u32 2147483647, %v8020_v45  ;;  %v995_v55 = vld [vmem:[#allocation6 + $0xd28] sm:$0xff]  ;;  %v998_v32 = vld [vmem:[#allocation6 + $0xd40] sm:$0xff]  ;;  %v8032_v54 = vld [vmem:[#allocation58_spill] sm:$0xff] }
 0x210   :  { %v1905_v3 = vand.u32 2147483647, %v8023_v23  ;;  %v8028_v35 = vld [vmem:[#allocation53_spill] sm:$0xff]  ;;  %v8034_v28 = vld [vmem:[#allocation59_spill] sm:$0xff]  ;;  %v2569_v34 = vadd.f32 %v2568_v59, %v1901_v1  ;;  %v1507_v23 = vsub.f32 %v483_v40, %v995_v55  ;;  %v8037_v42 = vld [vmem:[#allocation62_spill] sm:$0xff] }
 0x211   :  { %v8029_v58 = vsub.f32 %v8027_v17, %v8028_v35  ;;  %v8031_v41 = vld [vmem:[#allocation49_spill] sm:$0xff]  ;;  %v8035_v8 = vld [vmem:[#allocation63_spill] sm:$0xff]  ;;  %v2014_v17 = vand.u32 2147483647, %v1502_v10  ;;  %v2015_v35 = vand.u32 2147483647, %v1503_v26  ;;  %v1510_v10 = vsub.f32 %v486_v43, %v998_v32 }
 0x212   :  { %v8033_v61 = vsub.f32 %v8031_v41, %v8032_v54  ;;  %v8036_v45 = vsub.f32 %v8034_v28, %v8035_v8  ;;  %v8038_v18 = vld [vmem:[#allocation97_spill] sm:$0xff]  ;;  %v2343_v41 = vadd.f32 %v2342_v60, %v2011_v39  ;;  %v2443_v54 = vadd.f32 %v2442_v20, %v1904_v19  ;;  %v5862_v62 = vld [vmem:[#allocation3 + $0xd18] sm:$0xff]  ;;  %v490_v28 = vld [vmem:[#allocation3 + $0xd60] sm:$0xff] }
 0x213   :  { %v1908_v33 = vand.u32 2147483647, %v8029_v58  ;;  %v8039_v22 = vsub.f32 %v8037_v42, %v8038_v18  ;;  %v5860_v58 = vld [vmem:[#allocation3 + $0xd10] sm:$0xff]  ;;  %v487_v27 = vld [vmem:[#allocation3 + $0xd48] sm:$0xff]  ;;  %8041 = vst [vmem:[#allocation172_spill] sm:$0xff] %v5862_v62  ;;  %v8043_v1 = vld [vmem:[#allocation72_spill] sm:$0xff]  ;;  %v2217_v25 = vadd.f32 %v2216_v21, %v2014_v17 }
 0x214   :  { %v1909_v57 = vand.u32 2147483647, %v8033_v61  ;;  %v1912_v7 = vand.u32 2147483647, %v8036_v45  ;;  %8040 = vst [vmem:[#allocation167_spill] sm:$0xff] %v5860_v58  ;;  %v999_v29 = vld [vmem:[#allocation6 + $0xd48] sm:$0xff]  ;;  %v2570_v61 = vadd.f32 %v2569_v34, %v1905_v3 }
 0x215   :  { %v1913_v15 = vand.u32 2147483647, %v8039_v22  ;;  %v5864_v24 = vld [vmem:[#allocation6 + $0xd10] sm:$0xff]  ;;  %v8044_v26 = vld [vmem:[#allocation79_spill] sm:$0xff]  ;;  %v1002_v19 = vld [vmem:[#allocation6 + $0xd60] sm:$0xff]  ;;  %v2444_v34 = vadd.f32 %v2443_v54, %v1908_v33  ;;  %v1511_v22 = vsub.f32 %v487_v27, %v999_v29 }
 0x216   :  { %8042 = vst [vmem:[#allocation55_spill] sm:$0xff] %v5864_v24  ;;  %v8045_v48 = vsub.f32 %v8043_v1, %v8044_v26  ;;  %v5873_v47 = vld [vmem:[#allocation6 + $0xd18] sm:$0xff]  ;;  %v8047_v3 = vld [vmem:[#allocation78_spill] sm:$0xff]  ;;  %v8048_v50 = vld [vmem:[#allocation28_spill] sm:$0xff]  ;;  %v2571_v18 = vadd.f32 %v2570_v61, %v1909_v57  ;;  %v2018_v1 = vand.u32 2147483647, %v1506_v52  ;;  %v1514_v52 = vsub.f32 %v490_v28, %v1002_v19 }
 0x217   :  { %8046 = vst [vmem:[#allocation136_spill] sm:$0xff] %v5873_v47  ;;  %v8049_v39 = vsub.f32 %v8047_v3, %v8048_v50  ;;  %v8050_v42 = vld [vmem:[#allocation125_spill] sm:$0xff]  ;;  %v8051_v8 = vld [vmem:[#allocation83_spill] sm:$0xff]  ;;  %v8053_v40 = vld [vmem:[#allocation82_spill] sm:$0xff]  ;;  %v2019_v26 = vand.u32 2147483647, %v1507_v23  ;;  %v2344_v3 = vadd.f32 %v2343_v41, %v2015_v35  ;;  %v2445_v50 = vadd.f32 %v2444_v34, %v1912_v7 }
 0x218   :  { %v1916_v59 = vand.u32 2147483647, %v8045_v48  ;;  %v8052_v45 = vsub.f32 %v8050_v42, %v8051_v8  ;;  %v8054_v43 = vld [vmem:[#allocation90_spill] sm:$0xff]  ;;  %v491_v36 = vld [vmem:[#allocation3 + $0xd68] sm:$0xff]  ;;  %v5886_v11 = vld [vmem:[#allocation3 + $0xd38] sm:$0xff]  ;;  %v2218_v24 = vadd.f32 %v2217_v25, %v2018_v1 }
 0x219   :  { %v1917_v60 = vand.u32 2147483647, %v8049_v39  ;;  %v8055_v32 = vsub.f32 %v8053_v40, %v8054_v43  ;;  %v5884_v48 = vld [vmem:[#allocation3 + $0xd30] sm:$0xff]  ;;  %v1003_v56 = vld [vmem:[#allocation6 + $0xd68] sm:$0xff]  ;;  %v2572_v39 = vadd.f32 %v2571_v18, %v1913_v15  ;;  %8057 = vst [vmem:[#allocation173_spill] sm:$0xff] %v5886_v11  ;;  %v494_v42 = vld [vmem:[#allocation3 + $0xd80] sm:$0xff] }
 0x21a   :  { %v1920_v20 = vand.u32 2147483647, %v8052_v45  ;;  %8056 = vst [vmem:[#allocation60_spill] sm:$0xff] %v5884_v48  ;;  %v5888_v33 = vld [vmem:[#allocation6 + $0xd30] sm:$0xff]  ;;  %v8059_v57 = vld [vmem:[#allocation175_spill] sm:$0xff]  ;;  %v8060_v23 = vld [vmem:[#allocation101_spill] sm:$0xff]  ;;  %v2446_v18 = vadd.f32 %v2445_v50, %v1916_v59 }
 0x21b   :  { %v1921_v55 = vand.u32 2147483647, %v8055_v32  ;;  %8058 = vst [vmem:[#allocation76_spill] sm:$0xff] %v5888_v33  ;;  %v8061_v54 = vsub.f32 %v8059_v57, %v8060_v23  ;;  %v5897_v21 = vld [vmem:[#allocation6 + $0xd38] sm:$0xff]  ;;  %v1006_v7 = vld [vmem:[#allocation6 + $0xd80] sm:$0xff]  ;;  %v8067_v8 = vld [vmem:[#allocation34_spill] sm:$0xff]  ;;  %v2573_v43 = vadd.f32 %v2572_v39, %v1917_v60  ;;  %v1515_v32 = vsub.f32 %v491_v36, %v1003_v56 }
 0x21c   :  { %8062 = vst [vmem:[#allocation77_spill] sm:$0xff] %v5897_v21  ;;  %v8063_v15 = vld [vmem:[#allocation100_spill] sm:$0xff]  ;;  %v8069_v27 = vld [vmem:[#allocation122_spill] sm:$0xff]  ;;  %v8070_v28 = vld [vmem:[#allocation123_spill] sm:$0xff]  ;;  %v2022_v57 = vand.u32 2147483647, %v1510_v10  ;;  %v1518_v10 = vsub.f32 %v494_v42, %v1006_v7 }
 0x21d   :  { %v1924_v61 = vand.u32 2147483647, %v8061_v54  ;;  %v8064_v17 = vld [vmem:[#allocation188_spill] sm:$0xff]  ;;  %v8071_v19 = vsub.f32 %v8069_v27, %v8070_v28  ;;  %v2023_v23 = vand.u32 2147483647, %v1511_v22  ;;  %v5908_v54 = vld [vmem:[#allocation3 + $0xd50] sm:$0xff] }
 0x21e   :  { %v8065_v35 = vsub.f32 %v8063_v15, %v8064_v17  ;;  %v8066_v40 = vld [vmem:[#allocation108_spill] sm:$0xff]  ;;  %8072 = vst [vmem:[#allocation44_spill] sm:$0xff] %v5908_v54  ;;  %v495_v47 = vld [vmem:[#allocation3 + $0xd88] sm:$0xff]  ;;  %v2345_v15 = vadd.f32 %v2344_v3, %v2019_v26  ;;  %v2447_v17 = vadd.f32 %v2446_v18, %v1920_v20  ;;  %v5910_v58 = vld [vmem:[#allocation3 + $0xd58] sm:$0xff]  ;;  %v2219_v33 = vadd.f32 %v2218_v24, %v2022_v57 }
 0x21f   :  { %v8068_v45 = vsub.f32 %v8066_v40, %v8067_v8  ;;  %v1929_v29 = vand.u32 2147483647, %v8071_v19  ;;  %v1007_v62 = vld [vmem:[#allocation6 + $0xd88] sm:$0xff]  ;;  %8073 = vst [vmem:[#allocation142_spill] sm:$0xff] %v5910_v58  ;;  %v498_v40 = vld [vmem:[#allocation3 + $0xda0] sm:$0xff]  ;;  %v5912_v59 = vld [vmem:[#allocation6 + $0xd50] sm:$0xff] }
 0x220   :  { %v1925_v41 = vand.u32 2147483647, %v8065_v35  ;;  %v2574_v35 = vadd.f32 %v2573_v43, %v1921_v55  ;;  %8074 = vst [vmem:[#allocation140_spill] sm:$0xff] %v5912_v59  ;;  %v8075_v60 = vld [vmem:[#allocation25_spill] sm:$0xff]  ;;  %v8076_v22 = vld [vmem:[#allocation39_spill] sm:$0xff]  ;;  %v1010_v20 = vld [vmem:[#allocation6 + $0xda0] sm:$0xff]  ;;  %v2448_v43 = vadd.f32 %v2447_v17, %v1924_v61  ;;  %v1519_v19 = vsub.f32 %v495_v47, %v1007_v62 }
 0x221   :  { %v1928_v34 = vand.u32 2147483647, %v8068_v45  ;;  %v8077_v50 = vsub.f32 %v8075_v60, %v8076_v22  ;;  %v5921_v25 = vld [vmem:[#allocation6 + $0xd58] sm:$0xff]  ;;  %v8079_v55 = vld [vmem:[#allocation200_spill] sm:$0xff]  ;;  %v8080_v1 = vld [vmem:[#allocation46_spill] sm:$0xff] }
 0x222   :  { %8078 = vst [vmem:[#allocation145_spill] sm:$0xff] %v5921_v25  ;;  %v8081_v26 = vsub.f32 %v8079_v55, %v8080_v1  ;;  %v8082_v27 = vld [vmem:[#allocation45_spill] sm:$0xff]  ;;  %v8083_v8 = vld [vmem:[#allocation128_spill] sm:$0xff]  ;;  %v2575_v28 = vadd.f32 %v2574_v35, %v1925_v41  ;;  %v8085_v36 = vld [vmem:[#allocation130_spill] sm:$0xff]  ;;  %v2026_v60 = vand.u32 2147483647, %v1514_v52  ;;  %v2346_v55 = vadd.f32 %v2345_v15, %v2023_v23 }
 0x223   :  { %v1932_v39 = vand.u32 2147483647, %v8077_v50  ;;  %v8084_v45 = vsub.f32 %v8082_v27, %v8083_v8  ;;  %v8086_v42 = vld [vmem:[#allocation132_spill] sm:$0xff]  ;;  %v2027_v22 = vand.u32 2147483647, %v1515_v32  ;;  %v5932_v50 = vld [vmem:[#allocation3 + $0xd70] sm:$0xff]  ;;  %v2449_v1 = vadd.f32 %v2448_v43, %v1928_v34 }
 0x224   :  { %v1933_v3 = vand.u32 2147483647, %v8081_v26  ;;  %v8087_v7 = vsub.f32 %v8085_v36, %v8086_v42  ;;  %8088 = vst [vmem:[#allocation85_spill] sm:$0xff] %v5932_v50  ;;  %v499_v21 = vld [vmem:[#allocation3 + $0xda8] sm:$0xff]  ;;  %v2576_v26 = vadd.f32 %v2575_v28, %v1929_v29  ;;  %v5934_v48 = vld [vmem:[#allocation3 + $0xd78] sm:$0xff]  ;;  %v502_v27 = vld [vmem:[#allocation3 + $0xdc0] sm:$0xff]  ;;  %v1522_v52 = vsub.f32 %v498_v40, %v1010_v20 }
 0x225   :  { %v1936_v18 = vand.u32 2147483647, %v8084_v45  ;;  %v1011_v11 = vld [vmem:[#allocation6 + $0xda8] sm:$0xff]  ;;  %8089 = vst [vmem:[#allocation176_spill] sm:$0xff] %v5934_v48  ;;  %v5936_v61 = vld [vmem:[#allocation6 + $0xd70] sm:$0xff]  ;;  %v8092_v32 = vld [vmem:[#allocation40_spill] sm:$0xff]  ;;  %v2450_v28 = vadd.f32 %v2449_v1, %v1932_v39  ;;  %v2220_v59 = vadd.f32 %v2219_v33, %v2026_v60 }
 0x226   :  { %v1937_v56 = vand.u32 2147483647, %v8087_v7  ;;  %8090 = vst [vmem:[#allocation73_spill] sm:$0xff] %v5936_v61  ;;  %v8091_v41 = vld [vmem:[#allocation129_spill] sm:$0xff]  ;;  %v5945_v24 = vld [vmem:[#allocation6 + $0xd78] sm:$0xff]  ;;  %v1014_v34 = vld [vmem:[#allocation6 + $0xdc0] sm:$0xff]  ;;  %v2577_v42 = vadd.f32 %v2576_v26, %v1933_v3  ;;  %v1523_v7 = vsub.f32 %v499_v21, %v1011_v11 }
 0x227   :  { %v8093_v17 = vsub.f32 %v8091_v41, %v8092_v32  ;;  %8094 = vst [vmem:[#allocation177_spill] sm:$0xff] %v5945_v24  ;;  %v8095_v29 = vld [vmem:[#allocation133_spill] sm:$0xff]  ;;  %v8098_v36 = vld [vmem:[#allocation131_spill] sm:$0xff]  ;;  %v8099_v8 = vld [vmem:[#allocation54_spill] sm:$0xff]  ;;  %v2030_v41 = vand.u32 2147483647, %v1518_v10  ;;  %v1526_v10 = vsub.f32 %v502_v27, %v1014_v34 }
 0x228   :  { %v8096_v57 = vld [vmem:[#allocation65_spill] sm:$0xff]  ;;  %v8100_v45 = vsub.f32 %v8098_v36, %v8099_v8  ;;  %v8101_v47 = vld [vmem:[#allocation134_spill] sm:$0xff]  ;;  %v2031_v32 = vand.u32 2147483647, %v1519_v19  ;;  %v5958_v54 = vld [vmem:[#allocation3 + $0xd98] sm:$0xff] }
 0x229   :  { %v1940_v35 = vand.u32 2147483647, %v8093_v17  ;;  %v8097_v23 = vsub.f32 %v8095_v29, %v8096_v57  ;;  %v8102_v40 = vld [vmem:[#allocation137_spill] sm:$0xff]  ;;  %v5956_v17 = vld [vmem:[#allocation3 + $0xd90] sm:$0xff]  ;;  %v2347_v29 = vadd.f32 %v2346_v55, %v2027_v22  ;;  %v2451_v57 = vadd.f32 %v2450_v28, %v1936_v18  ;;  %8105 = vst [vmem:[#allocation178_spill] sm:$0xff] %v5958_v54  ;;  %v506_v36 = vld [vmem:[#allocation3 + $0xde0] sm:$0xff] }
 0x22a   :  { %v1944_v43 = vand.u32 2147483647, %v8100_v45  ;;  %v8103_v20 = vsub.f32 %v8101_v47, %v8102_v40  ;;  %8104 = vst [vmem:[#allocation147_spill] sm:$0xff] %v5956_v17  ;;  %v503_v25 = vld [vmem:[#allocation3 + $0xdc8] sm:$0xff]  ;;  %v5960_v39 = vld [vmem:[#allocation6 + $0xd90] sm:$0xff]  ;;  %v8108_v19 = vld [vmem:[#allocation75_spill] sm:$0xff]  ;;  %v2221_v61 = vadd.f32 %v2220_v59, %v2030_v41 }
 0x22b   :  { %v1941_v15 = vand.u32 2147483647, %v8097_v23  ;;  %v1015_v58 = vld [vmem:[#allocation6 + $0xdc8] sm:$0xff]  ;;  %v2578_v23 = vadd.f32 %v2577_v42, %v1937_v56  ;;  %8106 = vst [vmem:[#allocation68_spill] sm:$0xff] %v5960_v39  ;;  %v8107_v3 = vld [vmem:[#allocation66_spill] sm:$0xff]  ;;  %v5969_v33 = vld [vmem:[#allocation6 + $0xd98] sm:$0xff]  ;;  %v2452_v42 = vadd.f32 %v2451_v57, %v1940_v35 }
 0x22c   :  { %v1945_v62 = vand.u32 2147483647, %v8103_v20  ;;  %v8109_v1 = vsub.f32 %v8107_v3, %v8108_v19  ;;  %8110 = vst [vmem:[#allocation84_spill] sm:$0xff] %v5969_v33  ;;  %v1018_v18 = vld [vmem:[#allocation6 + $0xde0] sm:$0xff]  ;;  %v8111_v56 = vld [vmem:[#allocation139_spill] sm:$0xff]  ;;  %v8114_v47 = vld [vmem:[#allocation138_spill] sm:$0xff]  ;;  %v1527_v20 = vsub.f32 %v503_v25, %v1015_v58 }
 0x22d   :  { %v8112_v60 = vld [vmem:[#allocation143_spill] sm:$0xff]  ;;  %v8115_v8 = vld [vmem:[#allocation50_spill] sm:$0xff]  ;;  %v2579_v40 = vadd.f32 %v2578_v23, %v1941_v15  ;;  %v8117_v21 = vld [vmem:[#allocation144_spill] sm:$0xff]  ;;  %v2034_v3 = vand.u32 2147483647, %v1522_v52  ;;  %v1530_v52 = vsub.f32 %v506_v36, %v1018_v18 }
 0x22e   :  { %v1948_v26 = vand.u32 2147483647, %v8109_v1  ;;  %v8113_v22 = vsub.f32 %v8111_v56, %v8112_v60  ;;  %v8116_v45 = vsub.f32 %v8114_v47, %v8115_v8  ;;  %v8118_v27 = vld [vmem:[#allocation51_spill] sm:$0xff]  ;;  %v2035_v19 = vand.u32 2147483647, %v1523_v7  ;;  %v5980_v1 = vld [vmem:[#allocation3 + $0xdb0] sm:$0xff] }
 0x22f   :  { %v8119_v34 = vsub.f32 %v8117_v21, %v8118_v27  ;;  %8120 = vst [vmem:[#allocation81_spill] sm:$0xff] %v5980_v1  ;;  %v507_v24 = vld [vmem:[#allocation3 + $0xde8] sm:$0xff]  ;;  %v2348_v56 = vadd.f32 %v2347_v29, %v2031_v32  ;;  %v2453_v60 = vadd.f32 %v2452_v42, %v1944_v43  ;;  %v5982_v50 = vld [vmem:[#allocation3 + $0xdb8] sm:$0xff]  ;;  %v510_v47 = vld [vmem:[#allocation3 + $0xe00] sm:$0xff]  ;;  %v2222_v39 = vadd.f32 %v2221_v61, %v2034_v3 }
 0x230   :  { %v1949_v55 = vand.u32 2147483647, %v8113_v22  ;;  %v1952_v28 = vand.u32 2147483647, %v8116_v45  ;;  %v1019_v48 = vld [vmem:[#allocation6 + $0xde8] sm:$0xff]  ;;  %v2580_v22 = vadd.f32 %v2579_v40, %v1945_v62  ;;  %8121 = vst [vmem:[#allocation179_spill] sm:$0xff] %v5982_v50 }
 0x231   :  { %v1953_v11 = vand.u32 2147483647, %v8119_v34  ;;  %v5984_v35 = vld [vmem:[#allocation6 + $0xdb0] sm:$0xff]  ;;  %v8123_v15 = vld [vmem:[#allocation80_spill] sm:$0xff]  ;;  %v5993_v59 = vld [vmem:[#allocation6 + $0xdb8] sm:$0xff]  ;;  %v2454_v40 = vadd.f32 %v2453_v60, %v1948_v26  ;;  %v1531_v34 = vsub.f32 %v507_v24, %v1019_v48 }
 0x232   :  { %8122 = vst [vmem:[#allocation180_spill] sm:$0xff] %v5984_v35  ;;  %v8124_v7 = vld [vmem:[#allocation86_spill] sm:$0xff]  ;;  %8126 = vst [vmem:[#allocation182_spill] sm:$0xff] %v5993_v59  ;;  %v1022_v43 = vld [vmem:[#allocation6 + $0xe00] sm:$0xff]  ;;  %v2581_v27 = vadd.f32 %v2580_v22, %v1949_v55 }
 0x233   :  { %v8125_v57 = vsub.f32 %v8123_v15, %v8124_v7  ;;  %v8127_v62 = vld [vmem:[#allocation74_spill] sm:$0xff]  ;;  %v8128_v41 = vld [vmem:[#allocation148_spill] sm:$0xff]  ;;  %v8133_v25 = vld [vmem:[#allocation149_spill] sm:$0xff]  ;;  %v2038_v15 = vand.u32 2147483647, %v1526_v10  ;;  %v1534_v10 = vsub.f32 %v510_v47, %v1022_v43 }
 0x234   :  { %v8129_v32 = vsub.f32 %v8127_v62, %v8128_v41  ;;  %v8130_v21 = vld [vmem:[#allocation146_spill] sm:$0xff]  ;;  %v8131_v8 = vld [vmem:[#allocation88_spill] sm:$0xff]  ;;  %v2039_v7 = vand.u32 2147483647, %v1527_v20  ;;  %v511_v33 = vld [vmem:[#allocation3 + $0xe08] sm:$0xff]  ;;  %v2349_v62 = vadd.f32 %v2348_v56, %v2035_v19  ;;  %v2455_v41 = vadd.f32 %v2454_v40, %v1952_v28 }
 0x235   :  { %v1956_v23 = vand.u32 2147483647, %v8125_v57  ;;  %v8132_v45 = vsub.f32 %v8130_v21, %v8131_v8  ;;  %v8134_v36 = vld [vmem:[#allocation56_spill] sm:$0xff]  ;;  %v6004_v57 = vld [vmem:[#allocation3 + $0xdd0] sm:$0xff]  ;;  %v1023_v54 = vld [vmem:[#allocation6 + $0xe08] sm:$0xff]  ;;  %v2223_v35 = vadd.f32 %v2222_v39, %v2038_v15 }
 0x236   :  { %v1957_v29 = vand.u32 2147483647, %v8129_v32  ;;  %v8135_v18 = vsub.f32 %v8133_v25, %v8134_v36  ;;  %v2582_v32 = vadd.f32 %v2581_v27, %v1953_v11  ;;  %v6006_v17 = vld [vmem:[#allocation3 + $0xdd8] sm:$0xff]  ;;  %v514_v21 = vld [vmem:[#allocation3 + $0xe20] sm:$0xff]  ;;  %v6008_v26 = vld [vmem:[#allocation6 + $0xdd0] sm:$0xff] }
 0x237   :  { %v1960_v42 = vand.u32 2147483647, %v8132_v45  ;;  %8136 = vst [vmem:[#allocation181_spill] sm:$0xff] %v6006_v17  ;;  %8137 = vst [vmem:[#allocation183_spill] sm:$0xff] %v6008_v26  ;;  %v8138_v55 = vld [vmem:[#allocation102_spill] sm:$0xff]  ;;  %v8139_v20 = vld [vmem:[#allocation103_spill] sm:$0xff]  ;;  %v2456_v27 = vadd.f32 %v2455_v41, %v1956_v23 }
 0x238   :  { %v1961_v58 = vand.u32 2147483647, %v8135_v18  ;;  %v8140_v60 = vsub.f32 %v8138_v55, %v8139_v20  ;;  %v6017_v61 = vld [vmem:[#allocation6 + $0xdd8] sm:$0xff]  ;;  %v1026_v28 = vld [vmem:[#allocation6 + $0xe20] sm:$0xff]  ;;  %v8145_v25 = vld [vmem:[#allocation42_spill] sm:$0xff]  ;;  %v2583_v36 = vadd.f32 %v2582_v32, %v1957_v29  ;;  %v1535_v18 = vsub.f32 %v511_v33, %v1023_v54 }
 0x239   :  { %8141 = vst [vmem:[#allocation96_spill] sm:$0xff] %v6017_v61  ;;  %v8142_v11 = vld [vmem:[#allocation95_spill] sm:$0xff]  ;;  %v8146_v8 = vld [vmem:[#allocation57_spill] sm:$0xff]  ;;  %v2042_v55 = vand.u32 2147483647, %v1530_v52  ;;  %v6032_v23 = vld [vmem:[#allocation6 + $0xdf0] sm:$0xff]  ;;  %v1538_v52 = vsub.f32 %v514_v21, %v1026_v28 }
 0x23a   :  { %v1964_v22 = vand.u32 2147483647, %v8140_v60  ;;  %v8143_v3 = vld [vmem:[#allocation107_spill] sm:$0xff]  ;;  %v8147_v45 = vsub.f32 %v8145_v25, %v8146_v8  ;;  %v2043_v20 = vand.u32 2147483647, %v1531_v34  ;;  %v6028_v60 = vld [vmem:[#allocation3 + $0xdf0] sm:$0xff] }
 0x23b   :  { %v8144_v19 = vsub.f32 %v8142_v11, %v8143_v3  ;;  %v8148_v24 = vld [vmem:[#allocation43_spill] sm:$0xff]  ;;  %v515_v59 = vld [vmem:[#allocation3 + $0xe28] sm:$0xff]  ;;  %v2350_v11 = vadd.f32 %v2349_v62, %v2039_v7  ;;  %v2457_v3 = vadd.f32 %v2456_v27, %v1960_v42  ;;  %v518_v25 = vld [vmem:[#allocation3 + $0xe40] sm:$0xff]  ;;  %v2224_v17 = vadd.f32 %v2223_v35, %v2042_v55 }
 0x23c   :  { %v1968_v40 = vand.u32 2147483647, %v8147_v45  ;;  %v8149_v47 = vld [vmem:[#allocation151_spill] sm:$0xff]  ;;  %v1027_v50 = vld [vmem:[#allocation6 + $0xe28] sm:$0xff]  ;;  %v8151_v29 = vld [vmem:[#allocation154_spill] sm:$0xff] }
 0x23d   :  { %v1965_v56 = vand.u32 2147483647, %v8144_v19  ;;  %v8150_v43 = vsub.f32 %v8148_v24, %v8149_v47  ;;  %v2584_v19 = vadd.f32 %v2583_v36, %v1961_v58  ;;  %v6030_v1 = vld [vmem:[#allocation3 + $0xdf8] sm:$0xff]  ;;  %v8152_v34 = vsub.f32 %v5596_v63, %v8151_v29  ;;  %v1030_v42 = vld [vmem:[#allocation6 + $0xe40] sm:$0xff]  ;;  %v8157_v24 = vld [vmem:[#allocation157_spill] sm:$0xff] }
 0x23e   :  { %v6041_v39 = vld [vmem:[#allocation6 + $0xdf8] sm:$0xff]  ;;  %v8153_v58 = vld [vmem:[#allocation112_spill] sm:$0xff]  ;;  %v2458_v27 = vadd.f32 %v2457_v3, %v1964_v22  ;;  %v1539_v47 = vsub.f32 %v515_v59, %v1027_v50  ;;  %v8160_v21 = vld [vmem:[#allocation61_spill] sm:$0xff]  ;;  %v2046_v63 = vand.u32 2147483647, %v1534_v10  ;;  %v1542_v10 = vsub.f32 %v518_v25, %v1030_v42 }
 0x23f   :  { %v1969_v48 = vand.u32 2147483647, %v8150_v43  ;;  %v1972_v41 = vand.u32 2147483647, %v8152_v34  ;;  %v8154_v15 = vld [vmem:[#allocation152_spill] sm:$0xff]  ;;  %v2585_v36 = vadd.f32 %v2584_v19, %v1965_v56  ;;  %v8159_v43 = vld [vmem:[#allocation153_spill] sm:$0xff]  ;;  %v8162_v56 = vsub.f32 %v5644_v5, %v5648_v6 }
 0x240   :  { %v8155_v7 = vsub.f32 %v8153_v58, %v8154_v15  ;;  %v8156_v32 = vld [vmem:[#allocation156_spill] sm:$0xff]  ;;  %v8161_v28 = vsub.f32 %v8159_v43, %v8160_v21  ;;  %v2047_v29 = vand.u32 2147483647, %v1535_v18  ;;  %v6052_v34 = vld [vmem:[#allocation3 + $0xe10] sm:$0xff]  ;;  %v519_v54 = vld [vmem:[#allocation3 + $0xe48] sm:$0xff]  ;;  %v2351_v58 = vadd.f32 %v2350_v11, %v2043_v20 }
 0x241   :  { %v8158_v8 = vsub.f32 %v8156_v32, %v8157_v24  ;;  %v1031_v61 = vld [vmem:[#allocation6 + $0xe48] sm:$0xff]  ;;  %v2459_v15 = vadd.f32 %v2458_v27, %v1968_v40  ;;  %v6054_v26 = vld [vmem:[#allocation3 + $0xe18] sm:$0xff]  ;;  %v522_v32 = vld [vmem:[#allocation3 + $0xe60] sm:$0xff]  ;;  %v1980_v18 = vand.u32 2147483647, %v8162_v56  ;;  %v8164_v20 = vsub.f32 %v5668_v14, %v5672_v51 }
 0x242   :  { %v1973_v62 = vand.u32 2147483647, %v8155_v7  ;;  %v1977_v33 = vand.u32 2147483647, %v8161_v28  ;;  %v2586_v7 = vadd.f32 %v2585_v36, %v1969_v48  ;;  %v6056_v22 = vld [vmem:[#allocation6 + $0xe10] sm:$0xff]  ;;  %v6065_v35 = vld [vmem:[#allocation6 + $0xe18] sm:$0xff]  ;;  %v8163_v48 = vsub.f32 %v5646_v31, %v5657_v9 }
 0x243   :  { %v1976_v45 = vand.u32 2147483647, %v8158_v8  ;;  %v1034_v40 = vld [vmem:[#allocation6 + $0xe60] sm:$0xff]  ;;  %v1984_v11 = vand.u32 2147483647, %v8164_v20  ;;  %v2460_v3 = vadd.f32 %v2459_v15, %v1972_v41  ;;  %v1543_v24 = vsub.f32 %v519_v54, %v1031_v61  ;;  %v6076_v27 = vld [vmem:[#allocation3 + $0xe30] sm:$0xff] }
 0x244   :  { %v1981_v55 = vand.u32 2147483647, %v8163_v48  ;;  %v2587_v19 = vadd.f32 %v2586_v7, %v1973_v62  ;;  %v8165_v25 = vld [vmem:[#allocation64_spill] sm:$0xff]  ;;  %v2050_v5 = vand.u32 2147483647, %v1538_v52  ;;  %v523_v36 = vld [vmem:[#allocation3 + $0xe68] sm:$0xff]  ;;  %v2225_v21 = vadd.f32 %v2224_v17, %v2046_v63 }
 0x245   :  { %v8166_v42 = vsub.f32 %v5670_v2, %v8165_v25  ;;  %v2051_v6 = vand.u32 2147483647, %v1539_v47  ;;  %v1035_v43 = vld [vmem:[#allocation6 + $0xe68] sm:$0xff]  ;;  %v2352_v31 = vadd.f32 %v2351_v58, %v2047_v29  ;;  %v2461_v9 = vadd.f32 %v2460_v3, %v1976_v45  ;;  %v6078_v56 = vld [vmem:[#allocation3 + $0xe38] sm:$0xff]  ;;  %v526_v14 = vld [vmem:[#allocation3 + $0xe80] sm:$0xff] }
 0x246   :  { %v2588_v28 = vadd.f32 %v2587_v19, %v1977_v33  ;;  %v6080_v51 = vld [vmem:[#allocation6 + $0xe30] sm:$0xff]  ;;  %v1546_v54 = vsub.f32 %v522_v32, %v1034_v40  ;;  %v8167_v52 = vsub.f32 %v5692_v38, %v5696_v44  ;;  %v6089_v17 = vld [vmem:[#allocation6 + $0xe38] sm:$0xff]  ;;  %v1038_v62 = vld [vmem:[#allocation6 + $0xe80] sm:$0xff]  ;;  %v8168_v33 = vsub.f32 %v5694_v12, %v5705_v13 }
 0x247   :  { %v1985_v8 = vand.u32 2147483647, %v8166_v42  ;;  %v8169_v47 = vsub.f32 %v5716_v0, %v5720_v30  ;;  %v2462_v29 = vadd.f32 %v2461_v9, %v1980_v18  ;;  %v1547_v15 = vsub.f32 %v523_v36, %v1035_v43  ;;  %v6100_v40 = vld [vmem:[#allocation3 + $0xe50] sm:$0xff]  ;;  %v527_v48 = vld [vmem:[#allocation3 + $0xe88] sm:$0xff]  ;;  %v6102_v25 = vld [vmem:[#allocation3 + $0xe58] sm:$0xff] }
 0x248   :  { %v1988_v41 = vand.u32 2147483647, %v8167_v52  ;;  %v1989_v45 = vand.u32 2147483647, %v8168_v33  ;;  %v2589_v58 = vadd.f32 %v2588_v28, %v1981_v55  ;;  %v8170_v7 = vsub.f32 %v5718_v37, %v5729_v49  ;;  %v1039_v20 = vld [vmem:[#allocation6 + $0xe88] sm:$0xff]  ;;  %v530_v0 = vld [vmem:[#allocation3 + $0xea0] sm:$0xff] }
 0x249   :  { %v1992_v63 = vand.u32 2147483647, %v8169_v47  ;;  %v2054_v38 = vand.u32 2147483647, %v1542_v10  ;;  %v2055_v44 = vand.u32 2147483647, %v1543_v24  ;;  %v2226_v3 = vadd.f32 %v2225_v21, %v2050_v5 }
 0x24a   :  { %v1993_v32 = vand.u32 2147483647, %v8170_v7  ;;  %v2353_v12 = vadd.f32 %v2352_v31, %v2051_v6  ;;  %v2463_v13 = vadd.f32 %v2462_v29, %v1984_v11  ;;  %v2590_v19 = vadd.f32 %v2589_v58, %v1985_v8  ;;  %v6104_v30 = vld [vmem:[#allocation6 + $0xe50] sm:$0xff]  ;;  %v6113_v42 = vld [vmem:[#allocation6 + $0xe58] sm:$0xff]  ;;  %v1042_v11 = vld [vmem:[#allocation6 + $0xea0] sm:$0xff] }
 0x24b   :  { %v1550_v49 = vsub.f32 %v526_v14, %v1038_v62  ;;  %v8171_v10 = vld [vmem:[#allocation114_spill] sm:$0xff]  ;;  %v8173_v8 = vld [vmem:[#allocation155_spill] sm:$0xff]  ;;  %v8176_v43 = vsub.f32 %v5764_v46, %v5768_v16  ;;  %v1551_v28 = vsub.f32 %v527_v48, %v1039_v20  ;;  %v8177_v14 = vld [vmem:[#allocation160_spill] sm:$0xff]  ;;  %v2059_v33 = vand.u32 2147483647, %v1547_v15 }
 0x24c   :  { %v8172_v55 = vsub.f32 %v5740_v53, %v8171_v10  ;;  %v8174_v5 = vld [vmem:[#allocation119_spill] sm:$0xff]  ;;  %v2464_v31 = vadd.f32 %v2463_v13, %v1988_v41  ;;  %v2591_v9 = vadd.f32 %v2590_v19, %v1989_v45  ;;  %v8178_v52 = vsub.f32 %v5766_v4, %v8177_v14  ;;  %v6124_v47 = vld [vmem:[#allocation3 + $0xe70] sm:$0xff]  ;;  %v531_v29 = vld [vmem:[#allocation3 + $0xea8] sm:$0xff] }
 0x24d   :  { %v8175_v6 = vsub.f32 %v8173_v8, %v8174_v5  ;;  %v2000_v21 = vand.u32 2147483647, %v8176_v43  ;;  %v2058_v53 = vand.u32 2147483647, %v1546_v54  ;;  %v1043_v58 = vld [vmem:[#allocation6 + $0xea8] sm:$0xff]  ;;  %v2227_v7 = vadd.f32 %v2226_v3, %v2054_v38  ;;  %v6126_v5 = vld [vmem:[#allocation3 + $0xe78] sm:$0xff] }
 0x24e   :  { %v1996_v24 = vand.u32 2147483647, %v8172_v55  ;;  %v2001_v62 = vand.u32 2147483647, %v8178_v52  ;;  %v2354_v10 = vadd.f32 %v2353_v12, %v2055_v44  ;;  %v2465_v55 = vadd.f32 %v2464_v31, %v1992_v63  ;;  %v534_v46 = vld [vmem:[#allocation3 + $0xec0] sm:$0xff]  ;;  %v6128_v16 = vld [vmem:[#allocation6 + $0xe70] sm:$0xff] }
 0x24f   :  { %v1997_v36 = vand.u32 2147483647, %v8175_v6  ;;  %v2592_v8 = vadd.f32 %v2591_v9, %v1993_v32  ;;  %v1554_v54 = vsub.f32 %v530_v0, %v1042_v11  ;;  %v8179_v45 = vld [vmem:[#allocation158_spill] sm:$0xff]  ;;  %v8180_v15 = vld [vmem:[#allocation161_spill] sm:$0xff]  ;;  %v6137_v38 = vld [vmem:[#allocation6 + $0xe78] sm:$0xff]  ;;  %v1555_v14 = vsub.f32 %v531_v29, %v1043_v58 }
 0x250   :  { %v8181_v48 = vsub.f32 %v8179_v45, %v8180_v15  ;;  %8182 = vst [vmem:[#allocation186_spill] sm:$0xff] %v6137_v38  ;;  %v1046_v63 = vld [vmem:[#allocation6 + $0xec0] sm:$0xff]  ;;  %v8183_v32 = vld [vmem:[#allocation163_spill] sm:$0xff]  ;;  %v8186_v13 = vld [vmem:[#allocation162_spill] sm:$0xff]  ;;  %v2466_v31 = vadd.f32 %v2465_v55, %v1996_v24  ;;  %v2062_v45 = vand.u32 2147483647, %v1550_v49  ;;  %v2228_v18 = vadd.f32 %v2227_v7, %v2058_v53 }
 0x251   :  { %v8184_v44 = vld [vmem:[#allocation127_spill] sm:$0xff]  ;;  %v8187_v19 = vld [vmem:[#allocation69_spill] sm:$0xff]  ;;  %v2593_v9 = vadd.f32 %v2592_v8, %v1997_v36  ;;  %v8189_v52 = vld [vmem:[#allocation164_spill] sm:$0xff]  ;;  %v2063_v15 = vand.u32 2147483647, %v1551_v28  ;;  %v1558_v28 = vsub.f32 %v534_v46, %v1046_v63 }
 0x252   :  { %v2004_v20 = vand.u32 2147483647, %v8181_v48  ;;  %v8185_v3 = vsub.f32 %v8183_v32, %v8184_v44  ;;  %v8188_v6 = vsub.f32 %v8186_v13, %v8187_v19  ;;  %v8190_v0 = vld [vmem:[#allocation70_spill] sm:$0xff]  ;;  %v535_v41 = vld [vmem:[#allocation3 + $0xec8] sm:$0xff]  ;;  %v2355_v32 = vadd.f32 %v2354_v10, %v2059_v33  ;;  %v6150_v2 = vld [vmem:[#allocation3 + $0xe98] sm:$0xff] }
 0x253   :  { %v8191_v11 = vsub.f32 %v8189_v52, %v8190_v0  ;;  %v6148_v48 = vld [vmem:[#allocation3 + $0xe90] sm:$0xff]  ;;  %v1047_v37 = vld [vmem:[#allocation6 + $0xec8] sm:$0xff]  ;;  %v2467_v44 = vadd.f32 %v2466_v31, %v2000_v21  ;;  %8193 = vst [vmem:[#allocation187_spill] sm:$0xff] %v6150_v2  ;;  %v538_v13 = vld [vmem:[#allocation3 + $0xee0] sm:$0xff]  ;;  %v2229_v50 = vadd.f32 %v2228_v18, %v2062_v45 }
 0x254   :  { %v2005_v12 = vand.u32 2147483647, %v8185_v3  ;;  %v2008_v43 = vand.u32 2147483647, %v8188_v6  ;;  %8192 = vst [vmem:[#allocation150_spill] sm:$0xff] %v6148_v48  ;;  %v2594_v3 = vadd.f32 %v2593_v9, %v2001_v62  ;;  %v6152_v24 = vld [vmem:[#allocation6 + $0xe90] sm:$0xff] }
 0x255   :  { %v2009_v4 = vand.u32 2147483647, %v8191_v11  ;;  %8194 = vst [vmem:[#allocation91_spill] sm:$0xff] %v6152_v24  ;;  %v8195_v29 = vld [vmem:[#allocation38_spill] sm:$0xff]  ;;  %v6161_v53 = vld [vmem:[#allocation6 + $0xe98] sm:$0xff]  ;;  %v1050_v21 = vld [vmem:[#allocation6 + $0xee0] sm:$0xff]  ;;  %v2468_v52 = vadd.f32 %v2467_v44, %v2004_v20  ;;  %v1559_v11 = vsub.f32 %v535_v41, %v1047_v37 }
 0x256   :  { %v8196_v58 = vld [vmem:[#allocation166_spill] sm:$0xff]  ;;  %8198 = vst [vmem:[#allocation92_spill] sm:$0xff] %v6161_v53  ;;  %v8199_v62 = vld [vmem:[#allocation165_spill] sm:$0xff]  ;;  %v8200_v33 = vld [vmem:[#allocation171_spill] sm:$0xff]  ;;  %v2595_v0 = vadd.f32 %v2594_v3, %v2005_v12 }
 0x257   :  { %v8197_v55 = vsub.f32 %v8195_v29, %v8196_v58  ;;  %v8201_v7 = vsub.f32 %v8199_v62, %v8200_v33  ;;  %v8202_v19 = vld [vmem:[#allocation167_spill] sm:$0xff]  ;;  %v8205_v49 = vld [vmem:[#allocation172_spill] sm:$0xff]  ;;  %v2066_v29 = vand.u32 2147483647, %v1554_v54  ;;  %v2067_v58 = vand.u32 2147483647, %v1555_v14 }
 0x258   :  { %v8203_v6 = vld [vmem:[#allocation55_spill] sm:$0xff]  ;;  %v8206_v46 = vld [vmem:[#allocation136_spill] sm:$0xff]  ;;  %v539_v61 = vld [vmem:[#allocation3 + $0xee8] sm:$0xff]  ;;  %v2356_v62 = vadd.f32 %v2355_v32, %v2063_v15  ;;  %v2469_v33 = vadd.f32 %v2468_v52, %v2008_v43  ;;  %v1562_v54 = vsub.f32 %v538_v13, %v1050_v21 }
 0x259   :  { %v2012_v8 = vand.u32 2147483647, %v8197_v55  ;;  %v2013_v10 = vand.u32 2147483647, %v8201_v7  ;;  %v8204_v31 = vsub.f32 %v8202_v19, %v8203_v6  ;;  %v8207_v63 = vsub.f32 %v8205_v49, %v8206_v46  ;;  %v6172_v55 = vld [vmem:[#allocation3 + $0xeb0] sm:$0xff]  ;;  %v1051_v59 = vld [vmem:[#allocation6 + $0xee8] sm:$0xff] }
 0x25a   :  { %8208 = vst [vmem:[#allocation185_spill] sm:$0xff] %v6172_v55  ;;  %v2596_v7 = vadd.f32 %v2595_v0, %v2009_v4  ;;  %v6174_v38 = vld [vmem:[#allocation3 + $0xeb8] sm:$0xff]  ;;  %v542_v19 = vld [vmem:[#allocation3 + $0xf00] sm:$0xff]  ;;  %v6176_v20 = vld [vmem:[#allocation6 + $0xeb0] sm:$0xff]  ;;  %v2230_v24 = vadd.f32 %v2229_v50, %v2066_v29 }
 0x25b   :  { %v2016_v9 = vand.u32 2147483647, %v8204_v31  ;;  %v2017_v36 = vand.u32 2147483647, %v8207_v63  ;;  %8209 = vst [vmem:[#allocation118_spill] sm:$0xff] %v6174_v38  ;;  %8210 = vst [vmem:[#allocation23_spill] sm:$0xff] %v6176_v20  ;;  %v2470_v0 = vadd.f32 %v2469_v33, %v2012_v8  ;;  %v1563_v63 = vsub.f32 %v539_v61, %v1051_v59 }
 0x25c   :  { %v8211_v12 = vld [vmem:[#allocation60_spill] sm:$0xff]  ;;  %v6185_v18 = vld [vmem:[#allocation6 + $0xeb8] sm:$0xff]  ;;  %v8215_v4 = vld [vmem:[#allocation173_spill] sm:$0xff]  ;;  %v2597_v46 = vadd.f32 %v2596_v7, %v2013_v10 }
 0x25d   :  { %v8212_v14 = vld [vmem:[#allocation76_spill] sm:$0xff]  ;;  %8214 = vst [vmem:[#allocation190_spill] sm:$0xff] %v6185_v18  ;;  %v8216_v45 = vld [vmem:[#allocation77_spill] sm:$0xff]  ;;  %v8221_v41 = vld [vmem:[#allocation142_spill] sm:$0xff] }
 0x25e   :  { %v8213_v44 = vsub.f32 %v8211_v12, %v8212_v14  ;;  %v1054_v43 = vld [vmem:[#allocation6 + $0xf00] sm:$0xff]  ;;  %v8217_v15 = vsub.f32 %v8215_v4, %v8216_v45  ;;  %v8222_v13 = vld [vmem:[#allocation145_spill] sm:$0xff]  ;;  %v2070_v12 = vand.u32 2147483647, %v1558_v28  ;;  %v2071_v14 = vand.u32 2147483647, %v1559_v11 }
 0x25f   :  { %v8218_v49 = vld [vmem:[#allocation44_spill] sm:$0xff]  ;;  %v8223_v21 = vsub.f32 %v8221_v41, %v8222_v13  ;;  %v543_v53 = vld [vmem:[#allocation3 + $0xf08] sm:$0xff]  ;;  %v2357_v4 = vadd.f32 %v2356_v62, %v2067_v58  ;;  %v2471_v45 = vadd.f32 %v2470_v0, %v2016_v9  ;;  %v6198_v48 = vld [vmem:[#allocation3 + $0xed8] sm:$0xff]  ;;  %v1566_v28 = vsub.f32 %v542_v19, %v1054_v43 }
 0x260   :  { %v2020_v3 = vand.u32 2147483647, %v8213_v44  ;;  %v2021_v32 = vand.u32 2147483647, %v8217_v15  ;;  %v8219_v6 = vld [vmem:[#allocation140_spill] sm:$0xff]  ;;  %v6196_v44 = vld [vmem:[#allocation3 + $0xed0] sm:$0xff]  ;;  %v2598_v15 = vadd.f32 %v2597_v46, %v2017_v36  ;;  %v2231_v20 = vadd.f32 %v2230_v24, %v2070_v12 }
 0x261   :  { %v8220_v31 = vsub.f32 %v8218_v49, %v8219_v6  ;;  %v2025_v37 = vand.u32 2147483647, %v8223_v21  ;;  %v1055_v2 = vld [vmem:[#allocation6 + $0xf08] sm:$0xff]  ;;  %8224 = vst [vmem:[#allocation159_spill] sm:$0xff] %v6198_v48  ;;  %v546_v49 = vld [vmem:[#allocation3 + $0xf20] sm:$0xff]  ;;  %v6200_v8 = vld [vmem:[#allocation6 + $0xed0] sm:$0xff] }
 0x262   :  { %8225 = vst [vmem:[#allocation193_spill] sm:$0xff] %v6200_v8  ;;  %v8226_v10 = vld [vmem:[#allocation85_spill] sm:$0xff]  ;;  %v6209_v50 = vld [vmem:[#allocation6 + $0xed8] sm:$0xff]  ;;  %v1058_v9 = vld [vmem:[#allocation6 + $0xf20] sm:$0xff]  ;;  %v2472_v46 = vadd.f32 %v2471_v45, %v2020_v3  ;;  %v2599_v13 = vadd.f32 %v2598_v15, %v2021_v32  ;;  %v1567_v21 = vsub.f32 %v543_v53, %v1055_v2 }
 0x263   :  { %v2024_v52 = vand.u32 2147483647, %v8220_v31  ;;  %v8227_v11 = vld [vmem:[#allocation73_spill] sm:$0xff]  ;;  %8229 = vst [vmem:[#allocation191_spill] sm:$0xff] %v6209_v50  ;;  %v8230_v36 = vld [vmem:[#allocation176_spill] sm:$0xff]  ;;  %v8233_v41 = vld [vmem:[#allocation147_spill] sm:$0xff] }
 0x264   :  { %v8228_v33 = vsub.f32 %v8226_v10, %v8227_v11  ;;  %v8231_v29 = vld [vmem:[#allocation177_spill] sm:$0xff]  ;;  %v8234_v6 = vld [vmem:[#allocation68_spill] sm:$0xff]  ;;  %v8236_v61 = vld [vmem:[#allocation178_spill] sm:$0xff]  ;;  %v2074_v10 = vand.u32 2147483647, %v1562_v54  ;;  %v1570_v54 = vsub.f32 %v546_v49, %v1058_v9 }
 0x265   :  { %v8232_v58 = vsub.f32 %v8230_v36, %v8231_v29  ;;  %v8235_v31 = vsub.f32 %v8233_v41, %v8234_v6  ;;  %v8237_v19 = vld [vmem:[#allocation84_spill] sm:$0xff]  ;;  %v2075_v11 = vand.u32 2147483647, %v1563_v63  ;;  %v547_v18 = vld [vmem:[#allocation3 + $0xf28] sm:$0xff]  ;;  %v2358_v36 = vadd.f32 %v2357_v4, %v2071_v14  ;;  %v6222_v55 = vld [vmem:[#allocation3 + $0xef8] sm:$0xff] }
 0x266   :  { %v2028_v7 = vand.u32 2147483647, %v8228_v33  ;;  %v8238_v43 = vsub.f32 %v8236_v61, %v8237_v19  ;;  %v6220_v33 = vld [vmem:[#allocation3 + $0xef0] sm:$0xff]  ;;  %v1059_v38 = vld [vmem:[#allocation6 + $0xf28] sm:$0xff]  ;;  %v2473_v29 = vadd.f32 %v2472_v46, %v2024_v52  ;;  %v550_v41 = vld [vmem:[#allocation3 + $0xf40] sm:$0xff]  ;;  %v2232_v48 = vadd.f32 %v2231_v20, %v2074_v10 }
 0x267   :  { %v2029_v62 = vand.u32 2147483647, %v8232_v58  ;;  %v2032_v0 = vand.u32 2147483647, %v8235_v31  ;;  %v2600_v58 = vadd.f32 %v2599_v13, %v2025_v37  ;;  %v6224_v3 = vld [vmem:[#allocation6 + $0xef0] sm:$0xff]  ;;  %v8239_v32 = vld [vmem:[#allocation81_spill] sm:$0xff]  ;;  %v1571_v19 = vsub.f32 %v547_v18, %v1059_v38 }
 0x268   :  { %v2033_v59 = vand.u32 2147483647, %v8238_v43  ;;  %v8240_v63 = vld [vmem:[#allocation180_spill] sm:$0xff]  ;;  %v6233_v24 = vld [vmem:[#allocation6 + $0xef8] sm:$0xff]  ;;  %v8243_v12 = vld [vmem:[#allocation182_spill] sm:$0xff]  ;;  %v2474_v46 = vadd.f32 %v2473_v29, %v2028_v7  ;;  %v1564_v38 = vsub.f32 %v6220_v33, %v6224_v3 }
 0x269   :  { %v8241_v45 = vsub.f32 %v8239_v32, %v8240_v63  ;;  %v1062_v52 = vld [vmem:[#allocation6 + $0xf40] sm:$0xff]  ;;  %v8242_v37 = vld [vmem:[#allocation179_spill] sm:$0xff]  ;;  %v2601_v13 = vadd.f32 %v2600_v58, %v2029_v62  ;;  %v8247_v43 = vld [vmem:[#allocation181_spill] sm:$0xff]  ;;  %v2078_v32 = vand.u32 2147483647, %v1566_v28  ;;  %v1565_v18 = vsub.f32 %v6222_v55, %v6233_v24 }
 0x26a   :  { %v8244_v14 = vsub.f32 %v8242_v37, %v8243_v12  ;;  %v8245_v61 = vld [vmem:[#allocation183_spill] sm:$0xff]  ;;  %v8248_v49 = vld [vmem:[#allocation96_spill] sm:$0xff]  ;;  %v2079_v63 = vand.u32 2147483647, %v1567_v21  ;;  %v551_v2 = vld [vmem:[#allocation3 + $0xf48] sm:$0xff]  ;;  %v2359_v37 = vadd.f32 %v2358_v36, %v2075_v11  ;;  %v2475_v12 = vadd.f32 %v2474_v46, %v2032_v0 }
 0x26b   :  { %v2036_v15 = vand.u32 2147483647, %v8241_v45  ;;  %v8246_v6 = vsub.f32 %v6004_v57, %v8245_v61  ;;  %v8249_v9 = vsub.f32 %v8247_v43, %v8248_v49  ;;  %v6244_v45 = vld [vmem:[#allocation3 + $0xf10] sm:$0xff]  ;;  %v1063_v50 = vld [vmem:[#allocation6 + $0xf48] sm:$0xff]  ;;  %v6246_v8 = vld [vmem:[#allocation3 + $0xf18] sm:$0xff]  ;;  %v1574_v28 = vsub.f32 %v550_v41, %v1062_v52 }
 0x26c   :  { %v2037_v4 = vand.u32 2147483647, %v8244_v14  ;;  %v2602_v14 = vadd.f32 %v2601_v13, %v2033_v59  ;;  %v554_v57 = vld [vmem:[#allocation3 + $0xf60] sm:$0xff]  ;;  %v6248_v7 = vld [vmem:[#allocation6 + $0xf10] sm:$0xff]  ;;  %v8250_v62 = vsub.f32 %v6028_v60, %v6032_v23  ;;  %v6257_v20 = vld [vmem:[#allocation6 + $0xf18] sm:$0xff]  ;;  %v8251_v59 = vsub.f32 %v6030_v1, %v6041_v39 }
 0x26d   :  { %v2040_v31 = vand.u32 2147483647, %v8246_v6  ;;  %v2041_v53 = vand.u32 2147483647, %v8249_v9  ;;  %v1066_v0 = vld [vmem:[#allocation6 + $0xf60] sm:$0xff]  ;;  %v8252_v11 = vsub.f32 %v6052_v34, %v6056_v22  ;;  %v2476_v29 = vadd.f32 %v2475_v12, %v2036_v15  ;;  %v6268_v6 = vld [vmem:[#allocation3 + $0xf30] sm:$0xff] }
 0x26e   :  { %v2044_v21 = vand.u32 2147483647, %v8250_v62  ;;  %v2045_v10 = vand.u32 2147483647, %v8251_v59  ;;  %v2603_v58 = vadd.f32 %v2602_v14, %v2037_v4  ;;  %v1575_v61 = vsub.f32 %v551_v2, %v1063_v50  ;;  %v555_v46 = vld [vmem:[#allocation3 + $0xf68] sm:$0xff]  ;;  %v6270_v9 = vld [vmem:[#allocation3 + $0xf38] sm:$0xff] }
 0x26f   :  { %v2048_v36 = vand.u32 2147483647, %v8252_v11  ;;  %v8253_v41 = vsub.f32 %v6054_v26, %v6065_v35  ;;  %v2082_v60 = vand.u32 2147483647, %v1570_v54  ;;  %v2083_v23 = vand.u32 2147483647, %v1571_v19 }
 0x270   :  { %v1067_v13 = vld [vmem:[#allocation6 + $0xf68] sm:$0xff]  ;;  %v2233_v43 = vadd.f32 %v2232_v48, %v2078_v32  ;;  %v2360_v1 = vadd.f32 %v2359_v37, %v2079_v63  ;;  %v2477_v39 = vadd.f32 %v2476_v29, %v2040_v31  ;;  %v2604_v49 = vadd.f32 %v2603_v58, %v2041_v53  ;;  %v558_v34 = vld [vmem:[#allocation3 + $0xf80] sm:$0xff]  ;;  %v6272_v22 = vld [vmem:[#allocation6 + $0xf30] sm:$0xff] }
 0x271   :  { %v2049_v52 = vand.u32 2147483647, %v8253_v41  ;;  %v1568_v50 = vsub.f32 %v6244_v45, %v6248_v7  ;;  %v1569_v26 = vsub.f32 %v6246_v8, %v6257_v20  ;;  %v1578_v35 = vsub.f32 %v554_v57, %v1066_v0  ;;  %v6281_v48 = vld [vmem:[#allocation6 + $0xf38] sm:$0xff]  ;;  %v1070_v15 = vld [vmem:[#allocation6 + $0xf80] sm:$0xff]  ;;  %v6292_v57 = vld [vmem:[#allocation3 + $0xf50] sm:$0xff] }
 0x272   :  { %v8254_v2 = vsub.f32 %v6076_v27, %v6080_v51  ;;  %v8255_v53 = vsub.f32 %v6078_v56, %v6089_v17  ;;  %v8256_v31 = vsub.f32 %v6100_v40, %v6104_v30  ;;  %v2478_v32 = vadd.f32 %v2477_v39, %v2044_v21  ;;  %v559_v62 = vld [vmem:[#allocation3 + $0xf88] sm:$0xff]  ;;  %v6294_v29 = vld [vmem:[#allocation3 + $0xf58] sm:$0xff]  ;;  %v562_v40 = vld [vmem:[#allocation3 + $0xfa0] sm:$0xff] }
 0x273   :  { %v2605_v63 = vadd.f32 %v2604_v49, %v2045_v10  ;;  %v1579_v37 = vsub.f32 %v555_v46, %v1067_v13  ;;  %v8257_v12 = vsub.f32 %v6102_v25, %v6113_v42  ;;  %v2086_v27 = vand.u32 2147483647, %v1574_v28  ;;  %v1071_v0 = vld [vmem:[#allocation6 + $0xf88] sm:$0xff]  ;;  %v6296_v30 = vld [vmem:[#allocation6 + $0xf50] sm:$0xff]  ;;  %v6305_v58 = vld [vmem:[#allocation6 + $0xf58] sm:$0xff] }
 0x274   :  { %v2052_v54 = vand.u32 2147483647, %v8254_v2  ;;  %v2053_v4 = vand.u32 2147483647, %v8255_v53  ;;  %v2056_v19 = vand.u32 2147483647, %v8256_v31  ;;  %v2234_v59 = vadd.f32 %v2233_v43, %v2082_v60 }
 0x275   :  { %v2057_v14 = vand.u32 2147483647, %v8257_v12  ;;  %v2087_v51 = vand.u32 2147483647, %v1575_v61  ;;  %v2361_v56 = vadd.f32 %v2360_v1, %v2083_v23  ;;  %v2479_v17 = vadd.f32 %v2478_v32, %v2048_v36  ;;  %v1074_v36 = vld [vmem:[#allocation6 + $0xfa0] sm:$0xff]  ;;  %v8259_v61 = vld [vmem:[#allocation186_spill] sm:$0xff] }
 0x276   :  { %v2606_v11 = vadd.f32 %v2605_v63, %v2049_v52  ;;  %v1572_v21 = vsub.f32 %v6268_v6, %v6272_v22  ;;  %v1573_v25 = vsub.f32 %v6270_v9, %v6281_v48  ;;  %v1582_v42 = vsub.f32 %v558_v34, %v1070_v15  ;;  %v8261_v60 = vld [vmem:[#allocation150_spill] sm:$0xff]  ;;  %v8262_v23 = vld [vmem:[#allocation91_spill] sm:$0xff]  ;;  %v8265_v34 = vld [vmem:[#allocation92_spill] sm:$0xff] }
 0x277   :  { %v8258_v28 = vsub.f32 %v6124_v47, %v6128_v16  ;;  %v8260_v41 = vsub.f32 %v6126_v5, %v8259_v61  ;;  %v8263_v46 = vsub.f32 %v8261_v60, %v8262_v23  ;;  %v2480_v43 = vadd.f32 %v2479_v17, %v2052_v54  ;;  %v8264_v49 = vld [vmem:[#allocation187_spill] sm:$0xff]  ;;  %v6316_v53 = vld [vmem:[#allocation3 + $0xf70] sm:$0xff]  ;;  %v563_v31 = vld [vmem:[#allocation3 + $0xfa8] sm:$0xff] }
 0x278   :  { %v2607_v1 = vadd.f32 %v2606_v11, %v2053_v4  ;;  %v1583_v39 = vsub.f32 %v559_v62, %v1071_v0  ;;  %v8266_v2 = vsub.f32 %v8264_v49, %v8265_v34  ;;  %v2090_v47 = vand.u32 2147483647, %v1578_v35  ;;  %v1075_v32 = vld [vmem:[#allocation6 + $0xfa8] sm:$0xff]  ;;  %v6318_v61 = vld [vmem:[#allocation3 + $0xf78] sm:$0xff]  ;;  %v6320_v54 = vld [vmem:[#allocation6 + $0xf70] sm:$0xff] }
 0x279   :  { %v2060_v10 = vand.u32 2147483647, %v8258_v28  ;;  %v2061_v52 = vand.u32 2147483647, %v8260_v41  ;;  %v2064_v13 = vand.u32 2147483647, %v8263_v46  ;;  %v2235_v63 = vadd.f32 %v2234_v59, %v2086_v27 }
 0x27a   :  { %v2065_v15 = vand.u32 2147483647, %v8266_v2  ;;  %v2091_v16 = vand.u32 2147483647, %v1579_v37  ;;  %v2362_v5 = vadd.f32 %v2361_v56, %v2087_v51  ;;  %v2481_v12 = vadd.f32 %v2480_v43, %v2056_v19  ;;  %v566_v41 = vld [vmem:[#allocation3 + $0xfc0] sm:$0xff]  ;;  %v8267_v62 = vld [vmem:[#allocation185_spill] sm:$0xff] }
 0x27b   :  { %v2608_v28 = vadd.f32 %v2607_v1, %v2057_v14  ;;  %v1576_v4 = vsub.f32 %v6292_v57, %v6296_v30  ;;  %v1577_v35 = vsub.f32 %v6294_v29, %v6305_v58  ;;  %v1586_v37 = vsub.f32 %v562_v40, %v1074_v36  ;;  %v8268_v0 = vld [vmem:[#allocation23_spill] sm:$0xff]  ;;  %v1078_v19 = vld [vmem:[#allocation6 + $0xfc0] sm:$0xff]  ;;  %v8270_v14 = vld [vmem:[#allocation118_spill] sm:$0xff] }
 0x27c   :  { %v8269_v17 = vsub.f32 %v8267_v62, %v8268_v0  ;;  %v6329_v27 = vld [vmem:[#allocation6 + $0xf78] sm:$0xff]  ;;  %v8271_v51 = vld [vmem:[#allocation190_spill] sm:$0xff]  ;;  %v8273_v60 = vld [vmem:[#allocation193_spill] sm:$0xff]  ;;  %v2482_v57 = vadd.f32 %v2481_v12, %v2060_v10  ;;  %v1587_v43 = vsub.f32 %v563_v31, %v1075_v32  ;;  %v2094_v1 = vand.u32 2147483647, %v1582_v42 }
 0x27d   :  { %v8272_v59 = vsub.f32 %v8270_v14, %v8271_v51  ;;  %v8274_v23 = vsub.f32 %v6196_v44, %v8273_v60  ;;  %v2609_v30 = vadd.f32 %v2608_v28, %v2061_v52  ;;  %v8275_v29 = vld [vmem:[#allocation159_spill] sm:$0xff]  ;;  %v2095_v49 = vand.u32 2147483647, %v1583_v39  ;;  %v6340_v34 = vld [vmem:[#allocation3 + $0xf90] sm:$0xff]  ;;  %v567_v2 = vld [vmem:[#allocation3 + $0xfc8] sm:$0xff] }
 0x27e   :  { %v2068_v11 = vand.u32 2147483647, %v8269_v17  ;;  %v8276_v40 = vld [vmem:[#allocation191_spill] sm:$0xff]  ;;  %v1079_v62 = vld [vmem:[#allocation6 + $0xfc8] sm:$0xff]  ;;  %v2236_v0 = vadd.f32 %v2235_v63, %v2090_v47  ;;  %v2363_v17 = vadd.f32 %v2362_v5, %v2091_v16  ;;  %v2483_v14 = vadd.f32 %v2482_v57, %v2064_v13  ;;  %v570_v44 = vld [vmem:[#allocation3 + $0xfe0] sm:$0xff] }
 0x27f   :  { %v2069_v56 = vand.u32 2147483647, %v8272_v59  ;;  %v2072_v46 = vand.u32 2147483647, %v8274_v23  ;;  %v8277_v58 = vsub.f32 %v8275_v29, %v8276_v40  ;;  %v2610_v51 = vadd.f32 %v2609_v30, %v2065_v15  ;;  %v561_v59 = vld [vmem:[#allocation3 + $0xf98] sm:$0xff]  ;;  %v1072_v60 = vld [vmem:[#allocation6 + $0xf90] sm:$0xff] }
 0x280   :  { %v1580_v10 = vsub.f32 %v6316_v53, %v6320_v54  ;;  %v1581_v52 = vsub.f32 %v6318_v61, %v6329_v27  ;;  %v1590_v31 = vsub.f32 %v566_v41, %v1078_v19  ;;  %v2076_v42 = vand.u32 2147483647, %v1564_v38  ;;  %v1073_v39 = vld [vmem:[#allocation6 + $0xf98] sm:$0xff]  ;;  %v1082_v32 = vld [vmem:[#allocation6 + $0xfe0] sm:$0xff]  ;;  %v564_v3 = vld [vmem:[#allocation3 + $0xfb0] sm:$0xff] }
 0x281   :  { %v2073_v36 = vand.u32 2147483647, %v8277_v58  ;;  %v2077_v13 = vand.u32 2147483647, %v1565_v18  ;;  %v2080_v15 = vand.u32 2147483647, %v1568_v50  ;;  %v2484_v47 = vadd.f32 %v2483_v14, %v2068_v11 }
 0x282   :  { %v2611_v16 = vadd.f32 %v2610_v51, %v2069_v56  ;;  %v1591_v53 = vsub.f32 %v567_v2, %v1079_v62  ;;  %v2081_v63 = vand.u32 2147483647, %v1569_v26  ;;  %v2098_v5 = vand.u32 2147483647, %v1586_v37  ;;  %v571_v38 = vld [vmem:[#allocation3 + $0xfe8] sm:$0xff]  ;;  %v565_v18 = vld [vmem:[#allocation3 + $0xfb8] sm:$0xff] }
 0x283   :  { %v2099_v33 = vand.u32 2147483647, %v1587_v43  ;;  %v1083_v12 = vld [vmem:[#allocation6 + $0xfe8] sm:$0xff]  ;;  %v2237_v28 = vadd.f32 %v2236_v0, %v2094_v1  ;;  %v2364_v61 = vadd.f32 %v2363_v17, %v2095_v49  ;;  %v2485_v55 = vadd.f32 %v2484_v47, %v2072_v46  ;;  %v568_v41 = vld [vmem:[#allocation3 + $0xfd0] sm:$0xff]  ;;  %v1077_v20 = vld [vmem:[#allocation6 + $0xfb8] sm:$0xff] }
 0x284   :  { %v2612_v24 = vadd.f32 %v2611_v16, %v2073_v36  ;;  %v1076_v45 = vld [vmem:[#allocation6 + $0xfb0] sm:$0xff]  ;;  %v1584_v7 = vsub.f32 %v6340_v34, %v1072_v60  ;;  %v1585_v50 = vsub.f32 %v561_v59, %v1073_v39  ;;  %v1594_v54 = vsub.f32 %v570_v44, %v1082_v32  ;;  %v569_v30 = vld [vmem:[#allocation3 + $0xfd8] sm:$0xff] }
 0x285   :  { %v2084_v8 = vand.u32 2147483647, %v1572_v21  ;;  %v1080_v26 = vld [vmem:[#allocation6 + $0xfd0] sm:$0xff]  ;;  %v2085_v37 = vand.u32 2147483647, %v1573_v25  ;;  %v2486_v27 = vadd.f32 %v2485_v55, %v2076_v42  ;;  %v1595_v56 = vsub.f32 %v571_v38, %v1083_v12  ;;  %v1081_v43 = vld [vmem:[#allocation6 + $0xfd8] sm:$0xff] }
 0x286   :  { %v2088_v11 = vand.u32 2147483647, %v1576_v4  ;;  %v2613_v19 = vadd.f32 %v2612_v24, %v2077_v13  ;;  %v2089_v23 = vand.u32 2147483647, %v1577_v35  ;;  %v2102_v46 = vand.u32 2147483647, %v1590_v31 }
 0x287   :  { %v2103_v57 = vand.u32 2147483647, %v1591_v53  ;;  %v2238_v29 = vadd.f32 %v2237_v28, %v2098_v5  ;;  %v2365_v40 = vadd.f32 %v2364_v61, %v2099_v33  ;;  %v2487_v58 = vadd.f32 %v2486_v27, %v2080_v15  ;;  %v572_v22 = vld [vmem:[#allocation3 + $0xff0] sm:$0xff]  ;;  %v573_v21 = vld [vmem:[#allocation3 + $0xff8] sm:$0xff] }
 0x288   :  { %v2614_v6 = vadd.f32 %v2613_v19, %v2081_v63  ;;  %v1588_v36 = vsub.f32 %v564_v3, %v1076_v45  ;;  %v1589_v1 = vsub.f32 %v565_v18, %v1077_v20  ;;  %v1592_v49 = vsub.f32 %v568_v41, %v1080_v26  ;;  %v1084_v48 = vld [vmem:[#allocation6 + $0xff0] sm:$0xff]  ;;  %v1085_v25 = vld [vmem:[#allocation6 + $0xff8] sm:$0xff] }
 0x289   :  { %v2092_v9 = vand.u32 2147483647, %v1580_v10  ;;  %v2093_v4 = vand.u32 2147483647, %v1581_v52  ;;  %v2096_v34 = vand.u32 2147483647, %v1584_v7  ;;  %v2488_v2 = vadd.f32 %v2487_v58, %v2084_v8 }
 0x28a   :  { %v2615_v35 = vadd.f32 %v2614_v6, %v2085_v37  ;;  %v1593_v62 = vsub.f32 %v569_v30, %v1081_v43  ;;  %v2097_v0 = vand.u32 2147483647, %v1585_v50  ;;  %v2106_v17 = vand.u32 2147483647, %v1594_v54 }
 0x28b   :  { %v2107_v14 = vand.u32 2147483647, %v1595_v56  ;;  %v2239_v51 = vadd.f32 %v2238_v29, %v2102_v46  ;;  %v2366_v59 = vadd.f32 %v2365_v40, %v2103_v57  ;;  %v2489_v44 = vadd.f32 %v2488_v2, %v2088_v11 }
 0x28c   :  { %v2616_v60 = vadd.f32 %v2615_v35, %v2089_v23  ;;  %v1596_v31 = vsub.f32 %v572_v22, %v1084_v48  ;;  %v1597_v42 = vsub.f32 %v573_v21, %v1085_v25  ;;  %v2100_v39 = vand.u32 2147483647, %v1588_v36 }
 0x28d   :  { %v2101_v32 = vand.u32 2147483647, %v1589_v1  ;;  %v2490_v13 = vadd.f32 %v2489_v44, %v2092_v9  ;;  %v2104_v15 = vand.u32 2147483647, %v1592_v49  ;;  %v2105_v47 = vand.u32 2147483647, %v1593_v62 }
 0x28e   :  { %v2617_v10 = vadd.f32 %v2616_v60, %v2093_v4  ;;  %v2240_v52 = vadd.f32 %v2239_v51, %v2106_v17  ;;  %v2367_v16 = vadd.f32 %v2366_v59, %v2107_v14  ;;  %v2108_v5 = vand.u32 2147483647, %v1596_v31 }
 0x28f   :  { %v2491_v53 = vadd.f32 %v2490_v13, %v2096_v34  ;;  %v2109_v33 = vand.u32 2147483647, %v1597_v42 }
 0x290   :  { %v2618_v63 = vadd.f32 %v2617_v10, %v2097_v0  ;;  %v2637_v61 = vadd.f32 %v2367_v16, %v2240_v52 }
 0x291   :  { %v2492_v3 = vadd.f32 %v2491_v53, %v2100_v39 }
 0x292   :  { %v2619_v38 = vadd.f32 %v2618_v63, %v2101_v32 }
 0x293   :  { %v2493_v12 = vadd.f32 %v2492_v3, %v2104_v15 }
 0x294   :  { %v2620_v28 = vadd.f32 %v2619_v38, %v2105_v47 }
 0x295   :  { %v2494_v55 = vadd.f32 %v2493_v12, %v2108_v5 }
 0x296   :  { %v2621_v24 = vadd.f32 %v2620_v28, %v2109_v33 }
 0x297   :  { %v2638_v18 = vadd.f32 %v2637_v61, %v2494_v55 }
 0x299   :  { %v2639_v41 = vadd.f32 %v2638_v18, %v2621_v24 }
 0x29b   :  { %2640 = vadd.xlane.f32.xlu0 %v2639_v41 }
 0x328   :  { %v2641_v45 = vpop.xlane.xlu0 %2640 }
 0x329   :  { %v2642_v7 = vrot.slane %v2641_v45, 4 }
 0x32b   :  { %v2643_v50 = vadd.f32 %v2642_v7, %v2641_v45 }
 0x32d   :  { %v2644_v54 = vrot.slane %v2643_v50, 2 }
 0x32f   :  { %v2645_v8 = vadd.f32 %v2644_v54, %v2643_v50 }
 0x331   :  { %v2646_v20 = vrot.slane %v2645_v8, 1 }
 0x333   :  { %v2647_v26 = vadd.f32 %v2646_v20, %v2645_v8 }
 0x335   :  { %2666 = vpush %v2647_v26 }
 0x366   :  { %s2667_s1 = spop %2666 }
 0x367   :  { %2650 = sst [smem:[#allocation8]] %s2667_s1 }
 0x368   :  { %2726 = shalt.err (!%p2723_p4)
}
 0x369   :  { %s2737_s13 = smov [#allocation8]  }
 0x36a   :  { %2658 = dma.smem_to_hbm %s2737_s13, 16, %s6379_s2, [#allocation5]  }
 0x36b   :  { %2731 = dma.done.wait [#allocation5], 16  }
 0x36c   :  { %2732 = vsyncadd [#allocation5], 4294967280 }
 0x36d   :  { %2662 = sfence }
 0x36e   :  { %2663 = vsyncpa [#allocation4], 1 }
 0x36f   :  { %2664 = vsyncpa [#allocation7], 1 }
 0x370   :  { %2665 = vsyncpa [#allocation5], 1 }

</bundles_post_ra>
